<compile_context>
chip_gen: v7x
topology: tpu7x:2x2x1
jax: 0.10.0
libtpu: 0.0.40
codegen_flags: <defaults>
</compile_context>

<pallas_src>
import jax
import jax.numpy as jnp
from jax import lax
from jax.experimental import pallas as pl
from jax.experimental.pallas import tpu as pltpu

STATE_FEATURES = 4       # C_in
OUT_CHANNELS = 256       # fixed by the module (Conv2d(..., 256, 3))
BN_EPS = 1e-5


# --------------------------------------------------------------------------
# Fused two-pass kernel: pass 0 = conv matmul + batch statistics,
#                        pass 1 = conv matmul (recompute) + BN scale/shift + ReLU.
# --------------------------------------------------------------------------
def _make_kernel(TB, NB, HWp, inv_M, eps):
    cols = TB * HWp
    n_chunks = cols // 128

    def kernel(p_ref, w_ref, gamma_ref, beta_ref, out_ref,
               sum_ref, ssq_ref, scale_ref, shift_ref):
        p = pl.program_id(0)   # 0: statistics pass, 1: apply pass
        j = pl.program_id(1)   # sample-group index

        # Conv as one wide matmul: (Cout, K)bf16 @ (K, TB*HWp)bf16 -> (Cout, TB*HWp)f32.
        y = jnp.dot(w_ref[...], p_ref[0], preferred_element_type=jnp.float32)

        @pl.when(jnp.logical_and(p == 0, j == 0))
        def _init():
            sum_ref[...] = jnp.zeros_like(sum_ref)
            ssq_ref[...] = jnp.zeros_like(ssq_ref)

        @pl.when(p == 0)
        def _stats():
            # Lane-wise (pure VALU) accumulation into (Cout, 128) scratch using
            # vreg-aligned 128-lane slices; no per-step cross-lane reduce.
            for t in range(n_chunks):                     # static, small unroll
                chunk = y[:, t * 128:(t + 1) * 128]
                sum_ref[...] += chunk
                ssq_ref[...] += chunk * chunk

        @pl.when(jnp.logical_and(p == 0, j == NB - 1))
        def _finalize_stats():
            # Single 128->1 cross-lane reduce for the whole batch.
            mean = jnp.sum(sum_ref[...], axis=1, keepdims=True) * inv_M   # (Cout, 1)
            ex2 = jnp.sum(ssq_ref[...], axis=1, keepdims=True) * inv_M
            var = jnp.maximum(ex2 - mean * mean, 0.0)     # biased var, clamp cancellation
            inv_std = lax.rsqrt(var + eps)                # EUP, ~free
            scale = gamma_ref[...] * inv_std              # (Cout, 1)
            scale_ref[...] = scale
            shift_ref[...] = beta_ref[...] - mean * scale

        @pl.when(p == 1)
        def _apply():
            # BN + ReLU fused into the producing pass (scale/shift broadcast once).
            yb = jnp.maximum(y * scale_ref[...] + shift_ref[...], 0.0)
            # Scatter the TB per-sample (Cout, HWp) slabs into the NCHW-ordered output
            # block; slices are 128-lane aligned -> unmasked, lane-dense stores.
            for t in range(TB):                           # static, small unroll
                out_ref[t] = yb[:, t * HWp:(t + 1) * HWp]

    return kernel


# --------------------------------------------------------------------------
# Host-side wrapper
# --------------------------------------------------------------------------
@jax.jit
def conv_block_forward(x, w, gamma, beta):
    """ConvBlock forward. x: (N, C_in, H, W) f32 -> (N, 256, H, W) f32.

    Conv bias omitted: training-mode BatchNorm (batch statistics) cancels it exactly.
    """
    N, C, H, W = x.shape
    Cout = w.shape[0]
    HW = H * W
    HWp = ((HW + 127) // 128) * 128        # lane-dense guard for odd board sizes
    K = 9 * C

    # Samples per grid step: make the RHS free dim wide (<= 4096 columns).
    TB = 1
    for cand in (16, 8, 4, 2, 1):
        if N % cand == 0 and cand * HWp <= 4096:
            TB = cand
            break
    NB = N // TB
    cols = TB * HWp

    # Host-side transposed im2col, grouped so each grid step sees a (K, TB*HWp) slab.
    # TODO(synk): move this into the kernel (pltpu.roll taps) for real batch sizes.
    xp = jnp.pad(x, ((0, 0), (0, 0), (1, 1), (1, 1)))
    taps = [xp[:, :, kh:kh + H, kw:kw + W]
            for kh in range(3) for kw in range(3)]                 # 9 x (N, C, H, W)
    patches = jnp.stack(taps, axis=1).reshape(N, K, HW)            # (N, 9*C, H*W)
    if HWp != HW:
        patches = jnp.pad(patches, ((0, 0), (0, 0), (0, HWp - HW)))
    patches = (patches.reshape(NB, TB, K, HWp)
                      .transpose(0, 2, 1, 3)
                      .reshape(NB, K, cols)
                      .astype(jnp.bfloat16))                       # MXU-native dtype
    w_mat = (jnp.transpose(w, (0, 2, 3, 1)).reshape(Cout, K)       # (kh,kw,c) order
             .astype(jnp.bfloat16))
    g_col = gamma.reshape(Cout, 1).astype(jnp.float32)
    b_col = beta.reshape(Cout, 1).astype(jnp.float32)

    inv_M = 1.0 / float(N * HW)            # BN batch size (unpadded), biased variance
    kernel = _make_kernel(TB, NB, HWp, inv_M, BN_EPS)

    flops = 2 * 2 * Cout * K * N * HWp     # two passes over the conv matmul
    bytes_accessed = (patches.size * 2 * 2          # patches read in both passes (bf16)
                      + w_mat.size * 2
                      + N * Cout * HWp * 4          # output write (f32)
                      + 4 * Cout * 4)

    out = pl.pallas_call(
        kernel,
        out_shape=jax.ShapeDtypeStruct((N, Cout, HWp), jnp.float32),
        grid_spec=pltpu.PrefetchScalarGridSpec(
            num_scalar_prefetch=0,
            grid=(2, NB),                                   # (pass, sample-group)
            in_specs=[
                pl.BlockSpec((1, K, cols), lambda p, j: (j, 0, 0)),   # patch slab
                pl.BlockSpec((Cout, K), lambda p, j: (0, 0)),         # weights
                pl.BlockSpec((Cout, 1), lambda p, j: (0, 0)),         # gamma
                pl.BlockSpec((Cout, 1), lambda p, j: (0, 0)),         # beta
            ],
            # Pass 0 never writes the output; p*j keeps the block index parked at 0
            # during pass 0 so no stale block is ever flushed, then pass 1 walks the
            # blocks in order and each is written back exactly once (pipelined).
            out_specs=pl.BlockSpec((TB, Cout, HWp), lambda p, j: (p * j, 0, 0)),
            scratch_shapes=[
                pltpu.VMEM((Cout, 128), jnp.float32),   # per-channel partial sums
                pltpu.VMEM((Cout, 128), jnp.float32),   # per-channel partial sum-of-squares
                pltpu.VMEM((Cout, 1), jnp.float32),     # BN scale = gamma * rsqrt(var+eps)
                pltpu.VMEM((Cout, 1), jnp.float32),     # BN shift = beta - mean*scale
            ],
        ),
        compiler_params=pltpu.CompilerParams(
            # Stats accumulation (pass 0) and the pass-0 -> pass-1 dependency require
            # strictly sequential execution on both grid axes.
            dimension_semantics=("arbitrary", "arbitrary"),
            vmem_limit_bytes=32 * 1024 * 1024),
        cost_estimate=pl.CostEstimate(flops=flops, transcendentals=Cout,
                                      bytes_accessed=bytes_accessed),
    )(patches, w_mat, g_col, b_col)

    if HWp != HW:
        out = out[..., :HW]
    # (N, Cout, H*W) is already NCHW memory layout -> free reshape, no transpose.
    return out.reshape(N, Cout, H, W)


# --------------------------------------------------------------------------
# Reference (plain JAX) — includes the conv bias to show the bias-free kernel
# matches the full module semantics (training-mode BatchNorm).
# --------------------------------------------------------------------------
def conv_block_reference(x, w, b, gamma, beta):
    y = lax.conv_general_dilated(
        x, w, window_strides=(1, 1), padding=((1, 1), (1, 1)),
        dimension_numbers=("NCHW", "OIHW", "NCHW"))
    y = y + b.reshape(1, -1, 1, 1)
    mean = jnp.mean(y, axis=(0, 2, 3), keepdims=True)
    var = jnp.mean((y - mean) ** 2, axis=(0, 2, 3), keepdims=True)
    y = (y - mean) * lax.rsqrt(var + BN_EPS)
    y = y * gamma.reshape(1, -1, 1, 1) + beta.reshape(1, -1, 1, 1)
    return jnp.maximum(y, 0.0)


if __name__ == "__main__":
    key = jax.random.PRNGKey(0)
    k_x, k_w, k_b = jax.random.split(key, 3)

    N, C, H, W = 2, STATE_FEATURES, 16, 16
    x = jax.random.normal(k_x, (N, C, H, W), dtype=jnp.float32)

    # Parameter shapes from nn.Conv2d(C, 256, 3) / nn.BatchNorm2d(256).
    fan_in = C * 3 * 3
    bound = 1.0 / (fan_in ** 0.5)
    w = jax.random.uniform(k_w, (OUT_CHANNELS, C, 3, 3), jnp.float32, -bound, bound)
    b = jax.random.uniform(k_b, (OUT_CHANNELS,), jnp.float32, -bound, bound)
    gamma = jnp.ones((OUT_CHANNELS,), jnp.float32)
    beta = jnp.zeros((OUT_CHANNELS,), jnp.float32)

    out = conv_block_forward(x, w, gamma, beta)
    out = jax.block_until_ready(out)

    ref = conv_block_reference(x, w, b, gamma, beta)
    assert out.shape == (N, OUT_CHANNELS, H, W), out.shape
    max_err = float(jnp.max(jnp.abs(out - ref)))
    # bf16 matmul inputs (f32 accumulation): tolerance loosened accordingly.
    assert jnp.allclose(out, ref, rtol=2e-2, atol=5e-2), max_err

    print("KERNEL_OK")
</pallas_src>

<mosaic_0001>
module attributes {stable_mosaic.version = 11 : i64} {
  func.func @kernel(%arg0: i32, %arg1: i32, %arg2: memref<1x36x512xbf16, #tpu.memory_space<vmem>>, %arg3: memref<256x36xbf16, #tpu.memory_space<vmem>>, %arg4: memref<256x1xf32, #tpu.memory_space<vmem>>, %arg5: memref<256x1xf32, #tpu.memory_space<vmem>>, %arg6: memref<2x256x256xf32, #tpu.memory_space<vmem>>, %arg7: memref<256x128xf32, #tpu.memory_space<vmem>>, %arg8: memref<256x128xf32, #tpu.memory_space<vmem>>, %arg9: memref<256x1xf32, #tpu.memory_space<vmem>>, %arg10: memref<256x1xf32, #tpu.memory_space<vmem>>) attributes {dimension_semantics = [#tpu.dimension_semantics<arbitrary>, #tpu.dimension_semantics<arbitrary>], iteration_bounds = array<i64: 2, 1>, scalar_prefetch = 0 : i64, scratch_operands = 4 : i64, tpu.core_type = #tpu.core_type<tc>, window_params = [{transform_indices = @transform_0, window_bounds = array<i64: 1, 36, 512>}, {pipeline_mode = #tpu.pipeline_mode<synchronous>, transform_indices = @transform_1, window_bounds = array<i64: 256, 36>}, {pipeline_mode = #tpu.pipeline_mode<synchronous>, transform_indices = @transform_2, window_bounds = array<i64: 256, 1>}, {pipeline_mode = #tpu.pipeline_mode<synchronous>, transform_indices = @transform_3, window_bounds = array<i64: 256, 1>}, {transform_indices = @transform_4, window_bounds = array<i64: 2, 256, 256>}]} {
    %c0 = arith.constant 0 : index
    %c0_0 = arith.constant 0 : index
    %0 = vector.load %arg3[%c0, %c0_0] : memref<256x36xbf16, #tpu.memory_space<vmem>>, vector<256x36xbf16>
    %c0_1 = arith.constant 0 : index
    %c0_2 = arith.constant 0 : index
    %c0_3 = arith.constant 0 : index
    %1 = vector.load %arg2[%c0_1, %c0_2, %c0_3] : memref<1x36x512xbf16, #tpu.memory_space<vmem>>, vector<1x36x512xbf16>
    %2 = vector.shape_cast %1 : vector<1x36x512xbf16> to vector<36x512xbf16>
    %cst = arith.constant dense<0.000000e+00> : vector<256x512xf32>
    %3 = tpu.matmul %0, %2, %cst {dimension_numbers = #tpu.dot_dimension_numbers<[1], [0], [0], [1], [0, 0, 1, 1], [], []>} : vector<256x36xbf16>, vector<36x512xbf16>, vector<256x512xf32> -> vector<256x512xf32>
    %c0_i32 = arith.constant 0 : i32
    %4 = arith.cmpi eq, %arg0, %c0_i32 : i32
    %c0_i32_4 = arith.constant 0 : i32
    %5 = arith.cmpi eq, %arg1, %c0_i32_4 : i32
    %6 = arith.andi %4, %5 : i1
    %7 = arith.extui %6 : i1 to i32
    %c0_i32_5 = arith.constant 0 : i32
    %8 = arith.cmpi ne, %7, %c0_i32_5 : i32
    scf.if %8 {
      %cst_12 = arith.constant 0.000000e+00 : f32
      %20 = vector.broadcast %cst_12 : f32 to vector<256x128xf32>
      %c0_13 = arith.constant 0 : index
      %c0_14 = arith.constant 0 : index
      %21 = vector.load %arg7[%c0_13, %c0_14] : memref<256x128xf32, #tpu.memory_space<vmem>>, vector<256x128xf32>
      tpu.vector_store %arg7[%c0_13, %c0_14], %20 {strides = array<i32>} : memref<256x128xf32, #tpu.memory_space<vmem>>, vector<256x128xf32>,
      %cst_15 = arith.constant 0.000000e+00 : f32
      %22 = vector.broadcast %cst_15 : f32 to vector<256x128xf32>
      %c0_16 = arith.constant 0 : index
      %c0_17 = arith.constant 0 : index
      %23 = vector.load %arg8[%c0_16, %c0_17] : memref<256x128xf32, #tpu.memory_space<vmem>>, vector<256x128xf32>
      tpu.vector_store %arg8[%c0_16, %c0_17], %22 {strides = array<i32>} : memref<256x128xf32, #tpu.memory_space<vmem>>, vector<256x128xf32>,
    } else {
    }
    %c0_i32_6 = arith.constant 0 : i32
    %9 = arith.cmpi eq, %arg0, %c0_i32_6 : i32
    %10 = arith.extui %9 : i1 to i32
    %c0_i32_7 = arith.constant 0 : i32
    %11 = arith.cmpi ne, %10, %c0_i32_7 : i32
    scf.if %11 {
      %20 = vector.extract_strided_slice %3 {offsets = [0, 0], sizes = [256, 128], strides = [1, 1]} : vector<256x512xf32> to vector<256x128xf32>
      %c0_12 = arith.constant 0 : index
      %c0_13 = arith.constant 0 : index
      %21 = vector.load %arg7[%c0_12, %c0_13] : memref<256x128xf32, #tpu.memory_space<vmem>>, vector<256x128xf32>
      %22 = arith.addf %21, %20 : vector<256x128xf32>
      %c0_14 = arith.constant 0 : index
      %c0_15 = arith.constant 0 : index
      %23 = vector.load %arg7[%c0_14, %c0_15] : memref<256x128xf32, #tpu.memory_space<vmem>>, vector<256x128xf32>
      tpu.vector_store %arg7[%c0_14, %c0_15], %22 {strides = array<i32>} : memref<256x128xf32, #tpu.memory_space<vmem>>, vector<256x128xf32>,
      %c0_16 = arith.constant 0 : index
      %c0_17 = arith.constant 0 : index
      %24 = vector.load %arg8[%c0_16, %c0_17] : memref<256x128xf32, #tpu.memory_space<vmem>>, vector<256x128xf32>
      %25 = arith.mulf %20, %20 : vector<256x128xf32>
      %26 = arith.addf %24, %25 : vector<256x128xf32>
      %c0_18 = arith.constant 0 : index
      %c0_19 = arith.constant 0 : index
      %27 = vector.load %arg8[%c0_18, %c0_19] : memref<256x128xf32, #tpu.memory_space<vmem>>, vector<256x128xf32>
      tpu.vector_store %arg8[%c0_18, %c0_19], %26 {strides = array<i32>} : memref<256x128xf32, #tpu.memory_space<vmem>>, vector<256x128xf32>,
      %28 = vector.extract_strided_slice %3 {offsets = [0, 128], sizes = [256, 128], strides = [1, 1]} : vector<256x512xf32> to vector<256x128xf32>
      %c0_20 = arith.constant 0 : index
      %c0_21 = arith.constant 0 : index
      %29 = vector.load %arg7[%c0_20, %c0_21] : memref<256x128xf32, #tpu.memory_space<vmem>>, vector<256x128xf32>
      %30 = arith.addf %29, %28 : vector<256x128xf32>
      %c0_22 = arith.constant 0 : index
      %c0_23 = arith.constant 0 : index
      %31 = vector.load %arg7[%c0_22, %c0_23] : memref<256x128xf32, #tpu.memory_space<vmem>>, vector<256x128xf32>
      tpu.vector_store %arg7[%c0_22, %c0_23], %30 {strides = array<i32>} : memref<256x128xf32, #tpu.memory_space<vmem>>, vector<256x128xf32>,
      %c0_24 = arith.constant 0 : index
      %c0_25 = arith.constant 0 : index
      %32 = vector.load %arg8[%c0_24, %c0_25] : memref<256x128xf32, #tpu.memory_space<vmem>>, vector<256x128xf32>
      %33 = arith.mulf %28, %28 : vector<256x128xf32>
      %34 = arith.addf %32, %33 : vector<256x128xf32>
      %c0_26 = arith.constant 0 : index
      %c0_27 = arith.constant 0 : index
      %35 = vector.load %arg8[%c0_26, %c0_27] : memref<256x128xf32, #tpu.memory_space<vmem>>, vector<256x128xf32>
      tpu.vector_store %arg8[%c0_26, %c0_27], %34 {strides = array<i32>} : memref<256x128xf32, #tpu.memory_space<vmem>>, vector<256x128xf32>,
      %36 = vector.extract_strided_slice %3 {offsets = [0, 256], sizes = [256, 128], strides = [1, 1]} : vector<256x512xf32> to vector<256x128xf32>
      %c0_28 = arith.constant 0 : index
      %c0_29 = arith.constant 0 : index
      %37 = vector.load %arg7[%c0_28, %c0_29] : memref<256x128xf32, #tpu.memory_space<vmem>>, vector<256x128xf32>
      %38 = arith.addf %37, %36 : vector<256x128xf32>
      %c0_30 = arith.constant 0 : index
      %c0_31 = arith.constant 0 : index
      %39 = vector.load %arg7[%c0_30, %c0_31] : memref<256x128xf32, #tpu.memory_space<vmem>>, vector<256x128xf32>
      tpu.vector_store %arg7[%c0_30, %c0_31], %38 {strides = array<i32>} : memref<256x128xf32, #tpu.memory_space<vmem>>, vector<256x128xf32>,
      %c0_32 = arith.constant 0 : index
      %c0_33 = arith.constant 0 : index
      %40 = vector.load %arg8[%c0_32, %c0_33] : memref<256x128xf32, #tpu.memory_space<vmem>>, vector<256x128xf32>
      %41 = arith.mulf %36, %36 : vector<256x128xf32>
      %42 = arith.addf %40, %41 : vector<256x128xf32>
      %c0_34 = arith.constant 0 : index
      %c0_35 = arith.constant 0 : index
      %43 = vector.load %arg8[%c0_34, %c0_35] : memref<256x128xf32, #tpu.memory_space<vmem>>, vector<256x128xf32>
      tpu.vector_store %arg8[%c0_34, %c0_35], %42 {strides = array<i32>} : memref<256x128xf32, #tpu.memory_space<vmem>>, vector<256x128xf32>,
      %44 = vector.extract_strided_slice %3 {offsets = [0, 384], sizes = [256, 128], strides = [1, 1]} : vector<256x512xf32> to vector<256x128xf32>
      %c0_36 = arith.constant 0 : index
      %c0_37 = arith.constant 0 : index
      %45 = vector.load %arg7[%c0_36, %c0_37] : memref<256x128xf32, #tpu.memory_space<vmem>>, vector<256x128xf32>
      %46 = arith.addf %45, %44 : vector<256x128xf32>
      %c0_38 = arith.constant 0 : index
      %c0_39 = arith.constant 0 : index
      %47 = vector.load %arg7[%c0_38, %c0_39] : memref<256x128xf32, #tpu.memory_space<vmem>>, vector<256x128xf32>
      tpu.vector_store %arg7[%c0_38, %c0_39], %46 {strides = array<i32>} : memref<256x128xf32, #tpu.memory_space<vmem>>, vector<256x128xf32>,
      %c0_40 = arith.constant 0 : index
      %c0_41 = arith.constant 0 : index
      %48 = vector.load %arg8[%c0_40, %c0_41] : memref<256x128xf32, #tpu.memory_space<vmem>>, vector<256x128xf32>
      %49 = arith.mulf %44, %44 : vector<256x128xf32>
      %50 = arith.addf %48, %49 : vector<256x128xf32>
      %c0_42 = arith.constant 0 : index
      %c0_43 = arith.constant 0 : index
      %51 = vector.load %arg8[%c0_42, %c0_43] : memref<256x128xf32, #tpu.memory_space<vmem>>, vector<256x128xf32>
      tpu.vector_store %arg8[%c0_42, %c0_43], %50 {strides = array<i32>} : memref<256x128xf32, #tpu.memory_space<vmem>>, vector<256x128xf32>,
    } else {
    }
    %c0_i32_8 = arith.constant 0 : i32
    %12 = arith.cmpi eq, %arg0, %c0_i32_8 : i32
    %c0_i32_9 = arith.constant 0 : i32
    %13 = arith.cmpi eq, %arg1, %c0_i32_9 : i32
    %14 = arith.andi %12, %13 : i1
    %15 = arith.extui %14 : i1 to i32
    %c0_i32_10 = arith.constant 0 : i32
    %16 = arith.cmpi ne, %15, %c0_i32_10 : i32
    scf.if %16 {
      %c0_12 = arith.constant 0 : index
      %c0_13 = arith.constant 0 : index
      %20 = vector.load %arg7[%c0_12, %c0_13] : memref<256x128xf32, #tpu.memory_space<vmem>>, vector<256x128xf32>
      %cst_14 = arith.constant dense<0.000000e+00> : vector<256xf32>
      %21 = vector.multi_reduction <add>, %20, %cst_14 [1] : vector<256x128xf32> to vector<256xf32>
      %22 = vector.shape_cast %21 : vector<256xf32> to vector<256x1xf32>
      %cst_15 = arith.constant 0.001953125 : f32
      %23 = vector.broadcast %cst_15 : f32 to vector<256x1xf32>
      %24 = arith.mulf %22, %23 : vector<256x1xf32>
      %c0_16 = arith.constant 0 : index
      %c0_17 = arith.constant 0 : index
      %25 = vector.load %arg8[%c0_16, %c0_17] : memref<256x128xf32, #tpu.memory_space<vmem>>, vector<256x128xf32>
      %cst_18 = arith.constant dense<0.000000e+00> : vector<256xf32>
      %26 = vector.multi_reduction <add>, %25, %cst_18 [1] : vector<256x128xf32> to vector<256xf32>
      %27 = vector.shape_cast %26 : vector<256xf32> to vector<256x1xf32>
      %cst_19 = arith.constant 0.001953125 : f32
      %28 = vector.broadcast %cst_19 : f32 to vector<256x1xf32>
      %29 = arith.mulf %27, %28 : vector<256x1xf32>
      %30 = arith.mulf %24, %24 : vector<256x1xf32>
      %31 = arith.subf %29, %30 : vector<256x1xf32>
      %cst_20 = arith.constant 0.000000e+00 : f32
      %32 = vector.broadcast %cst_20 : f32 to vector<256x1xf32>
      %33 = arith.maximumf %31, %32 : vector<256x1xf32>
      %cst_21 = arith.constant 9.99999974E-6 : f32
      %34 = vector.broadcast %cst_21 : f32 to vector<256x1xf32>
      %35 = arith.addf %33, %34 : vector<256x1xf32>
      %36 = math.rsqrt %35 : vector<256x1xf32>
      %c0_22 = arith.constant 0 : index
      %c0_23 = arith.constant 0 : index
      %37 = vector.load %arg4[%c0_22, %c0_23] : memref<256x1xf32, #tpu.memory_space<vmem>>, vector<256x1xf32>
      %38 = arith.mulf %37, %36 : vector<256x1xf32>
      %c0_24 = arith.constant 0 : index
      %c0_25 = arith.constant 0 : index
      %39 = vector.load %arg9[%c0_24, %c0_25] : memref<256x1xf32, #tpu.memory_space<vmem>>, vector<256x1xf32>
      tpu.vector_store %arg9[%c0_24, %c0_25], %38 {strides = array<i32>} : memref<256x1xf32, #tpu.memory_space<vmem>>, vector<256x1xf32>,
      %c0_26 = arith.constant 0 : index
      %c0_27 = arith.constant 0 : index
      %40 = vector.load %arg5[%c0_26, %c0_27] : memref<256x1xf32, #tpu.memory_space<vmem>>, vector<256x1xf32>
      %41 = arith.mulf %24, %38 : vector<256x1xf32>
      %42 = arith.subf %40, %41 : vector<256x1xf32>
      %c0_28 = arith.constant 0 : index
      %c0_29 = arith.constant 0 : index
      %43 = vector.load %arg10[%c0_28, %c0_29] : memref<256x1xf32, #tpu.memory_space<vmem>>, vector<256x1xf32>
      tpu.vector_store %arg10[%c0_28, %c0_29], %42 {strides = array<i32>} : memref<256x1xf32, #tpu.memory_space<vmem>>, vector<256x1xf32>,
    } else {
    }
    %c1_i32 = arith.constant 1 : i32
    %17 = arith.cmpi eq, %arg0, %c1_i32 : i32
    %18 = arith.extui %17 : i1 to i32
    %c0_i32_11 = arith.constant 0 : i32
    %19 = arith.cmpi ne, %18, %c0_i32_11 : i32
    scf.if %19 {
      %c0_12 = arith.constant 0 : index
      %c0_13 = arith.constant 0 : index
      %20 = vector.load %arg9[%c0_12, %c0_13] : memref<256x1xf32, #tpu.memory_space<vmem>>, vector<256x1xf32>
      %21 = vector.broadcast %20 : vector<256x1xf32> to vector<256x512xf32>
      %22 = arith.mulf %3, %21 : vector<256x512xf32>
      %c0_14 = arith.constant 0 : index
      %c0_15 = arith.constant 0 : index
      %23 = vector.load %arg10[%c0_14, %c0_15] : memref<256x1xf32, #tpu.memory_space<vmem>>, vector<256x1xf32>
      %24 = vector.broadcast %23 : vector<256x1xf32> to vector<256x512xf32>
      %25 = arith.addf %22, %24 : vector<256x512xf32>
      %cst_16 = arith.constant 0.000000e+00 : f32
      %26 = vector.broadcast %cst_16 : f32 to vector<256x512xf32>
      %27 = arith.maximumf %25, %26 : vector<256x512xf32>
      %28 = vector.extract_strided_slice %27 {offsets = [0, 0], sizes = [256, 256], strides = [1, 1]} : vector<256x512xf32> to vector<256x256xf32>
      %c0_17 = arith.constant 0 : index
      %c0_18 = arith.constant 0 : index
      %c0_19 = arith.constant 0 : index
      %29 = vector.load %arg6[%c0_17, %c0_18, %c0_19] : memref<2x256x256xf32, #tpu.memory_space<vmem>>, vector<1x256x256xf32>
      %30 = vector.shape_cast %29 : vector<1x256x256xf32> to vector<256x256xf32>
      %31 = vector.shape_cast %28 : vector<256x256xf32> to vector<1x256x256xf32>
      tpu.vector_store %arg6[%c0_17, %c0_18, %c0_19], %31 {strides = array<i32>} : memref<2x256x256xf32, #tpu.memory_space<vmem>>, vector<1x256x256xf32>,
      %32 = vector.extract_strided_slice %27 {offsets = [0, 256], sizes = [256, 256], strides = [1, 1]} : vector<256x512xf32> to vector<256x256xf32>
      %c1 = arith.constant 1 : index
      %c0_20 = arith.constant 0 : index
      %c0_21 = arith.constant 0 : index
      %33 = vector.load %arg6[%c1, %c0_20, %c0_21] : memref<2x256x256xf32, #tpu.memory_space<vmem>>, vector<1x256x256xf32>
      %34 = vector.shape_cast %33 : vector<1x256x256xf32> to vector<256x256xf32>
      %35 = vector.shape_cast %32 : vector<256x256xf32> to vector<1x256x256xf32>
      tpu.vector_store %arg6[%c1, %c0_20, %c0_21], %35 {strides = array<i32>} : memref<2x256x256xf32, #tpu.memory_space<vmem>>, vector<1x256x256xf32>,
    } else {
    }
    return
  }
  func.func @transform_0(%arg0: i32, %arg1: i32) -> (i32, i32, i32) {
    %c0_i32 = arith.constant 0 : i32
    %c0_i32_0 = arith.constant 0 : i32
    %c0_i32_1 = arith.constant 0 : i32
    return %arg1, %c0_i32, %c0_i32_0 : i32, i32, i32
  }
  func.func @transform_1(%arg0: i32, %arg1: i32) -> (i32, i32) {
    %c0_i32 = arith.constant 0 : i32
    %c0_i32_0 = arith.constant 0 : i32
    %c0_i32_1 = arith.constant 0 : i32
    return %c0_i32, %c0_i32_0 : i32, i32
  }
  func.func @transform_2(%arg0: i32, %arg1: i32) -> (i32, i32) {
    %c0_i32 = arith.constant 0 : i32
    %c0_i32_0 = arith.constant 0 : i32
    %c0_i32_1 = arith.constant 0 : i32
    return %c0_i32, %c0_i32_0 : i32, i32
  }
  func.func @transform_3(%arg0: i32, %arg1: i32) -> (i32, i32) {
    %c0_i32 = arith.constant 0 : i32
    %c0_i32_0 = arith.constant 0 : i32
    %c0_i32_1 = arith.constant 0 : i32
    return %c0_i32, %c0_i32_0 : i32, i32
  }
  func.func @transform_4(%arg0: i32, %arg1: i32) -> (i32, i32, i32) {
    %0 = arith.muli %arg0, %arg1 : i32
    %c0_i32 = arith.constant 0 : i32
    %c0_i32_0 = arith.constant 0 : i32
    %c0_i32_1 = arith.constant 0 : i32
    return %0, %c0_i32, %c0_i32_0 : i32, i32, i32
  }
}

</mosaic_0001>

<bundles_post_ra>
// kernel: conv_block_forward.1
= control target key start
LH: loop header
LB: loop body
LE: loop exit
PB: predicated region body
PF: predicated region fallthrough
CT: control target
= control target key end

     0   :  { %s3741_s15 = smov 0   ;;  %s3743_s16 = smov 0   ;;  %s6697_s0 = inlined_call_operand.vmem [shape: bf16[1,36,512], index: 0, kind: input, shape index: {}]   ;;  %s6698_s1 = inlined_call_operand.vmem [shape: bf16[256,36], index: 1, kind: input, shape index: {}]   ;;  %s6699_s2 = inlined_call_operand.vmem [shape: f32[256,1], index: 2, kind: input, shape index: {}]   ;;  %s6700_s3 = inlined_call_operand.vmem [shape: f32[256,1], index: 3, kind: input, shape index: {}]   ;;  %s6701_s4 = inlined_call_operand.vmem [shape: f32[2,256,256], index: 4, kind: output, shape index: {}]  }
   0x1   :  { %s3745_s17 = smov 0  }
   0x2 LB: > { %s26_s18 = sadd.s32 1, %s3707_s16  ;;  %p3429_p0 = scmp.ge.s32.totalorder %s3711_s17, 1  ;;  %s3711_s17 = sphi %s3745_s17, %s14_s17   ;;  %s3707_s16 = sphi %s3743_s16, %s7600_s16   ;;  %s3703_s15 = sphi %s3741_s15, %s7599_s15  }
   0x3   : > { %p28_p1 = scmp.ge.s32.totalorder %s26_s18, 2  ;;  %p176_p2 = scmp.lt.s32.totalorder %s3711_s17, 3 }
   0x5   : > { %s7602_s18 = smov (%p28_p1, %s26_s18), 0  ;;  %p177_p3 = pnand %p3429_p0, %p176_p2 }
   0x7   : > { %180 = sbr.rel (%p177_p3) target bundleno = 1139 (0x473), region = 36 }
   0xe   : > { %v3591_v0 = vld [vmem:[%s6697_s0 + $0x4] ss:$16 sps:$4 sm:$0xff]   ;;  %v3593_v1 = vld [vmem:[%s6697_s0 + $0xc] ss:$16 sps:$4 sm:$0xff]   ;;  %v3713_v2 = vmov 0   ;;  %vm440_vm0 = vcmask 1041408  }
   0xf   : > { %485 = vmatprep.mubr.bf16.mxu0 %v3713_v2  ;;  %678 = vmatprep.mubr.bf16.mxu1 %v3713_v2  ;;  %v3595_v3 = vld [vmem:[%s6697_s0] ss:$16 sps:$4 sm:$0xff]   ;;  %v3596_v4 = vld [vmem:[%s6697_s0 + $0x8] ss:$16 sps:$4 sm:$0xff]   ;;  %v3597_v5 = vld [vmem:[%s6697_s0 + $0x24] ss:$16 sps:$4 sm:$0xff]  }
  0x10   : > { %453 = vmatprep.subr.bf16.mxu0 %v3591_v0  ;;  %646 = vmatprep.subr.bf16.mxu1 %v3593_v1  ;;  %v3599_v6 = vld [vmem:[%s6697_s0 + $0x2c] ss:$16 sps:$4 sm:$0xff]   ;;  %v3601_v7 = vld [vmem:[%s6697_s0 + $0x20] ss:$16 sps:$4 sm:$0xff]   ;;  %v3602_v8 = vld [vmem:[%s6697_s0 + $0x28] ss:$16 sps:$4 sm:$0xff]  }
  0x11   : > { %454 = vmatpush1.bf16.msra.mxu0 %v3595_v3  ;;  %647 = vmatpush1.bf16.msra.mxu1 %v3596_v4  ;;  %v259_v9 = vld [vmem:[%s6697_s0 + $0x40] sm:$0x33]  ;;  %v260_v10 = vld [vmem:[%s6697_s0 + $0x48] sm:$0x33]  ;;  %vm391_vm1 = vcmask 293888   ;;  %v3609_v19 = vld [vmem:[%s6698_s1 + $0x10] sm:$0xff]  }
  0x12   : > { %455 = vmatprep.subr.bf16.mxu0 %v3597_v5  ;;  %648 = vmatprep.subr.bf16.mxu1 %v3599_v6  ;;  %v3455_v11 = vcombine.high %v259_v9, %v259_v9  ;;  %v3457_v12 = vcombine.high %v260_v10, %v260_v10  ;;  %v3454_v13 = vcombine.low %v259_v9, %v259_v9  ;;  %v3607_v17 = vld [vmem:[%s6698_s1] sm:$0xff]   ;;  %v3608_v18 = vld [vmem:[%s6698_s1 + $0x8] sm:$0xff]   ;;  %v3610_v20 = vld [vmem:[%s6698_s1 + $0x18] sm:$0xff]   ;;  %p839_p4 = scmp.eq.s32.totalorder %s3703_s15, 0 }
  0x13   : > { %v3456_v14 = vcombine.low %v260_v10, %v260_v10  ;;  %v3611_v21 = vld [vmem:[%s6698_s1 + $0x20] sm:$0xff]   ;;  %v3612_v22 = vld [vmem:[%s6698_s1 + $0x28] sm:$0xff]   ;;  %v3613_v23 = vld [vmem:[%s6698_s1 + $0x30] sm:$0xff]  }
  0x14   : > { %v442_v15 = vsel %vm440_vm0, %v3454_v13, 0  ;;  %v3614_v24 = vld [vmem:[%s6698_s1 + $0x38] sm:$0xff]   ;;  %v3615_v25 = vld [vmem:[%s6698_s1 + $0x40] sm:$0xff]   ;;  %v3616_v26 = vld [vmem:[%s6698_s1 + $0x48] sm:$0xff]  }
  0x15   : > { %456 = vmatpush1.bf16.msra.mxu0 %v3601_v7  ;;  %649 = vmatpush1.bf16.msra.mxu1 %v3602_v8  ;;  %v448_v16 = vsel %vm440_vm0, %v3456_v14, 0  ;;  %v3617_v27 = vld [vmem:[%s6698_s1 + $0x50] sm:$0xff]   ;;  %v3618_v28 = vld [vmem:[%s6698_s1 + $0x58] sm:$0xff]   ;;  %v3619_v29 = vld [vmem:[%s6698_s1 + $0x60] sm:$0xff]  }
  0x16   : > { %3458 = vmatprep.subr.msk.bf16.mxu0 %vm440_vm0, %v3455_v11  ;;  %3475 = vmatprep.subr.msk.bf16.mxu1 %vm440_vm0, %v3457_v12  ;;  %v3620_v30 = vld [vmem:[%s6698_s1 + $0x68] sm:$0xff]   ;;  %v3621_v31 = vld [vmem:[%s6698_s1 + $0x70] sm:$0xff]   ;;  %v3622_v32 = vld [vmem:[%s6698_s1 + $0x78] sm:$0xff]  }
  0x19   : > { %458 = vmatpush1.bf16.msra.mxu0 %v442_v15  ;;  %651 = vmatpush1.bf16.msra.mxu1 %v448_v16 }
  0x1c   : > { %3459 = vmatmul.mubr.msk.bf16.vlgmr.msra.gmra.mrb[0].mxu0 %vm391_vm1, %v3607_v17  ;;  %3476 = vmatmul.mubr.msk.bf16.vlgmr.msra.gmra.mrb[0].mxu1 %vm391_vm1, %v3607_v17 }
  0x1d   : > { %495 = vmatprep.mubr.bf16.mxu0 %v3713_v2  ;;  %688 = vmatprep.mubr.bf16.mxu1 %v3713_v2 }
  0x24   : > { %3460 = vmatmul.mubr.msk.bf16.gmra.mrb[4].mxu0 %vm391_vm1, %v3608_v18  ;;  %3477 = vmatmul.mubr.msk.bf16.gmra.mrb[4].mxu1 %vm391_vm1, %v3608_v18 }
  0x25   : > { %505 = vmatprep.mubr.bf16.mxu0 %v3713_v2  ;;  %698 = vmatprep.mubr.bf16.mxu1 %v3713_v2 }
  0x2c   : > { %3461 = vmatmul.mubr.msk.bf16.gmra.mrb[8].mxu0 %vm391_vm1, %v3609_v19  ;;  %3478 = vmatmul.mubr.msk.bf16.gmra.mrb[8].mxu1 %vm391_vm1, %v3609_v19 }
  0x2d   : > { %515 = vmatprep.mubr.bf16.mxu0 %v3713_v2  ;;  %708 = vmatprep.mubr.bf16.mxu1 %v3713_v2 }
  0x34   : > { %3462 = vmatmul.mubr.msk.bf16.gmra.mrb[12].mxu0 %vm391_vm1, %v3610_v20  ;;  %3479 = vmatmul.mubr.msk.bf16.gmra.mrb[12].mxu1 %vm391_vm1, %v3610_v20 }
  0x35   : > { %525 = vmatprep.mubr.bf16.mxu0 %v3713_v2  ;;  %718 = vmatprep.mubr.bf16.mxu1 %v3713_v2 }
  0x3c   : > { %3463 = vmatmul.mubr.msk.bf16.gmra.mrb[16].mxu0 %vm391_vm1, %v3611_v21  ;;  %3480 = vmatmul.mubr.msk.bf16.gmra.mrb[16].mxu1 %vm391_vm1, %v3611_v21 }
  0x3d   : > { %535 = vmatprep.mubr.bf16.mxu0 %v3713_v2  ;;  %728 = vmatprep.mubr.bf16.mxu1 %v3713_v2 }
  0x44   : > { %3464 = vmatmul.mubr.msk.bf16.gmra.mrb[20].mxu0 %vm391_vm1, %v3612_v22  ;;  %3481 = vmatmul.mubr.msk.bf16.gmra.mrb[20].mxu1 %vm391_vm1, %v3612_v22 }
  0x45   : > { %545 = vmatprep.mubr.bf16.mxu0 %v3713_v2  ;;  %738 = vmatprep.mubr.bf16.mxu1 %v3713_v2 }
  0x4c   : > { %3465 = vmatmul.mubr.msk.bf16.gmra.mrb[24].mxu0 %vm391_vm1, %v3613_v23  ;;  %3482 = vmatmul.mubr.msk.bf16.gmra.mrb[24].mxu1 %vm391_vm1, %v3613_v23 }
  0x4d   : > { %555 = vmatprep.mubr.bf16.mxu0 %v3713_v2  ;;  %748 = vmatprep.mubr.bf16.mxu1 %v3713_v2 }
  0x54   : > { %3466 = vmatmul.mubr.msk.bf16.gmra.mrb[28].mxu0 %vm391_vm1, %v3614_v24  ;;  %3483 = vmatmul.mubr.msk.bf16.gmra.mrb[28].mxu1 %vm391_vm1, %v3614_v24 }
  0x55   : > { %565 = vmatprep.mubr.bf16.mxu0 %v3713_v2  ;;  %758 = vmatprep.mubr.bf16.mxu1 %v3713_v2 }
  0x5c   : > { %3467 = vmatmul.mubr.msk.bf16.gmra.mrb[32].mxu0 %vm391_vm1, %v3615_v25  ;;  %3484 = vmatmul.mubr.msk.bf16.gmra.mrb[32].mxu1 %vm391_vm1, %v3615_v25 }
  0x5d   : > { %575 = vmatprep.mubr.bf16.mxu0 %v3713_v2  ;;  %768 = vmatprep.mubr.bf16.mxu1 %v3713_v2 }
  0x64   : > { %3468 = vmatmul.mubr.msk.bf16.gmra.mrb[36].mxu0 %vm391_vm1, %v3616_v26  ;;  %3485 = vmatmul.mubr.msk.bf16.gmra.mrb[36].mxu1 %vm391_vm1, %v3616_v26 }
  0x65   : > { %585 = vmatprep.mubr.bf16.mxu0 %v3713_v2  ;;  %778 = vmatprep.mubr.bf16.mxu1 %v3713_v2 }
  0x6c   : > { %3469 = vmatmul.mubr.msk.bf16.gmra.mrb[40].mxu0 %vm391_vm1, %v3617_v27  ;;  %3486 = vmatmul.mubr.msk.bf16.gmra.mrb[40].mxu1 %vm391_vm1, %v3617_v27 }
  0x6d   : > { %595 = vmatprep.mubr.bf16.mxu0 %v3713_v2  ;;  %788 = vmatprep.mubr.bf16.mxu1 %v3713_v2 }
  0x74   : > { %3470 = vmatmul.mubr.msk.bf16.gmra.mrb[44].mxu0 %vm391_vm1, %v3618_v28  ;;  %3487 = vmatmul.mubr.msk.bf16.gmra.mrb[44].mxu1 %vm391_vm1, %v3618_v28 }
  0x75   : > { %605 = vmatprep.mubr.bf16.mxu0 %v3713_v2  ;;  %798 = vmatprep.mubr.bf16.mxu1 %v3713_v2 }
  0x7c   : > { %3471 = vmatmul.mubr.msk.bf16.gmra.mrb[48].mxu0 %vm391_vm1, %v3619_v29  ;;  %3488 = vmatmul.mubr.msk.bf16.gmra.mrb[48].mxu1 %vm391_vm1, %v3619_v29 }
  0x7d   : > { %615 = vmatprep.mubr.bf16.mxu0 %v3713_v2  ;;  %808 = vmatprep.mubr.bf16.mxu1 %v3713_v2 }
  0x84   : > { %3472 = vmatmul.mubr.msk.bf16.gmra.mrb[52].mxu0 %vm391_vm1, %v3620_v30  ;;  %3489 = vmatmul.mubr.msk.bf16.gmra.mrb[52].mxu1 %vm391_vm1, %v3620_v30 }
  0x85   : > { %625 = vmatprep.mubr.bf16.mxu0 %v3713_v2  ;;  %818 = vmatprep.mubr.bf16.mxu1 %v3713_v2 }
  0x8c   : > { %3473 = vmatmul.mubr.msk.bf16.gmra.mrb[56].mxu0 %vm391_vm1, %v3621_v31  ;;  %3490 = vmatmul.mubr.msk.bf16.gmra.mrb[56].mxu1 %vm391_vm1, %v3621_v31 }
  0x8d   : > { %635 = vmatprep.mubr.bf16.mxu0 %v3713_v2  ;;  %828 = vmatprep.mubr.bf16.mxu1 %v3713_v2 }
  0x94   : > { %3474 = vmatmul.mubr.msk.bf16.gmra.mrb[60].mxu0 %vm391_vm1, %v3622_v32  ;;  %3491 = vmatmul.mubr.msk.bf16.gmra.mrb[60].mxu1 %vm391_vm1, %v3622_v32 }
  0xef   : > { %v3904_v33 = vpop.f32.mrb[0].mxu0  ;;  %v3906_v34 = vpop.f32.mrb[0].mxu1 }
  0xf0   : > { %6839 = vst [vmem:[#allocation6_spill] sm:$0xff] %v3904_v33  ;;  %6840 = vst [vmem:[#allocation7_spill] sm:$0xff] %v3906_v34  ;;  %v3908_v35 = vpop.f32.mrb[1].mxu0  ;;  %v3910_v36 = vpop.f32.mrb[1].mxu1 }
  0xf1   : > { %6841 = vst [vmem:[#allocation8_spill] sm:$0xff] %v3908_v35  ;;  %6842 = vst [vmem:[#allocation9_spill] sm:$0xff] %v3910_v36  ;;  %v3912_v37 = vpop.f32.mrb[2].mxu0  ;;  %v3914_v38 = vpop.f32.mrb[2].mxu1 }
  0xf2   : > { %6843 = vst [vmem:[#allocation10_spill] sm:$0xff] %v3912_v37  ;;  %6844 = vst [vmem:[#allocation11_spill] sm:$0xff] %v3914_v38  ;;  %v3916_v39 = vpop.f32.mrb[3].mxu0  ;;  %v3918_v40 = vpop.f32.mrb[3].mxu1 }
  0xf3   : > { %6845 = vst [vmem:[#allocation12_spill] sm:$0xff] %v3916_v39  ;;  %6846 = vst [vmem:[#allocation13_spill] sm:$0xff] %v3918_v40 }
  0xf7   : > { %v3920_v41 = vpop.f32.mrb[4].mxu0  ;;  %v3922_v42 = vpop.f32.mrb[4].mxu1 }
  0xf8   : > { %6847 = vst [vmem:[#allocation14_spill] sm:$0xff] %v3920_v41  ;;  %6848 = vst [vmem:[#allocation15_spill] sm:$0xff] %v3922_v42  ;;  %v3924_v43 = vpop.f32.mrb[5].mxu0  ;;  %v3926_v44 = vpop.f32.mrb[5].mxu1 }
  0xf9   : > { %6849 = vst [vmem:[#allocation16_spill] sm:$0xff] %v3924_v43  ;;  %6850 = vst [vmem:[#allocation17_spill] sm:$0xff] %v3926_v44  ;;  %v3928_v45 = vpop.f32.mrb[6].mxu0  ;;  %v3930_v46 = vpop.f32.mrb[6].mxu1 }
  0xfa   : > { %6851 = vst [vmem:[#allocation18_spill] sm:$0xff] %v3928_v45  ;;  %6852 = vst [vmem:[#allocation19_spill] sm:$0xff] %v3930_v46  ;;  %v3932_v47 = vpop.f32.mrb[7].mxu0  ;;  %v3934_v48 = vpop.f32.mrb[7].mxu1 }
  0xfb   : > { %6853 = vst [vmem:[#allocation20_spill] sm:$0xff] %v3932_v47  ;;  %6854 = vst [vmem:[#allocation21_spill] sm:$0xff] %v3934_v48 }
  0xff   : > { %v3936_v49 = vpop.f32.mrb[8].mxu0  ;;  %v3938_v50 = vpop.f32.mrb[8].mxu1 }
 0x100   : > { %6855 = vst [vmem:[#allocation22_spill] sm:$0xff] %v3936_v49  ;;  %6856 = vst [vmem:[#allocation23_spill] sm:$0xff] %v3938_v50  ;;  %v3940_v51 = vpop.f32.mrb[9].mxu0  ;;  %v3942_v52 = vpop.f32.mrb[9].mxu1 }
 0x101   : > { %6857 = vst [vmem:[#allocation24_spill] sm:$0xff] %v3940_v51  ;;  %6858 = vst [vmem:[#allocation25_spill] sm:$0xff] %v3942_v52  ;;  %v3944_v53 = vpop.f32.mrb[10].mxu0  ;;  %v3946_v54 = vpop.f32.mrb[10].mxu1 }
 0x102   : > { %6859 = vst [vmem:[#allocation26_spill] sm:$0xff] %v3944_v53  ;;  %6860 = vst [vmem:[#allocation27_spill] sm:$0xff] %v3946_v54  ;;  %v3948_v55 = vpop.f32.mrb[11].mxu0  ;;  %v3950_v56 = vpop.f32.mrb[11].mxu1 }
 0x103   : > { %6861 = vst [vmem:[#allocation28_spill] sm:$0xff] %v3948_v55  ;;  %6862 = vst [vmem:[#allocation29_spill] sm:$0xff] %v3950_v56 }
 0x107   : > { %v3952_v57 = vpop.f32.mrb[12].mxu0  ;;  %v3954_v58 = vpop.f32.mrb[12].mxu1 }
 0x108   : > { %6863 = vst [vmem:[#allocation30_spill] sm:$0xff] %v3952_v57  ;;  %6864 = vst [vmem:[#allocation31_spill] sm:$0xff] %v3954_v58  ;;  %v3956_v59 = vpop.f32.mrb[13].mxu0  ;;  %v3958_v60 = vpop.f32.mrb[13].mxu1 }
 0x109   : > { %6865 = vst [vmem:[#allocation32_spill] sm:$0xff] %v3956_v59  ;;  %6866 = vst [vmem:[#allocation33_spill] sm:$0xff] %v3958_v60  ;;  %v3960_v61 = vpop.f32.mrb[14].mxu0  ;;  %v3962_v62 = vpop.f32.mrb[14].mxu1 }
 0x10a   : > { %6867 = vst [vmem:[#allocation34_spill] sm:$0xff] %v3960_v61  ;;  %6868 = vst [vmem:[#allocation35_spill] sm:$0xff] %v3962_v62  ;;  %v3964_v63 = vpop.f32.mrb[15].mxu0  ;;  %v3966_v0 = vpop.f32.mrb[15].mxu1 }
 0x10b   : > { %6869 = vst [vmem:[#allocation36_spill] sm:$0xff] %v3964_v63  ;;  %6870 = vst [vmem:[#allocation37_spill] sm:$0xff] %v3966_v0 }
 0x10f   : > { %v3968_v1 = vpop.f32.mrb[16].mxu0  ;;  %v3970_v2 = vpop.f32.mrb[16].mxu1 }
 0x110   : > { %6871 = vst [vmem:[#allocation38_spill] sm:$0xff] %v3968_v1  ;;  %6872 = vst [vmem:[#allocation39_spill] sm:$0xff] %v3970_v2  ;;  %v3972_v3 = vpop.f32.mrb[17].mxu0  ;;  %v3974_v4 = vpop.f32.mrb[17].mxu1 }
 0x111   : > { %6873 = vst [vmem:[#allocation40_spill] sm:$0xff] %v3972_v3  ;;  %6874 = vst [vmem:[#allocation41_spill] sm:$0xff] %v3974_v4  ;;  %v3976_v5 = vpop.f32.mrb[18].mxu0  ;;  %v3978_v6 = vpop.f32.mrb[18].mxu1 }
 0x112   : > { %6875 = vst [vmem:[#allocation42_spill] sm:$0xff] %v3976_v5  ;;  %6876 = vst [vmem:[#allocation43_spill] sm:$0xff] %v3978_v6  ;;  %v3980_v7 = vpop.f32.mrb[19].mxu0  ;;  %v3982_v8 = vpop.f32.mrb[19].mxu1 }
 0x113   : > { %6877 = vst [vmem:[#allocation44_spill] sm:$0xff] %v3980_v7  ;;  %6878 = vst [vmem:[#allocation45_spill] sm:$0xff] %v3982_v8 }
 0x117   : > { %v3984_v9 = vpop.f32.mrb[20].mxu0  ;;  %v3986_v10 = vpop.f32.mrb[20].mxu1 }
 0x118   : > { %6879 = vst [vmem:[#allocation46_spill] sm:$0xff] %v3984_v9  ;;  %6880 = vst [vmem:[#allocation47_spill] sm:$0xff] %v3986_v10  ;;  %v3988_v11 = vpop.f32.mrb[21].mxu0  ;;  %v3990_v12 = vpop.f32.mrb[21].mxu1 }
 0x119   : > { %6881 = vst [vmem:[#allocation48_spill] sm:$0xff] %v3988_v11  ;;  %6882 = vst [vmem:[#allocation49_spill] sm:$0xff] %v3990_v12  ;;  %v3992_v13 = vpop.f32.mrb[22].mxu0  ;;  %v3994_v14 = vpop.f32.mrb[22].mxu1 }
 0x11a   : > { %6883 = vst [vmem:[#allocation50_spill] sm:$0xff] %v3992_v13  ;;  %6884 = vst [vmem:[#allocation51_spill] sm:$0xff] %v3994_v14  ;;  %v3996_v15 = vpop.f32.mrb[23].mxu0  ;;  %v3998_v16 = vpop.f32.mrb[23].mxu1 }
 0x11b   : > { %6885 = vst [vmem:[#allocation52_spill] sm:$0xff] %v3996_v15  ;;  %6886 = vst [vmem:[#allocation53_spill] sm:$0xff] %v3998_v16 }
 0x11f   : > { %v4000_v17 = vpop.f32.mrb[24].mxu0  ;;  %v4002_v18 = vpop.f32.mrb[24].mxu1 }
 0x120   : > { %6887 = vst [vmem:[#allocation54_spill] sm:$0xff] %v4000_v17  ;;  %6888 = vst [vmem:[#allocation55_spill] sm:$0xff] %v4002_v18  ;;  %v4004_v19 = vpop.f32.mrb[25].mxu0  ;;  %v4006_v20 = vpop.f32.mrb[25].mxu1 }
 0x121   : > { %6889 = vst [vmem:[#allocation56_spill] sm:$0xff] %v4004_v19  ;;  %6890 = vst [vmem:[#allocation57_spill] sm:$0xff] %v4006_v20  ;;  %v4008_v21 = vpop.f32.mrb[26].mxu0  ;;  %v4010_v22 = vpop.f32.mrb[26].mxu1 }
 0x122   : > { %6891 = vst [vmem:[#allocation58_spill] sm:$0xff] %v4008_v21  ;;  %6892 = vst [vmem:[#allocation59_spill] sm:$0xff] %v4010_v22  ;;  %v4012_v23 = vpop.f32.mrb[27].mxu0  ;;  %v4014_v24 = vpop.f32.mrb[27].mxu1 }
 0x123   : > { %6893 = vst [vmem:[#allocation60_spill] sm:$0xff] %v4012_v23  ;;  %6894 = vst [vmem:[#allocation61_spill] sm:$0xff] %v4014_v24 }
 0x127   : > { %v4016_v25 = vpop.f32.mrb[28].mxu0  ;;  %v4018_v26 = vpop.f32.mrb[28].mxu1 }
 0x128   : > { %6895 = vst [vmem:[#allocation62_spill] sm:$0xff] %v4016_v25  ;;  %6896 = vst [vmem:[#allocation63_spill] sm:$0xff] %v4018_v26  ;;  %v4020_v27 = vpop.f32.mrb[29].mxu0  ;;  %v4022_v28 = vpop.f32.mrb[29].mxu1 }
 0x129   : > { %6897 = vst [vmem:[#allocation64_spill] sm:$0xff] %v4020_v27  ;;  %6898 = vst [vmem:[#allocation65_spill] sm:$0xff] %v4022_v28  ;;  %v4024_v29 = vpop.f32.mrb[30].mxu0  ;;  %v4026_v30 = vpop.f32.mrb[30].mxu1 }
 0x12a   : > { %6899 = vst [vmem:[#allocation66_spill] sm:$0xff] %v4024_v29  ;;  %6900 = vst [vmem:[#allocation67_spill] sm:$0xff] %v4026_v30  ;;  %v4028_v31 = vpop.f32.mrb[31].mxu0  ;;  %v4030_v32 = vpop.f32.mrb[31].mxu1 }
 0x12b   : > { %6901 = vst [vmem:[#allocation68_spill] sm:$0xff] %v4028_v31  ;;  %6902 = vst [vmem:[#allocation69_spill] sm:$0xff] %v4030_v32 }
 0x12f   : > { %v4032_v20 = vpop.f32.mrb[32].mxu0  ;;  %v4034_v16 = vpop.f32.mrb[32].mxu1 }
 0x130   : > { %6903 = vst [vmem:[#allocation70_spill] sm:$0xff] %v4032_v20  ;;  %6904 = vst [vmem:[#allocation71_spill] sm:$0xff] %v4034_v16  ;;  %v4036_v24 = vpop.f32.mrb[33].mxu0  ;;  %v4038_v12 = vpop.f32.mrb[33].mxu1 }
 0x131   : > { %6905 = vst [vmem:[#allocation72_spill] sm:$0xff] %v4036_v24  ;;  %6906 = vst [vmem:[#allocation73_spill] sm:$0xff] %v4038_v12  ;;  %v4040_v8 = vpop.f32.mrb[34].mxu0  ;;  %v4042_v4 = vpop.f32.mrb[34].mxu1 }
 0x132   : > { %6907 = vst [vmem:[#allocation74_spill] sm:$0xff] %v4040_v8  ;;  %6908 = vst [vmem:[#allocation75_spill] sm:$0xff] %v4042_v4  ;;  %v4044_v28 = vpop.f32.mrb[35].mxu0  ;;  %v4046_v0 = vpop.f32.mrb[35].mxu1 }
 0x133   : > { %6909 = vst [vmem:[#allocation76_spill] sm:$0xff] %v4044_v28  ;;  %6910 = vst [vmem:[#allocation77_spill] sm:$0xff] %v4046_v0 }
 0x137   : > { %v4048_v60 = vpop.f32.mrb[36].mxu0  ;;  %v4050_v56 = vpop.f32.mrb[36].mxu1 }
 0x138   : > { %6911 = vst [vmem:[#allocation78_spill] sm:$0xff] %v4048_v60  ;;  %6912 = vst [vmem:[#allocation79_spill] sm:$0xff] %v4050_v56  ;;  %v4052_v32 = vpop.f32.mrb[37].mxu0  ;;  %v4054_v52 = vpop.f32.mrb[37].mxu1 }
 0x139   : > { %6913 = vst [vmem:[#allocation80_spill] sm:$0xff] %v4052_v32  ;;  %6914 = vst [vmem:[#allocation81_spill] sm:$0xff] %v4054_v52  ;;  %v4056_v48 = vpop.f32.mrb[38].mxu0  ;;  %v4058_v44 = vpop.f32.mrb[38].mxu1 }
 0x13a   : > { %6915 = vst [vmem:[#allocation82_spill] sm:$0xff] %v4056_v48  ;;  %6916 = vst [vmem:[#allocation83_spill] sm:$0xff] %v4058_v44  ;;  %v4060_v12 = vpop.f32.mrb[39].mxu0  ;;  %v4062_v40 = vpop.f32.mrb[39].mxu1 }
 0x13b   : > { %6917 = vst [vmem:[#allocation84_spill] sm:$0xff] %v4060_v12  ;;  %6918 = vst [vmem:[#allocation85_spill] sm:$0xff] %v4062_v40 }
 0x13f   : > { %v4064_v36 = vpop.f32.mrb[40].mxu0  ;;  %v4066_v4 = vpop.f32.mrb[40].mxu1 }
 0x140   : > { %6919 = vst [vmem:[#allocation86_spill] sm:$0xff] %v4064_v36  ;;  %6920 = vst [vmem:[#allocation87_spill] sm:$0xff] %v4066_v4  ;;  %v4068_v0 = vpop.f32.mrb[41].mxu0  ;;  %v4070_v16 = vpop.f32.mrb[41].mxu1 }
 0x141   : > { %6921 = vst [vmem:[#allocation88_spill] sm:$0xff] %v4068_v0  ;;  %6922 = vst [vmem:[#allocation89_spill] sm:$0xff] %v4070_v16  ;;  %v4072_v56 = vpop.f32.mrb[42].mxu0  ;;  %v4074_v30 = vpop.f32.mrb[42].mxu1 }
 0x142   : > { %6923 = vst [vmem:[#allocation90_spill] sm:$0xff] %v4072_v56  ;;  %6924 = vst [vmem:[#allocation91_spill] sm:$0xff] %v4074_v30  ;;  %v4076_v52 = vpop.f32.mrb[43].mxu0  ;;  %v4078_v26 = vpop.f32.mrb[43].mxu1 }
 0x143   : > { %6925 = vst [vmem:[#allocation92_spill] sm:$0xff] %v4076_v52  ;;  %6926 = vst [vmem:[#allocation93_spill] sm:$0xff] %v4078_v26 }
 0x147   : > { %v4080_v44 = vpop.f32.mrb[44].mxu0  ;;  %v4082_v22 = vpop.f32.mrb[44].mxu1 }
 0x148   : > { %6927 = vst [vmem:[#allocation94_spill] sm:$0xff] %v4080_v44  ;;  %6928 = vst [vmem:[#allocation95_spill] sm:$0xff] %v4082_v22  ;;  %v4084_v40 = vpop.f32.mrb[45].mxu0  ;;  %v4086_v18 = vpop.f32.mrb[45].mxu1 }
 0x149   : > { %6929 = vst [vmem:[#allocation96_spill] sm:$0xff] %v4084_v40  ;;  %6930 = vst [vmem:[#allocation97_spill] sm:$0xff] %v4086_v18  ;;  %v4088_v4 = vpop.f32.mrb[46].mxu0  ;;  %v4090_v14 = vpop.f32.mrb[46].mxu1 }
 0x14a   : > { %6931 = vst [vmem:[#allocation98_spill] sm:$0xff] %v4088_v4  ;;  %6932 = vst [vmem:[#allocation99_spill] sm:$0xff] %v4090_v14  ;;  %v4092_v16 = vpop.f32.mrb[47].mxu0  ;;  %v4094_v10 = vpop.f32.mrb[47].mxu1 }
 0x14b   : > { %6933 = vst [vmem:[#allocation100_spill] sm:$0xff] %v4092_v16  ;;  %6934 = vst [vmem:[#allocation101_spill] sm:$0xff] %v4094_v10 }
 0x14f   : > { %v4096_v30 = vpop.f32.mrb[48].mxu0  ;;  %v4098_v6 = vpop.f32.mrb[48].mxu1 }
 0x150   : > { %6935 = vst [vmem:[#allocation102_spill] sm:$0xff] %v4096_v30  ;;  %6936 = vst [vmem:[#allocation103_spill] sm:$0xff] %v4098_v6  ;;  %v4100_v26 = vpop.f32.mrb[49].mxu0  ;;  %v4102_v2 = vpop.f32.mrb[49].mxu1 }
 0x151   : > { %6937 = vst [vmem:[#allocation104_spill] sm:$0xff] %v4100_v26  ;;  %6938 = vst [vmem:[#allocation105_spill] sm:$0xff] %v4102_v2  ;;  %v4104_v22 = vpop.f32.mrb[50].mxu0  ;;  %v4106_v62 = vpop.f32.mrb[50].mxu1 }
 0x152   : > { %6939 = vst [vmem:[#allocation106_spill] sm:$0xff] %v4104_v22  ;;  %6940 = vst [vmem:[#allocation107_spill] sm:$0xff] %v4106_v62  ;;  %v4108_v18 = vpop.f32.mrb[51].mxu0  ;;  %v4110_v58 = vpop.f32.mrb[51].mxu1 }
 0x153   : > { %6941 = vst [vmem:[#allocation108_spill] sm:$0xff] %v4108_v18  ;;  %6942 = vst [vmem:[#allocation109_spill] sm:$0xff] %v4110_v58 }
 0x157   : > { %v4112_v14 = vpop.f32.mrb[52].mxu0  ;;  %v4114_v54 = vpop.f32.mrb[52].mxu1 }
 0x158   : > { %6943 = vst [vmem:[#allocation110_spill] sm:$0xff] %v4112_v14  ;;  %6944 = vst [vmem:[#allocation111_spill] sm:$0xff] %v4114_v54  ;;  %v4116_v10 = vpop.f32.mrb[53].mxu0  ;;  %v4118_v50 = vpop.f32.mrb[53].mxu1 }
 0x159   : > { %6945 = vst [vmem:[#allocation112_spill] sm:$0xff] %v4116_v10  ;;  %6946 = vst [vmem:[#allocation113_spill] sm:$0xff] %v4118_v50  ;;  %v4120_v6 = vpop.f32.mrb[54].mxu0  ;;  %v4122_v46 = vpop.f32.mrb[54].mxu1 }
 0x15a   : > { %6947 = vst [vmem:[#allocation114_spill] sm:$0xff] %v4120_v6  ;;  %6948 = vst [vmem:[#allocation115_spill] sm:$0xff] %v4122_v46  ;;  %v4124_v2 = vpop.f32.mrb[55].mxu0  ;;  %v4126_v42 = vpop.f32.mrb[55].mxu1 }
 0x15b   : > { %6949 = vst [vmem:[#allocation116_spill] sm:$0xff] %v4124_v2  ;;  %6950 = vst [vmem:[#allocation117_spill] sm:$0xff] %v4126_v42 }
 0x15f   : > { %v4128_v62 = vpop.f32.mrb[56].mxu0  ;;  %v4130_v38 = vpop.f32.mrb[56].mxu1 }
 0x160   : > { %6951 = vst [vmem:[#allocation118_spill] sm:$0xff] %v4128_v62  ;;  %6952 = vst [vmem:[#allocation119_spill] sm:$0xff] %v4130_v38  ;;  %v4132_v58 = vpop.f32.mrb[57].mxu0  ;;  %v4134_v34 = vpop.f32.mrb[57].mxu1 }
 0x161   : > { %6953 = vst [vmem:[#allocation120_spill] sm:$0xff] %v4132_v58  ;;  %6954 = vst [vmem:[#allocation121_spill] sm:$0xff] %v4134_v34  ;;  %v4136_v54 = vpop.f32.mrb[58].mxu0  ;;  %v4138_v10 = vpop.f32.mrb[58].mxu1 }
 0x162   : > { %6955 = vst [vmem:[#allocation122_spill] sm:$0xff] %v4136_v54  ;;  %6956 = vst [vmem:[#allocation123_spill] sm:$0xff] %v4138_v10  ;;  %v4140_v50 = vpop.f32.mrb[59].mxu0  ;;  %v4142_v18 = vpop.f32.mrb[59].mxu1 }
 0x163   : > { %6957 = vst [vmem:[#allocation124_spill] sm:$0xff] %v4140_v50  ;;  %6958 = vst [vmem:[#allocation125_spill] sm:$0xff] %v4142_v18  ;;  %v3714_v18 = vmov (%p839_p4), 0.0  }
 0x164   : > { %845 = vst [vmem:[#allocation2] sm:$0xff] (%p839_p4), %v3714_v18  ;;  %846 = vst [vmem:[#allocation2 + $0x8] sm:$0xff] (%p839_p4), %v3714_v18 }
 0x165   : > { %844 = sbr.rel (!%p839_p4) target bundleno = 392 (0x188), region = 40  ;;  %847 = vst [vmem:[#allocation2 + $0x10] sm:$0xff] (%p839_p4), %v3714_v18  ;;  %848 = vst [vmem:[#allocation2 + $0x18] sm:$0xff] (%p839_p4), %v3714_v18 }
 0x166   : > { %849 = vst [vmem:[#allocation2 + $0x20] sm:$0xff] (%p839_p4), %v3714_v18  ;;  %850 = vst [vmem:[#allocation2 + $0x28] sm:$0xff] (%p839_p4), %v3714_v18 }
 0x167   : > { %v4144_v46 = vpop.f32.mrb[60].mxu0  ;;  %v4146_v2 = vpop.f32.mrb[60].mxu1  ;;  %851 = vst [vmem:[#allocation2 + $0x30] sm:$0xff] (%p839_p4), %v3714_v18  ;;  %852 = vst [vmem:[#allocation2 + $0x38] sm:$0xff] (%p839_p4), %v3714_v18 }
 0x168   : > { %6959 = vst [vmem:[#allocation126_spill] sm:$0xff] %v4144_v46  ;;  %6960 = vst [vmem:[#allocation127_spill] sm:$0xff] %v4146_v2  ;;  %v4148_v42 = vpop.f32.mrb[61].mxu0  ;;  %v4150_v26 = vpop.f32.mrb[61].mxu1 }
 0x169   : > { %6961 = vst [vmem:[#allocation128_spill] sm:$0xff] %v4148_v42  ;;  %6962 = vst [vmem:[#allocation129_spill] sm:$0xff] %v4150_v26  ;;  %v4152_v38 = vpop.f32.mrb[62].mxu0  ;;  %v4154_v58 = vpop.f32.mrb[62].mxu1 }
 0x16a   : > { %6963 = vst [vmem:[#allocation130_spill] sm:$0xff] %v4152_v38  ;;  %6964 = vst [vmem:[#allocation131_spill] sm:$0xff] %v4154_v58  ;;  %v4156_v34 = vpop.f32.mrb[63].mxu0  ;;  %v4158_v16 = vpop.f32.mrb[63].mxu1 }
 0x16b   : > { %6965 = vst [vmem:[#allocation132_spill] sm:$0xff] %v4156_v34  ;;  %6966 = vst [vmem:[#allocation133_spill] sm:$0xff] %v4158_v16 }
 0x16c   : > { %853 = vst [vmem:[#allocation2 + $0x40] sm:$0xff] %v3714_v18  ;;  %854 = vst [vmem:[#allocation2 + $0x48] sm:$0xff] %v3714_v18 }
 0x16d   : > { %855 = vst [vmem:[#allocation2 + $0x50] sm:$0xff] %v3714_v18  ;;  %856 = vst [vmem:[#allocation2 + $0x58] sm:$0xff] %v3714_v18 }
 0x16e   : > { %857 = vst [vmem:[#allocation2 + $0x60] sm:$0xff] %v3714_v18  ;;  %858 = vst [vmem:[#allocation2 + $0x68] sm:$0xff] %v3714_v18 }
 0x16f   : > { %859 = vst [vmem:[#allocation2 + $0x70] sm:$0xff] %v3714_v18  ;;  %860 = vst [vmem:[#allocation2 + $0x78] sm:$0xff] %v3714_v18 }
 0x170   : > { %861 = vst [vmem:[#allocation2 + $0x80] sm:$0xff] %v3714_v18  ;;  %862 = vst [vmem:[#allocation2 + $0x88] sm:$0xff] %v3714_v18 }
 0x171   : > { %863 = vst [vmem:[#allocation2 + $0x90] sm:$0xff] %v3714_v18  ;;  %864 = vst [vmem:[#allocation2 + $0x98] sm:$0xff] %v3714_v18 }
 0x172   : > { %865 = vst [vmem:[#allocation2 + $0xa0] sm:$0xff] %v3714_v18  ;;  %866 = vst [vmem:[#allocation2 + $0xa8] sm:$0xff] %v3714_v18 }
 0x173   : > { %867 = vst [vmem:[#allocation2 + $0xb0] sm:$0xff] %v3714_v18  ;;  %868 = vst [vmem:[#allocation2 + $0xb8] sm:$0xff] %v3714_v18 }
 0x174   : > { %869 = vst [vmem:[#allocation2 + $0xc0] sm:$0xff] %v3714_v18  ;;  %870 = vst [vmem:[#allocation2 + $0xc8] sm:$0xff] %v3714_v18 }
 0x175   : > { %871 = vst [vmem:[#allocation2 + $0xd0] sm:$0xff] %v3714_v18  ;;  %872 = vst [vmem:[#allocation2 + $0xd8] sm:$0xff] %v3714_v18 }
 0x176   : > { %873 = vst [vmem:[#allocation2 + $0xe0] sm:$0xff] %v3714_v18  ;;  %874 = vst [vmem:[#allocation2 + $0xe8] sm:$0xff] %v3714_v18 }
 0x177   : > { %875 = vst [vmem:[#allocation2 + $0xf0] sm:$0xff] %v3714_v18  ;;  %876 = vst [vmem:[#allocation2 + $0xf8] sm:$0xff] %v3714_v18 }
 0x178   : > { %877 = vst [vmem:[#allocation3] sm:$0xff] %v3714_v18  ;;  %878 = vst [vmem:[#allocation3 + $0x8] sm:$0xff] %v3714_v18 }
 0x179   : > { %879 = vst [vmem:[#allocation3 + $0x10] sm:$0xff] %v3714_v18  ;;  %880 = vst [vmem:[#allocation3 + $0x18] sm:$0xff] %v3714_v18 }
 0x17a   : > { %881 = vst [vmem:[#allocation3 + $0x20] sm:$0xff] %v3714_v18  ;;  %882 = vst [vmem:[#allocation3 + $0x28] sm:$0xff] %v3714_v18 }
 0x17b   : > { %883 = vst [vmem:[#allocation3 + $0x30] sm:$0xff] %v3714_v18  ;;  %884 = vst [vmem:[#allocation3 + $0x38] sm:$0xff] %v3714_v18 }
 0x17c   : > { %885 = vst [vmem:[#allocation3 + $0x40] sm:$0xff] %v3714_v18  ;;  %886 = vst [vmem:[#allocation3 + $0x48] sm:$0xff] %v3714_v18 }
 0x17d   : > { %887 = vst [vmem:[#allocation3 + $0x50] sm:$0xff] %v3714_v18  ;;  %888 = vst [vmem:[#allocation3 + $0x58] sm:$0xff] %v3714_v18 }
 0x17e   : > { %889 = vst [vmem:[#allocation3 + $0x60] sm:$0xff] %v3714_v18  ;;  %890 = vst [vmem:[#allocation3 + $0x68] sm:$0xff] %v3714_v18 }
 0x17f   : > { %891 = vst [vmem:[#allocation3 + $0x70] sm:$0xff] %v3714_v18  ;;  %892 = vst [vmem:[#allocation3 + $0x78] sm:$0xff] %v3714_v18 }
 0x180   : > { %893 = vst [vmem:[#allocation3 + $0x80] sm:$0xff] %v3714_v18  ;;  %894 = vst [vmem:[#allocation3 + $0x88] sm:$0xff] %v3714_v18 }
 0x181   : > { %895 = vst [vmem:[#allocation3 + $0x90] sm:$0xff] %v3714_v18  ;;  %896 = vst [vmem:[#allocation3 + $0x98] sm:$0xff] %v3714_v18 }
 0x182   : > { %897 = vst [vmem:[#allocation3 + $0xa0] sm:$0xff] %v3714_v18  ;;  %898 = vst [vmem:[#allocation3 + $0xa8] sm:$0xff] %v3714_v18 }
 0x183   : > { %899 = vst [vmem:[#allocation3 + $0xb0] sm:$0xff] %v3714_v18  ;;  %900 = vst [vmem:[#allocation3 + $0xb8] sm:$0xff] %v3714_v18 }
 0x184   : > { %901 = vst [vmem:[#allocation3 + $0xc0] sm:$0xff] %v3714_v18  ;;  %902 = vst [vmem:[#allocation3 + $0xc8] sm:$0xff] %v3714_v18 }
 0x185   : > { %903 = vst [vmem:[#allocation3 + $0xd0] sm:$0xff] %v3714_v18  ;;  %904 = vst [vmem:[#allocation3 + $0xd8] sm:$0xff] %v3714_v18 }
 0x186   : > { %905 = vst [vmem:[#allocation3 + $0xe0] sm:$0xff] %v3714_v18  ;;  %906 = vst [vmem:[#allocation3 + $0xe8] sm:$0xff] %v3714_v18 }
 0x187   : > { %907 = vst [vmem:[#allocation3 + $0xf0] sm:$0xff] %v3714_v18  ;;  %908 = vst [vmem:[#allocation3 + $0xf8] sm:$0xff] %v3714_v18 }
 0x188 PF: > { %p3493_p5 = scmp.ne.s32.totalorder %s3703_s15, 0 }
 0x18a   : > { %911 = sbr.rel (%p3493_p5) target bundleno = 564 (0x234), region = 44 }
 0x191   : > { %v912_v16 = vld [vmem:[#allocation2] sm:$0xff]  ;;  %v913_v26 = vld [vmem:[#allocation2 + $0x8] sm:$0xff]  ;;  %v914_v58 = vld [vmem:[#allocation2 + $0x10] sm:$0xff]  ;;  %v4229_v2 = vmul.f32 %v3904_v33, %v3904_v33  ;;  %v4233_v10 = vmul.f32 %v3912_v37, %v3912_v37  ;;  %v4237_v34 = vmul.f32 %v3920_v41, %v3920_v41  ;;  %v4241_v18 = vmul.f32 %v3928_v45, %v3928_v45 }
 0x192   : > { %v4244_v42 = vadd.f32 %v912_v16, %v3904_v33  ;;  %v4247_v50 = vadd.f32 %v913_v26, %v3912_v37  ;;  %v4250_v40 = vadd.f32 %v914_v58, %v3920_v41  ;;  %v915_v52 = vld [vmem:[#allocation2 + $0x18] sm:$0xff]  ;;  %v916_v0 = vld [vmem:[#allocation2 + $0x20] sm:$0xff]  ;;  %v917_v12 = vld [vmem:[#allocation2 + $0x28] sm:$0xff]  ;;  %v4254_v32 = vmul.f32 %v3936_v49, %v3936_v49 }
 0x193   : > { %v4257_v28 = vadd.f32 %v915_v52, %v3928_v45  ;;  %v4260_v24 = vadd.f32 %v916_v0, %v3936_v49  ;;  %v4263_v16 = vadd.f32 %v917_v12, %v3944_v53  ;;  %v918_v26 = vld [vmem:[#allocation2 + $0x30] sm:$0xff]  ;;  %v919_v37 = vld [vmem:[#allocation2 + $0x38] sm:$0xff]  ;;  %v920_v58 = vld [vmem:[#allocation2 + $0x40] sm:$0xff]  ;;  %v4267_v33 = vmul.f32 %v3944_v53, %v3944_v53 }
 0x194   : > { %v4270_v41 = vadd.f32 %v918_v26, %v3952_v57  ;;  %v4273_v31 = vadd.f32 %v919_v37, %v3960_v61  ;;  %v4276_v52 = vadd.f32 %v920_v58, %v3968_v1  ;;  %v921_v0 = vld [vmem:[#allocation2 + $0x48] sm:$0xff]  ;;  %v922_v49 = vld [vmem:[#allocation2 + $0x50] sm:$0xff]  ;;  %v923_v12 = vld [vmem:[#allocation2 + $0x58] sm:$0xff]  ;;  %v4280_v45 = vmul.f32 %v3952_v57, %v3952_v57 }
 0x195   : > { %v4283_v27 = vadd.f32 %v921_v0, %v3976_v5  ;;  %v4286_v53 = vadd.f32 %v922_v49, %v3984_v9  ;;  %v4289_v26 = vadd.f32 %v923_v12, %v3992_v13  ;;  %v924_v37 = vld [vmem:[#allocation2 + $0x60] sm:$0xff]  ;;  %v925_v23 = vld [vmem:[#allocation2 + $0x68] sm:$0xff]  ;;  %v926_v58 = vld [vmem:[#allocation2 + $0x70] sm:$0xff]  ;;  %v4293_v19 = vmul.f32 %v3960_v61, %v3960_v61 }
 0x196   : > { %v4296_v15 = vadd.f32 %v924_v37, %v4000_v17  ;;  %v4299_v57 = vadd.f32 %v925_v23, %v4008_v21  ;;  %v4302_v0 = vadd.f32 %v926_v58, %v4016_v25  ;;  %v927_v49 = vld [vmem:[#allocation2 + $0x78] sm:$0xff]  ;;  %v929_v12 = vld [vmem:[#allocation2 + $0x88] sm:$0xff]  ;;  %v930_v23 = vld [vmem:[#allocation2 + $0x90] sm:$0xff]  ;;  %v1049_v58 = vmul.f32 %v3976_v5, %v3976_v5 }
 0x197   : > { %6967 = vst [vmem:[#allocation134_spill] sm:$0xff] %v4286_v53  ;;  %6968 = vst [vmem:[#allocation135_spill] sm:$0xff] %v4289_v26  ;;  %v928_v53 = vld [vmem:[#allocation2 + $0x80] sm:$0xff]  ;;  %v1048_v26 = vmul.f32 %v3968_v1, %v3968_v1  ;;  %v4307_v11 = vadd.f32 %v927_v49, %v4024_v29  ;;  %v4313_v37 = vadd.f32 %v929_v12, %v4040_v8 }
 0x198   : > { %6969 = vst [vmem:[#allocation136_spill] sm:$0xff] %v4296_v15  ;;  %6970 = vst [vmem:[#allocation137_spill] sm:$0xff] %v4299_v57  ;;  %v4310_v61 = vadd.f32 %v928_v53, %v4032_v20  ;;  %v931_v57 = vld [vmem:[#allocation2 + $0x98] sm:$0xff]  ;;  %v932_v15 = vld [vmem:[#allocation2 + $0xa0] sm:$0xff]  ;;  %v1050_v12 = vmul.f32 %v3984_v9, %v3984_v9 }
 0x199   : > { %6971 = vst [vmem:[#allocation138_spill] sm:$0xff] %v4302_v0  ;;  %6972 = vst [vmem:[#allocation139_spill] sm:$0xff] %v4307_v11  ;;  %v4318_v0 = vadd.f32 %v930_v23, %v4048_v60  ;;  %v4321_v1 = vadd.f32 %v931_v57, %v4056_v48  ;;  %v4324_v49 = vadd.f32 %v932_v15, %v4064_v36  ;;  %v933_v53 = vld [vmem:[#allocation2 + $0xa8] sm:$0xff]  ;;  %v935_v11 = vld [vmem:[#allocation2 + $0xb8] sm:$0xff] }
 0x19a   : > { %6973 = vst [vmem:[#allocation140_spill] sm:$0xff] %v4310_v61  ;;  %6974 = vst [vmem:[#allocation141_spill] sm:$0xff] %v4313_v37  ;;  %v934_v61 = vld [vmem:[#allocation2 + $0xb0] sm:$0xff]  ;;  %v4329_v37 = vadd.f32 %v933_v53, %v4072_v56  ;;  %v4335_v23 = vadd.f32 %v935_v11, %v4088_v4  ;;  %v936_v57 = vld [vmem:[#allocation2 + $0xc0] sm:$0xff]  ;;  %v1051_v15 = vmul.f32 %v3992_v13, %v3992_v13 }
 0x19b   : > { %6975 = vst [vmem:[#allocation142_spill] sm:$0xff] %v4318_v0  ;;  %6976 = vst [vmem:[#allocation143_spill] sm:$0xff] %v4321_v1  ;;  %v4332_v5 = vadd.f32 %v934_v61, %v4080_v44  ;;  %v937_v1 = vld [vmem:[#allocation2 + $0xc8] sm:$0xff]  ;;  %v938_v0 = vld [vmem:[#allocation2 + $0xd0] sm:$0xff]  ;;  %v1052_v11 = vmul.f32 %v4000_v17, %v4000_v17 }
 0x19c   : > { %6977 = vst [vmem:[#allocation144_spill] sm:$0xff] %v4324_v49  ;;  %6978 = vst [vmem:[#allocation145_spill] sm:$0xff] %v4329_v37  ;;  %v4340_v49 = vadd.f32 %v936_v57, %v4096_v30  ;;  %v4343_v9 = vadd.f32 %v937_v1, %v4104_v22  ;;  %v4346_v53 = vadd.f32 %v938_v0, %v4112_v14  ;;  %v939_v61 = vld [vmem:[#allocation2 + $0xd8] sm:$0xff]  ;;  %v941_v37 = vld [vmem:[#allocation2 + $0xe8] sm:$0xff] }
 0x19d   : > { %6979 = vst [vmem:[#allocation146_spill] sm:$0xff] %v4332_v5  ;;  %6980 = vst [vmem:[#allocation147_spill] sm:$0xff] %v4335_v23  ;;  %v940_v5 = vld [vmem:[#allocation2 + $0xe0] sm:$0xff]  ;;  %v4351_v23 = vadd.f32 %v939_v61, %v4120_v6  ;;  %v4357_v57 = vadd.f32 %v941_v37, %v4136_v54  ;;  %v942_v1 = vld [vmem:[#allocation2 + $0xf0] sm:$0xff]  ;;  %v1053_v0 = vmul.f32 %v4008_v21, %v4008_v21 }
 0x19e   : > { %6981 = vst [vmem:[#allocation148_spill] sm:$0xff] %v4340_v49  ;;  %6982 = vst [vmem:[#allocation149_spill] sm:$0xff] %v4343_v9  ;;  %v4354_v13 = vadd.f32 %v940_v5, %v4128_v62  ;;  %v943_v9 = vld [vmem:[#allocation2 + $0xf8] sm:$0xff]  ;;  %v1008_v49 = vld [vmem:[#allocation3] sm:$0xff]  ;;  %v1054_v37 = vmul.f32 %v4016_v25, %v4016_v25 }
 0x19f   : > { %6983 = vst [vmem:[#allocation150_spill] sm:$0xff] %v4346_v53  ;;  %6984 = vst [vmem:[#allocation151_spill] sm:$0xff] %v4351_v23  ;;  %v4362_v53 = vadd.f32 %v942_v1, %v4144_v46  ;;  %v4365_v17 = vadd.f32 %v943_v9, %v4152_v38  ;;  %v4368_v61 = vadd.f32 %v4229_v2, %v1008_v49  ;;  %v1009_v5 = vld [vmem:[#allocation3 + $0x8] sm:$0xff]  ;;  %v1011_v23 = vld [vmem:[#allocation3 + $0x18] sm:$0xff] }
 0x1a0   : > { %6985 = vst [vmem:[#allocation152_spill] sm:$0xff] %v4354_v13  ;;  %6986 = vst [vmem:[#allocation153_spill] sm:$0xff] %v4357_v57  ;;  %v1010_v13 = vld [vmem:[#allocation3 + $0x10] sm:$0xff]  ;;  %v4373_v57 = vadd.f32 %v4233_v10, %v1009_v5  ;;  %v4379_v1 = vadd.f32 %v4241_v18, %v1011_v23  ;;  %v1012_v9 = vld [vmem:[#allocation3 + $0x20] sm:$0xff]  ;;  %v1055_v2 = vmul.f32 %v4024_v29, %v4024_v29 }
 0x1a1   : > { %6987 = vst [vmem:[#allocation154_spill] sm:$0xff] %v4362_v53  ;;  %6988 = vst [vmem:[#allocation155_spill] sm:$0xff] %v4365_v17  ;;  %v4376_v21 = vadd.f32 %v4237_v34, %v1010_v13  ;;  %v1013_v17 = vld [vmem:[#allocation3 + $0x28] sm:$0xff]  ;;  %v1014_v53 = vld [vmem:[#allocation3 + $0x30] sm:$0xff]  ;;  %v4384_v49 = vadd.f32 %v4254_v32, %v1012_v9  ;;  %v1056_v18 = vmul.f32 %v4032_v20, %v4032_v20 }
 0x1a2   : > { %6989 = vst [vmem:[#allocation156_spill] sm:$0xff] %v4379_v1  ;;  %v4387_v25 = vadd.f32 %v4267_v33, %v1013_v17  ;;  %v4390_v10 = vadd.f32 %v4280_v45, %v1014_v53  ;;  %v1015_v34 = vld [vmem:[#allocation3 + $0x38] sm:$0xff]  ;;  %v1016_v13 = vld [vmem:[#allocation3 + $0x40] sm:$0xff]  ;;  %v1017_v5 = vld [vmem:[#allocation3 + $0x48] sm:$0xff]  ;;  %v1057_v45 = vmul.f32 %v4040_v8, %v4040_v8 }
 0x1a3   : > { %v4395_v23 = vadd.f32 %v4293_v19, %v1015_v34  ;;  %v4397_v1 = vadd.f32 %v1048_v26, %v1016_v13  ;;  %v4399_v29 = vadd.f32 %v1049_v58, %v1017_v5  ;;  %v1018_v32 = vld [vmem:[#allocation3 + $0x50] sm:$0xff]  ;;  %v1019_v9 = vld [vmem:[#allocation3 + $0x58] sm:$0xff]  ;;  %v1020_v33 = vld [vmem:[#allocation3 + $0x60] sm:$0xff]  ;;  %v1058_v26 = vmul.f32 %v4048_v60, %v4048_v60 }
 0x1a4   : > { %6990 = vst [vmem:[#allocation157_spill] sm:$0xff] %v4387_v25  ;;  %6991 = vst [vmem:[#allocation158_spill] sm:$0xff] %v4390_v10  ;;  %v4403_v17 = vadd.f32 %v1050_v12, %v1018_v32  ;;  %v4405_v53 = vadd.f32 %v1051_v15, %v1019_v9  ;;  %v4407_v10 = vadd.f32 %v1052_v11, %v1020_v33  ;;  %v1021_v20 = vld [vmem:[#allocation3 + $0x68] sm:$0xff]  ;;  %v1022_v25 = vld [vmem:[#allocation3 + $0x70] sm:$0xff] }
 0x1a5   : > { %v1023_v19 = vld [vmem:[#allocation3 + $0x78] sm:$0xff]  ;;  %v4411_v58 = vadd.f32 %v1053_v0, %v1021_v20  ;;  %v4413_v34 = vadd.f32 %v1054_v37, %v1022_v25  ;;  %v1024_v5 = vld [vmem:[#allocation3 + $0x80] sm:$0xff]  ;;  %v1025_v8 = vld [vmem:[#allocation3 + $0x88] sm:$0xff]  ;;  %v1059_v15 = vmul.f32 %v4056_v48, %v4056_v48  ;;  %v1060_v20 = vmul.f32 %v4064_v36, %v4064_v36 }
 0x1a6   : > { %v4415_v13 = vadd.f32 %v1055_v2, %v1023_v19  ;;  %v1026_v12 = vld [vmem:[#allocation3 + $0x90] sm:$0xff]  ;;  %v4419_v11 = vadd.f32 %v1056_v18, %v1024_v5  ;;  %v4421_v32 = vadd.f32 %v1057_v45, %v1025_v8  ;;  %v1027_v33 = vld [vmem:[#allocation3 + $0x98] sm:$0xff]  ;;  %v1028_v60 = vld [vmem:[#allocation3 + $0xa0] sm:$0xff]  ;;  %v1061_v37 = vmul.f32 %v4072_v56, %v4072_v56 }
 0x1a7   : > { %v4423_v9 = vadd.f32 %v1058_v26, %v1026_v12  ;;  %v1029_v25 = vld [vmem:[#allocation3 + $0xa8] sm:$0xff]  ;;  %v4427_v0 = vadd.f32 %v1059_v15, %v1027_v33  ;;  %v1030_v2 = vld [vmem:[#allocation3 + $0xb0] sm:$0xff]  ;;  %v1062_v18 = vmul.f32 %v4080_v44, %v4080_v44  ;;  %v1031_v19 = vld [vmem:[#allocation3 + $0xb8] sm:$0xff]  ;;  %v1063_v8 = vmul.f32 %v4088_v4, %v4088_v4 }
 0x1a8   : > { %v1032_v45 = vld [vmem:[#allocation3 + $0xc0] sm:$0xff]  ;;  %v4435_v26 = vadd.f32 %v1060_v20, %v1028_v60  ;;  %v1064_v5 = vmul.f32 %v4096_v30, %v4096_v30  ;;  %v1033_v12 = vld [vmem:[#allocation3 + $0xc8] sm:$0xff]  ;;  %v1065_v15 = vmul.f32 %v4104_v22, %v4104_v22  ;;  %v1034_v33 = vld [vmem:[#allocation3 + $0xd0] sm:$0xff]  ;;  %v1066_v36 = vmul.f32 %v4112_v14, %v4112_v14 }
 0x1a9   : > { %6992 = vst [vmem:[#allocation159_spill] sm:$0xff] %v4427_v0  ;;  %v1035_v56 = vld [vmem:[#allocation3 + $0xd8] sm:$0xff]  ;;  %v4443_v44 = vadd.f32 %v1061_v37, %v1029_v25  ;;  %v4445_v48 = vadd.f32 %v1062_v18, %v1030_v2  ;;  %v4447_v4 = vadd.f32 %v1063_v8, %v1031_v19  ;;  %v1067_v60 = vmul.f32 %v4120_v6, %v4120_v6  ;;  %v1036_v20 = vld [vmem:[#allocation3 + $0xe0] sm:$0xff]  ;;  %v1037_v0 = vld [vmem:[#allocation3 + $0xe8] sm:$0xff] }
 0x1aa   : > { %6993 = vst [vmem:[#allocation160_spill] sm:$0xff] %v4435_v26  ;;  %v4451_v30 = vadd.f32 %v1064_v5, %v1032_v45  ;;  %v4453_v26 = vadd.f32 %v1065_v15, %v1033_v12  ;;  %v4455_v22 = vadd.f32 %v1066_v36, %v1034_v33  ;;  %v1068_v14 = vmul.f32 %v4128_v62, %v4128_v62  ;;  %v1038_v25 = vld [vmem:[#allocation3 + $0xf0] sm:$0xff]  ;;  %v1039_v37 = vld [vmem:[#allocation3 + $0xf8] sm:$0xff]  ;;  %v7023_v62 = vld [vmem:[#allocation138_spill] sm:$0xff] }
 0x1ab   : > { %v4459_v2 = vadd.f32 %v1067_v60, %v1035_v56  ;;  %v1069_v18 = vmul.f32 %v4136_v54, %v4136_v54  ;;  %v1070_v19 = vmul.f32 %v4144_v46, %v4144_v46  ;;  %v1071_v8 = vmul.f32 %v4152_v38, %v4152_v38  ;;  %v7010_v60 = vld [vmem:[#allocation48_spill] sm:$0xff]  ;;  %v7020_v46 = vld [vmem:[#allocation137_spill] sm:$0xff]  ;;  %v7026_v6 = vld [vmem:[#allocation139_spill] sm:$0xff] }
 0x1ac   : > { %6994 = vst [vmem:[#allocation161_spill] sm:$0xff] %v4455_v22  ;;  %v4467_v45 = vadd.f32 %v1068_v14, %v1036_v20  ;;  %v4471_v36 = vadd.f32 %v4244_v42, %v3908_v35  ;;  %v4475_v5 = vadd.f32 %v4247_v50, %v3916_v39  ;;  %v4479_v56 = vadd.f32 %v4250_v40, %v3924_v43  ;;  %v7011_v20 = vld [vmem:[#allocation134_spill] sm:$0xff]  ;;  %v7022_v38 = vld [vmem:[#allocation64_spill] sm:$0xff]  ;;  %v7073_v22 = vld [vmem:[#allocation155_spill] sm:$0xff] }
 0x1ad   : > { %6995 = vst [vmem:[#allocation162_spill] sm:$0xff] %v4459_v2  ;;  %v4481_v12 = vadd.f32 %v1069_v18, %v1037_v0  ;;  %v4483_v15 = vadd.f32 %v1070_v19, %v1038_v25  ;;  %v4485_v33 = vadd.f32 %v1071_v8, %v1039_v37  ;;  %v4489_v14 = vadd.f32 %v4257_v28, %v3932_v47  ;;  %v7013_v25 = vld [vmem:[#allocation52_spill] sm:$0xff]  ;;  %v7014_v37 = vld [vmem:[#allocation135_spill] sm:$0xff]  ;;  %v7070_v2 = vld [vmem:[#allocation154_spill] sm:$0xff] }
 0x1ae   : > { %6996 = vst [vmem:[#allocation163_spill] sm:$0xff] %v4467_v45  ;;  %6997 = vst [vmem:[#allocation164_spill] sm:$0xff] %v4471_v36  ;;  %v4493_v42 = vadd.f32 %v4260_v24, %v3940_v51  ;;  %v4497_v50 = vadd.f32 %v4263_v16, %v3948_v55  ;;  %v4501_v40 = vadd.f32 %v4270_v41, %v3956_v59  ;;  %v7016_v18 = vld [vmem:[#allocation56_spill] sm:$0xff]  ;;  %v7056_v36 = vld [vmem:[#allocation149_spill] sm:$0xff] }
 0x1af   : > { %6998 = vst [vmem:[#allocation165_spill] sm:$0xff] %v4475_v5  ;;  %6999 = vst [vmem:[#allocation166_spill] sm:$0xff] %v4479_v56  ;;  %v4505_v0 = vadd.f32 %v4273_v31, %v3964_v63  ;;  %v4509_v28 = vadd.f32 %v4276_v52, %v3972_v3  ;;  %v4513_v24 = vadd.f32 %v4283_v27, %v3980_v7  ;;  %v7017_v19 = vld [vmem:[#allocation136_spill] sm:$0xff]  ;;  %v7050_v56 = vld [vmem:[#allocation147_spill] sm:$0xff] }
 0x1b0   : > { %7000 = vst [vmem:[#allocation167_spill] sm:$0xff] %v4481_v12  ;;  %7001 = vst [vmem:[#allocation168_spill] sm:$0xff] %v4483_v15  ;;  %v4517_v16 = vadd.f32 %v7011_v20, %v7010_v60  ;;  %v4521_v41 = vadd.f32 %v7014_v37, %v7013_v25  ;;  %v4525_v31 = vadd.f32 %v7017_v19, %v7016_v18  ;;  %v7019_v8 = vld [vmem:[#allocation60_spill] sm:$0xff]  ;;  %v7061_v15 = vld [vmem:[#allocation151_spill] sm:$0xff] }
 0x1b1   : > { %7002 = vst [vmem:[#allocation169_spill] sm:$0xff] %v4485_v33  ;;  %7003 = vst [vmem:[#allocation170_spill] sm:$0xff] %v4489_v14  ;;  %v4529_v52 = vadd.f32 %v7020_v46, %v7019_v8  ;;  %v4533_v27 = vadd.f32 %v7023_v62, %v7022_v38  ;;  %v7025_v54 = vld [vmem:[#allocation68_spill] sm:$0xff]  ;;  %v7047_v14 = vld [vmem:[#allocation146_spill] sm:$0xff] }
 0x1b2   : > { %7004 = vst [vmem:[#allocation171_spill] sm:$0xff] %v4493_v42  ;;  %7005 = vst [vmem:[#allocation172_spill] sm:$0xff] %v4497_v50  ;;  %v4537_v20 = vadd.f32 %v7026_v6, %v7025_v54  ;;  %v7041_v50 = vld [vmem:[#allocation144_spill] sm:$0xff]  ;;  %v7044_v42 = vld [vmem:[#allocation145_spill] sm:$0xff] }
 0x1b3   : > { %7006 = vst [vmem:[#allocation173_spill] sm:$0xff] %v4501_v40  ;;  %7007 = vst [vmem:[#allocation174_spill] sm:$0xff] %v4505_v0  ;;  %v7035_v0 = vld [vmem:[#allocation142_spill] sm:$0xff]  ;;  %v7038_v40 = vld [vmem:[#allocation143_spill] sm:$0xff] }
 0x1b4   : > { %7008 = vst [vmem:[#allocation175_spill] sm:$0xff] %v4509_v28  ;;  %7009 = vst [vmem:[#allocation176_spill] sm:$0xff] %v4513_v24  ;;  %v7029_v24 = vld [vmem:[#allocation140_spill] sm:$0xff]  ;;  %v7032_v28 = vld [vmem:[#allocation141_spill] sm:$0xff] }
 0x1b5   : > { %7012 = vst [vmem:[#allocation134_spill] sm:$0xff] %v4517_v16  ;;  %7015 = vst [vmem:[#allocation135_spill] sm:$0xff] %v4521_v41  ;;  %v7028_v16 = vld [vmem:[#allocation72_spill] sm:$0xff]  ;;  %v7059_v33 = vld [vmem:[#allocation150_spill] sm:$0xff] }
 0x1b6   : > { %7018 = vst [vmem:[#allocation136_spill] sm:$0xff] %v4525_v31  ;;  %7021 = vst [vmem:[#allocation137_spill] sm:$0xff] %v4529_v52  ;;  %v4541_v37 = vadd.f32 %v7029_v24, %v7028_v16  ;;  %v7031_v41 = vld [vmem:[#allocation76_spill] sm:$0xff]  ;;  %v7067_v45 = vld [vmem:[#allocation153_spill] sm:$0xff] }
 0x1b7   : > { %7024 = vst [vmem:[#allocation138_spill] sm:$0xff] %v4533_v27  ;;  %7027 = vst [vmem:[#allocation139_spill] sm:$0xff] %v4537_v20  ;;  %v4545_v19 = vadd.f32 %v7032_v28, %v7031_v41  ;;  %v7034_v31 = vld [vmem:[#allocation80_spill] sm:$0xff] }
 0x1b8   : > { %7030 = vst [vmem:[#allocation140_spill] sm:$0xff] %v4541_v37  ;;  %v4549_v46 = vadd.f32 %v7035_v0, %v7034_v31  ;;  %v7037_v52 = vld [vmem:[#allocation84_spill] sm:$0xff] }
 0x1b9   : > { %7033 = vst [vmem:[#allocation141_spill] sm:$0xff] %v4545_v19  ;;  %v4553_v62 = vadd.f32 %v7038_v40, %v7037_v52  ;;  %v7040_v27 = vld [vmem:[#allocation88_spill] sm:$0xff] }
 0x1ba   : > { %7036 = vst [vmem:[#allocation142_spill] sm:$0xff] %v4549_v46  ;;  %v4557_v6 = vadd.f32 %v7041_v50, %v7040_v27  ;;  %v7043_v20 = vld [vmem:[#allocation92_spill] sm:$0xff] }
 0x1bb   : > { %7039 = vst [vmem:[#allocation143_spill] sm:$0xff] %v4553_v62  ;;  %v4561_v24 = vadd.f32 %v7044_v42, %v7043_v20  ;;  %v7046_v37 = vld [vmem:[#allocation96_spill] sm:$0xff] }
 0x1bc   : > { %7042 = vst [vmem:[#allocation144_spill] sm:$0xff] %v4557_v6  ;;  %v4565_v28 = vadd.f32 %v7047_v14, %v7046_v37  ;;  %v7049_v19 = vld [vmem:[#allocation100_spill] sm:$0xff] }
 0x1bd   : > { %7045 = vst [vmem:[#allocation145_spill] sm:$0xff] %v4561_v24  ;;  %v4569_v0 = vadd.f32 %v7050_v56, %v7049_v19  ;;  %v7052_v46 = vld [vmem:[#allocation104_spill] sm:$0xff] }
 0x1be   : > { %7048 = vst [vmem:[#allocation146_spill] sm:$0xff] %v4565_v28  ;;  %v7053_v5 = vld [vmem:[#allocation148_spill] sm:$0xff] }
 0x1bf   : > { %7051 = vst [vmem:[#allocation147_spill] sm:$0xff] %v4569_v0  ;;  %v4573_v40 = vadd.f32 %v7053_v5, %v7052_v46  ;;  %v7055_v62 = vld [vmem:[#allocation108_spill] sm:$0xff] }
 0x1c0   : > { %v4577_v50 = vadd.f32 %v7056_v36, %v7055_v62  ;;  %v7058_v6 = vld [vmem:[#allocation112_spill] sm:$0xff] }
 0x1c1   : > { %7054 = vst [vmem:[#allocation148_spill] sm:$0xff] %v4573_v40  ;;  %v4581_v42 = vadd.f32 %v7059_v33, %v7058_v6  ;;  %v7060_v24 = vld [vmem:[#allocation116_spill] sm:$0xff] }
 0x1c2   : > { %7057 = vst [vmem:[#allocation149_spill] sm:$0xff] %v4577_v50  ;;  %v4585_v14 = vadd.f32 %v7061_v15, %v7060_v24  ;;  %v7063_v28 = vld [vmem:[#allocation120_spill] sm:$0xff]  ;;  %v1264_v15 = vmul.f32 %v3908_v35, %v3908_v35  ;;  %v1271_v35 = vmul.f32 %v3964_v63, %v3964_v63 }
 0x1c3   : > { %v7064_v12 = vld [vmem:[#allocation152_spill] sm:$0xff] }
 0x1c4   : > { %7062 = vst [vmem:[#allocation150_spill] sm:$0xff] %v4585_v14  ;;  %v4589_v56 = vadd.f32 %v7064_v12, %v7063_v28  ;;  %v7066_v0 = vld [vmem:[#allocation124_spill] sm:$0xff]  ;;  %v1265_v14 = vmul.f32 %v3916_v39, %v3916_v39  ;;  %v1266_v12 = vmul.f32 %v3924_v43, %v3924_v43  ;;  %v4620_v39 = vadd.f32 %v1264_v15, %v4368_v61 }
 0x1c5   : > { %v4593_v5 = vadd.f32 %v7067_v45, %v7066_v0  ;;  %v7069_v40 = vld [vmem:[#allocation128_spill] sm:$0xff]  ;;  %v1267_v45 = vmul.f32 %v3932_v47, %v3932_v47  ;;  %v4641_v61 = vadd.f32 %v1271_v35, %v4395_v23  ;;  %v1278_v35 = vmul.f32 %v7022_v38, %v7022_v38 }
 0x1c6   : > { %7065 = vst [vmem:[#allocation151_spill] sm:$0xff] %v4589_v56  ;;  %v4597_v36 = vadd.f32 %v7070_v2, %v7069_v40  ;;  %v7072_v50 = vld [vmem:[#allocation132_spill] sm:$0xff]  ;;  %v1268_v2 = vmul.f32 %v3940_v51, %v3940_v51  ;;  %v4623_v43 = vadd.f32 %v1265_v14, %v4373_v57  ;;  %v4626_v47 = vadd.f32 %v1266_v12, %v4376_v21  ;;  %v7077_v56 = vld [vmem:[#allocation158_spill] sm:$0xff] }
 0x1c7   : > { %7068 = vst [vmem:[#allocation152_spill] sm:$0xff] %v4593_v5  ;;  %v4601_v33 = vadd.f32 %v7073_v22, %v7072_v50  ;;  %v1270_v22 = vmul.f32 %v3956_v59, %v3956_v59  ;;  %v7076_v5 = vld [vmem:[#allocation157_spill] sm:$0xff]  ;;  %v1272_v57 = vmul.f32 %v3972_v3, %v3972_v3  ;;  %v1273_v21 = vmul.f32 %v3980_v7, %v3980_v7  ;;  %v7079_v15 = vld [vmem:[#allocation160_spill] sm:$0xff]  ;;  %v7131_v3 = vld [vmem:[#allocation55_spill] sm:$0xff] }
 0x1c8   : > { %7071 = vst [vmem:[#allocation153_spill] sm:$0xff] %v4597_v36  ;;  %v1269_v36 = vmul.f32 %v3948_v55, %v3948_v55  ;;  %v4632_v55 = vadd.f32 %v1268_v2, %v4384_v49  ;;  %v1274_v14 = vmul.f32 %v7010_v60, %v7010_v60  ;;  %v1275_v49 = vmul.f32 %v7013_v25, %v7013_v25  ;;  %v7083_v2 = vld [vmem:[#allocation161_spill] sm:$0xff]  ;;  %v7132_v7 = vld [vmem:[#allocation136_spill] sm:$0xff] }
 0x1c9   : > { %7074 = vst [vmem:[#allocation154_spill] sm:$0xff] %v4601_v33  ;;  %v7075_v33 = vld [vmem:[#allocation156_spill] sm:$0xff]  ;;  %v4638_v63 = vadd.f32 %v1270_v22, %v7077_v56  ;;  %v1277_v56 = vmul.f32 %v7019_v8, %v7019_v8  ;;  %v1279_v23 = vmul.f32 %v7025_v54, %v7025_v54  ;;  %v4663_v60 = vadd.f32 %v1273_v21, %v4399_v29  ;;  %v7085_v22 = vld [vmem:[#allocation162_spill] sm:$0xff]  ;;  %v7089_v21 = vld [vmem:[#allocation167_spill] sm:$0xff] }
 0x1ca   : > { %v4629_v51 = vadd.f32 %v1267_v45, %v7075_v33  ;;  %v4635_v59 = vadd.f32 %v1269_v36, %v7076_v5  ;;  %v1276_v5 = vmul.f32 %v7016_v18, %v7016_v18  ;;  %v4660_v36 = vadd.f32 %v1272_v57, %v4397_v1  ;;  %v7078_v33 = vld [vmem:[#allocation159_spill] sm:$0xff] }
 0x1cb   : > { %v4666_v25 = vadd.f32 %v1274_v14, %v4403_v17  ;;  %v4669_v18 = vadd.f32 %v1275_v49, %v4405_v53  ;;  %v4675_v38 = vadd.f32 %v1277_v56, %v4411_v58  ;;  %v4678_v54 = vadd.f32 %v1278_v35, %v4413_v34  ;;  %v7087_v57 = vld [vmem:[#allocation163_spill] sm:$0xff]  ;;  %v7091_v14 = vld [vmem:[#allocation168_spill] sm:$0xff] }
 0x1cc   : > { %v4672_v8 = vadd.f32 %v1276_v5, %v4407_v10  ;;  %v4681_v1 = vadd.f32 %v1279_v23, %v4415_v13  ;;  %v1280_v29 = vmul.f32 %v7028_v16, %v7028_v16  ;;  %v1281_v17 = vmul.f32 %v7031_v41, %v7031_v41  ;;  %v7096_v5 = vld [vmem:[#allocation164_spill] sm:$0xff]  ;;  %v7098_v35 = vld [vmem:[#allocation11_spill] sm:$0xff]  ;;  %v7099_v23 = vld [vmem:[#allocation165_spill] sm:$0xff] }
 0x1cd   : > { %v1282_v53 = vmul.f32 %v7034_v31, %v7034_v31  ;;  %v1283_v10 = vmul.f32 %v7037_v52, %v7037_v52  ;;  %v1284_v58 = vmul.f32 %v7040_v27, %v7040_v27  ;;  %v1285_v34 = vmul.f32 %v7043_v20, %v7043_v20 }
 0x1ce   : > { %v1286_v13 = vmul.f32 %v7046_v37, %v7046_v37  ;;  %v1287_v16 = vmul.f32 %v7049_v19, %v7049_v19  ;;  %v4700_v41 = vadd.f32 %v1280_v29, %v4419_v11  ;;  %v4703_v31 = vadd.f32 %v1281_v17, %v4421_v32  ;;  %v7101_v17 = vld [vmem:[#allocation15_spill] sm:$0xff] }
 0x1cf   : > { %v4706_v52 = vadd.f32 %v1282_v53, %v4423_v9  ;;  %v4709_v27 = vadd.f32 %v1283_v10, %v7078_v33  ;;  %v4712_v20 = vadd.f32 %v1284_v58, %v7079_v15  ;;  %v4715_v37 = vadd.f32 %v1285_v34, %v4443_v44  ;;  %v7102_v53 = vld [vmem:[#allocation166_spill] sm:$0xff]  ;;  %v7104_v58 = vld [vmem:[#allocation19_spill] sm:$0xff] }
 0x1d0   : > { %v4718_v19 = vadd.f32 %v1286_v13, %v4445_v48  ;;  %v4721_v11 = vadd.f32 %v1287_v16, %v4447_v4  ;;  %v1288_v32 = vmul.f32 %v7052_v46, %v7052_v46  ;;  %v1289_v9 = vmul.f32 %v7055_v62, %v7055_v62  ;;  %v7105_v34 = vld [vmem:[#allocation170_spill] sm:$0xff]  ;;  %v7107_v16 = vld [vmem:[#allocation23_spill] sm:$0xff] }
 0x1d1   : > { %v1290_v12 = vmul.f32 %v7058_v6, %v7058_v6  ;;  %v1291_v45 = vmul.f32 %v7060_v24, %v7060_v24  ;;  %v1292_v44 = vmul.f32 %v7063_v28, %v7063_v28  ;;  %v1293_v48 = vmul.f32 %v7066_v0, %v7066_v0  ;;  %v7108_v33 = vld [vmem:[#allocation171_spill] sm:$0xff] }
 0x1d2   : > { %7080 = vst [vmem:[#allocation155_spill] sm:$0xff] %v4721_v11  ;;  %v1294_v4 = vmul.f32 %v7069_v40, %v7069_v40  ;;  %v1295_v46 = vmul.f32 %v7072_v50, %v7072_v50  ;;  %v4740_v62 = vadd.f32 %v1288_v32, %v4451_v30  ;;  %v4743_v6 = vadd.f32 %v1289_v9, %v4453_v26  ;;  %v7093_v30 = vld [vmem:[#allocation169_spill] sm:$0xff]  ;;  %v7095_v26 = vld [vmem:[#allocation7_spill] sm:$0xff]  ;;  %v7111_v9 = vld [vmem:[#allocation172_spill] sm:$0xff] }
 0x1d3   : > { %v4746_v24 = vadd.f32 %v1290_v12, %v7083_v2  ;;  %v4749_v28 = vadd.f32 %v1291_v45, %v7085_v22  ;;  %v4752_v0 = vadd.f32 %v1292_v44, %v7087_v57  ;;  %v4755_v40 = vadd.f32 %v1293_v48, %v7089_v21  ;;  %v7110_v32 = vld [vmem:[#allocation27_spill] sm:$0xff]  ;;  %v7114_v44 = vld [vmem:[#allocation173_spill] sm:$0xff]  ;;  %v7180_v11 = vld [vmem:[#allocation152_spill] sm:$0xff] }
 0x1d4   : > { %7081 = vst [vmem:[#allocation156_spill] sm:$0xff] %v4740_v62  ;;  %7082 = vst [vmem:[#allocation157_spill] sm:$0xff] %v4743_v6  ;;  %v4758_v50 = vadd.f32 %v1294_v4, %v7091_v14  ;;  %v4761_v49 = vadd.f32 %v1295_v46, %v7093_v30  ;;  %v4765_v56 = vadd.f32 %v7096_v5, %v7095_v26  ;;  %v7113_v45 = vld [vmem:[#allocation31_spill] sm:$0xff]  ;;  %v7117_v46 = vld [vmem:[#allocation174_spill] sm:$0xff] }
 0x1d5   : > { %7084 = vst [vmem:[#allocation158_spill] sm:$0xff] %v4746_v24  ;;  %7086 = vst [vmem:[#allocation159_spill] sm:$0xff] %v4749_v28  ;;  %v4769_v29 = vadd.f32 %v7099_v23, %v7098_v35  ;;  %v4773_v10 = vadd.f32 %v7102_v53, %v7101_v17  ;;  %v4777_v13 = vadd.f32 %v7105_v34, %v7104_v58  ;;  %v7116_v4 = vld [vmem:[#allocation35_spill] sm:$0xff]  ;;  %v7123_v30 = vld [vmem:[#allocation176_spill] sm:$0xff] }
 0x1d6   : > { %7088 = vst [vmem:[#allocation160_spill] sm:$0xff] %v4752_v0  ;;  %7090 = vst [vmem:[#allocation161_spill] sm:$0xff] %v4755_v40  ;;  %v4781_v15 = vadd.f32 %v7108_v33, %v7107_v16  ;;  %v4785_v12 = vadd.f32 %v7111_v9, %v7110_v32  ;;  %v4789_v48 = vadd.f32 %v7114_v44, %v7113_v45  ;;  %v7119_v22 = vld [vmem:[#allocation39_spill] sm:$0xff]  ;;  %v7126_v53 = vld [vmem:[#allocation134_spill] sm:$0xff] }
 0x1d7   : > { %7092 = vst [vmem:[#allocation162_spill] sm:$0xff] %v4758_v50  ;;  %7094 = vst [vmem:[#allocation163_spill] sm:$0xff] %v4761_v49  ;;  %v4793_v2 = vadd.f32 %v7117_v46, %v7116_v4  ;;  %v7120_v57 = vld [vmem:[#allocation175_spill] sm:$0xff]  ;;  %v4813_v46 = vadd.f32 %v7132_v7, %v7131_v3  ;;  %v7156_v49 = vld [vmem:[#allocation144_spill] sm:$0xff] }
 0x1d8   : > { %7097 = vst [vmem:[#allocation167_spill] sm:$0xff] %v4765_v56  ;;  %7100 = vst [vmem:[#allocation168_spill] sm:$0xff] %v4769_v29  ;;  %v4797_v21 = vadd.f32 %v7120_v57, %v7119_v22  ;;  %v7122_v14 = vld [vmem:[#allocation43_spill] sm:$0xff]  ;;  %v7150_v29 = vld [vmem:[#allocation142_spill] sm:$0xff] }
 0x1d9   : > { %7103 = vst [vmem:[#allocation169_spill] sm:$0xff] %v4773_v10  ;;  %7106 = vst [vmem:[#allocation164_spill] sm:$0xff] %v4777_v13  ;;  %v4801_v5 = vadd.f32 %v7123_v30, %v7122_v14  ;;  %v7125_v23 = vld [vmem:[#allocation47_spill] sm:$0xff]  ;;  %v7144_v13 = vld [vmem:[#allocation140_spill] sm:$0xff] }
 0x1da   : > { %7109 = vst [vmem:[#allocation165_spill] sm:$0xff] %v4781_v15  ;;  %7112 = vst [vmem:[#allocation166_spill] sm:$0xff] %v4785_v12  ;;  %v4805_v34 = vadd.f32 %v7126_v53, %v7125_v23  ;;  %v7128_v33 = vld [vmem:[#allocation51_spill] sm:$0xff]  ;;  %v7138_v12 = vld [vmem:[#allocation138_spill] sm:$0xff] }
 0x1db   : > { %7115 = vst [vmem:[#allocation170_spill] sm:$0xff] %v4789_v48  ;;  %7118 = vst [vmem:[#allocation171_spill] sm:$0xff] %v4793_v2  ;;  %v7129_v9 = vld [vmem:[#allocation135_spill] sm:$0xff]  ;;  %v7135_v48 = vld [vmem:[#allocation137_spill] sm:$0xff] }
 0x1dc   : > { %7121 = vst [vmem:[#allocation172_spill] sm:$0xff] %v4797_v21  ;;  %7124 = vst [vmem:[#allocation173_spill] sm:$0xff] %v4801_v5  ;;  %v4809_v44 = vadd.f32 %v7129_v9, %v7128_v33  ;;  %v7134_v2 = vld [vmem:[#allocation59_spill] sm:$0xff]  ;;  %v7147_v10 = vld [vmem:[#allocation141_spill] sm:$0xff] }
 0x1dd   : > { %7127 = vst [vmem:[#allocation174_spill] sm:$0xff] %v4805_v34  ;;  %7133 = vst [vmem:[#allocation176_spill] sm:$0xff] %v4813_v46  ;;  %v4817_v57 = vadd.f32 %v7135_v48, %v7134_v2  ;;  %v7137_v21 = vld [vmem:[#allocation63_spill] sm:$0xff]  ;;  %v7159_v50 = vld [vmem:[#allocation145_spill] sm:$0xff] }
 0x1de   : > { %7130 = vst [vmem:[#allocation175_spill] sm:$0xff] %v4809_v44  ;;  %v4821_v30 = vadd.f32 %v7138_v12, %v7137_v21  ;;  %v7140_v5 = vld [vmem:[#allocation67_spill] sm:$0xff]  ;;  %v7162_v40 = vld [vmem:[#allocation146_spill] sm:$0xff]  ;;  %v7168_v28 = vld [vmem:[#allocation148_spill] sm:$0xff] }
 0x1df   : > { %7136 = vst [vmem:[#allocation134_spill] sm:$0xff] %v4817_v57  ;;  %v7141_v15 = vld [vmem:[#allocation139_spill] sm:$0xff]  ;;  %v7171_v24 = vld [vmem:[#allocation149_spill] sm:$0xff]  ;;  %v7175_v6 = vld [vmem:[#allocation150_spill] sm:$0xff] }
 0x1e0   : > { %7139 = vst [vmem:[#allocation135_spill] sm:$0xff] %v4821_v30  ;;  %v4825_v53 = vadd.f32 %v7141_v15, %v7140_v5  ;;  %v7143_v34 = vld [vmem:[#allocation71_spill] sm:$0xff] }
 0x1e1   : > { %v4829_v9 = vadd.f32 %v7144_v13, %v7143_v34  ;;  %v7146_v44 = vld [vmem:[#allocation75_spill] sm:$0xff] }
 0x1e2   : > { %7142 = vst [vmem:[#allocation136_spill] sm:$0xff] %v4825_v53  ;;  %v4833_v7 = vadd.f32 %v7147_v10, %v7146_v44  ;;  %v7149_v46 = vld [vmem:[#allocation79_spill] sm:$0xff] }
 0x1e3   : > { %7145 = vst [vmem:[#allocation137_spill] sm:$0xff] %v4829_v9  ;;  %v4837_v48 = vadd.f32 %v7150_v29, %v7149_v46  ;;  %v7152_v57 = vld [vmem:[#allocation83_spill] sm:$0xff] }
 0x1e4   : > { %7148 = vst [vmem:[#allocation138_spill] sm:$0xff] %v4833_v7  ;;  %v7153_v56 = vld [vmem:[#allocation143_spill] sm:$0xff] }
 0x1e5   : > { %7151 = vst [vmem:[#allocation139_spill] sm:$0xff] %v4837_v48  ;;  %v4841_v12 = vadd.f32 %v7153_v56, %v7152_v57  ;;  %v7155_v30 = vld [vmem:[#allocation87_spill] sm:$0xff] }
 0x1e6   : > { %v4845_v15 = vadd.f32 %v7156_v49, %v7155_v30  ;;  %v7158_v53 = vld [vmem:[#allocation91_spill] sm:$0xff] }
 0x1e7   : > { %7154 = vst [vmem:[#allocation140_spill] sm:$0xff] %v4841_v12  ;;  %v4849_v13 = vadd.f32 %v7159_v50, %v7158_v53  ;;  %v7161_v9 = vld [vmem:[#allocation95_spill] sm:$0xff] }
 0x1e8   : > { %7157 = vst [vmem:[#allocation141_spill] sm:$0xff] %v4845_v15  ;;  %v4853_v10 = vadd.f32 %v7162_v40, %v7161_v9  ;;  %v7164_v7 = vld [vmem:[#allocation99_spill] sm:$0xff] }
 0x1e9   : > { %7160 = vst [vmem:[#allocation142_spill] sm:$0xff] %v4849_v13  ;;  %v7165_v0 = vld [vmem:[#allocation147_spill] sm:$0xff] }
 0x1ea   : > { %7163 = vst [vmem:[#allocation143_spill] sm:$0xff] %v4853_v10  ;;  %v4857_v29 = vadd.f32 %v7165_v0, %v7164_v7  ;;  %v7167_v48 = vld [vmem:[#allocation103_spill] sm:$0xff] }
 0x1eb   : > { %v4861_v56 = vadd.f32 %v7168_v28, %v7167_v48  ;;  %v7170_v12 = vld [vmem:[#allocation107_spill] sm:$0xff]  ;;  %v7182_v48 = vld [vmem:[#allocation153_spill] sm:$0xff] }
 0x1ec   : > { %7166 = vst [vmem:[#allocation144_spill] sm:$0xff] %v4857_v29  ;;  %v4865_v49 = vadd.f32 %v7171_v24, %v7170_v12  ;;  %v7173_v15 = vld [vmem:[#allocation111_spill] sm:$0xff]  ;;  %v7185_v12 = vld [vmem:[#allocation154_spill] sm:$0xff] }
 0x1ed   : > { %7169 = vst [vmem:[#allocation145_spill] sm:$0xff] %v4861_v56  ;;  %v4869_v50 = vadd.f32 %v4581_v42, %v7173_v15  ;;  %v7174_v13 = vld [vmem:[#allocation115_spill] sm:$0xff] }
 0x1ee   : > { %7172 = vst [vmem:[#allocation146_spill] sm:$0xff] %v4865_v49  ;;  %v4873_v40 = vadd.f32 %v7175_v6, %v7174_v13  ;;  %v7177_v10 = vld [vmem:[#allocation119_spill] sm:$0xff]  ;;  %v1488_v6 = vmul.f32 %v7095_v26, %v7095_v26  ;;  %v1495_v26 = vmul.f32 %v7116_v4, %v7116_v4 }
 0x1ef   : > { %v7178_v62 = vld [vmem:[#allocation151_spill] sm:$0xff] }
 0x1f0   : > { %7176 = vst [vmem:[#allocation147_spill] sm:$0xff] %v4873_v40  ;;  %v4877_v0 = vadd.f32 %v7178_v62, %v7177_v10  ;;  %v7179_v29 = vld [vmem:[#allocation123_spill] sm:$0xff]  ;;  %v1489_v40 = vmul.f32 %v7098_v35, %v7098_v35  ;;  %v1490_v62 = vmul.f32 %v7101_v17, %v7101_v17  ;;  %v4908_v35 = vadd.f32 %v1488_v6, %v4620_v39 }
 0x1f1   : > { %v4881_v28 = vadd.f32 %v7180_v11, %v7179_v29  ;;  %v7181_v56 = vld [vmem:[#allocation127_spill] sm:$0xff]  ;;  %v1491_v11 = vmul.f32 %v7104_v58, %v7104_v58  ;;  %v4929_v39 = vadd.f32 %v1495_v26, %v4641_v61  ;;  %v1502_v61 = vmul.f32 %v7137_v21, %v7137_v21  ;;  %v7199_v26 = vld [vmem:[#allocation157_spill] sm:$0xff] }
 0x1f2   : > { %v4885_v24 = vadd.f32 %v7182_v48, %v7181_v56  ;;  %v7184_v49 = vld [vmem:[#allocation131_spill] sm:$0xff]  ;;  %v1492_v48 = vmul.f32 %v7107_v16, %v7107_v16  ;;  %v4911_v17 = vadd.f32 %v1489_v40, %v4623_v43  ;;  %v4914_v58 = vadd.f32 %v1490_v62, %v4626_v47 }
 0x1f3   : > { %v4889_v42 = vadd.f32 %v7185_v12, %v7184_v49  ;;  %v1494_v12 = vmul.f32 %v7113_v45, %v7113_v45  ;;  %v4917_v16 = vadd.f32 %v1491_v11, %v4629_v51  ;;  %v1496_v43 = vmul.f32 %v7119_v22, %v7119_v22 }
 0x1f4   : > { %7183 = vst [vmem:[#allocation148_spill] sm:$0xff] %v4885_v24  ;;  %v1493_v24 = vmul.f32 %v7110_v32, %v7110_v32  ;;  %v4920_v32 = vadd.f32 %v1492_v48, %v4632_v55  ;;  %v1497_v47 = vmul.f32 %v7122_v14, %v7122_v14  ;;  %v1498_v51 = vmul.f32 %v7125_v23, %v7125_v23  ;;  %v7197_v48 = vld [vmem:[#allocation156_spill] sm:$0xff] }
 0x1f5   : > { %v4926_v4 = vadd.f32 %v1494_v12, %v4638_v63  ;;  %v1499_v55 = vmul.f32 %v7128_v33, %v7128_v33  ;;  %v1501_v63 = vmul.f32 %v7134_v2, %v7134_v2  ;;  %v1503_v22 = vmul.f32 %v7140_v5, %v7140_v5 }
 0x1f6   : > { %v4923_v45 = vadd.f32 %v1493_v24, %v4635_v59  ;;  %v1500_v59 = vmul.f32 %v7131_v3, %v7131_v3  ;;  %v4948_v14 = vadd.f32 %v1496_v43, %v4660_v36  ;;  %v4951_v23 = vadd.f32 %v1497_v47, %v4663_v60  ;;  %v7201_v43 = vld [vmem:[#allocation158_spill] sm:$0xff]  ;;  %v7203_v47 = vld [vmem:[#allocation159_spill] sm:$0xff] }
 0x1f7   : > { %v4954_v33 = vadd.f32 %v1498_v51, %v4666_v25  ;;  %v4957_v3 = vadd.f32 %v1499_v55, %v4669_v18  ;;  %v4963_v21 = vadd.f32 %v1501_v63, %v4675_v38  ;;  %v4966_v5 = vadd.f32 %v1502_v61, %v4678_v54  ;;  %v7205_v51 = vld [vmem:[#allocation160_spill] sm:$0xff]  ;;  %v7207_v55 = vld [vmem:[#allocation161_spill] sm:$0xff]  ;;  %v7211_v63 = vld [vmem:[#allocation163_spill] sm:$0xff] }
 0x1f8   : > { %v4960_v2 = vadd.f32 %v1500_v59, %v4672_v8  ;;  %v4969_v36 = vadd.f32 %v1503_v22, %v4681_v1  ;;  %v1504_v60 = vmul.f32 %v7143_v34, %v7143_v34  ;;  %v1505_v25 = vmul.f32 %v7146_v44, %v7146_v44  ;;  %v7209_v59 = vld [vmem:[#allocation162_spill] sm:$0xff]  ;;  %v7213_v22 = vld [vmem:[#allocation9_spill] sm:$0xff] }
 0x1f9   : > { %v1506_v18 = vmul.f32 %v7149_v46, %v7149_v46  ;;  %v1507_v8 = vmul.f32 %v7152_v57, %v7152_v57  ;;  %v1508_v38 = vmul.f32 %v7155_v30, %v7155_v30  ;;  %v1509_v54 = vmul.f32 %v7158_v53, %v7158_v53 }
 0x1fa   : > { %v1510_v1 = vmul.f32 %v7161_v9, %v7161_v9  ;;  %v1511_v34 = vmul.f32 %v7164_v7, %v7164_v7  ;;  %v4988_v44 = vadd.f32 %v1504_v60, %v4700_v41  ;;  %v4991_v46 = vadd.f32 %v1505_v25, %v4703_v31  ;;  %v7193_v41 = vld [vmem:[#allocation155_spill] sm:$0xff] }
 0x1fb   : > { %v4994_v57 = vadd.f32 %v1506_v18, %v4706_v52  ;;  %v4997_v30 = vadd.f32 %v1507_v8, %v4709_v27  ;;  %v5000_v53 = vadd.f32 %v1508_v38, %v4712_v20  ;;  %v5003_v9 = vadd.f32 %v1509_v54, %v4715_v37  ;;  %v7195_v31 = vld [vmem:[#allocation103_spill] sm:$0xff]  ;;  %v7215_v18 = vld [vmem:[#allocation13_spill] sm:$0xff]  ;;  %v7216_v8 = vld [vmem:[#allocation168_spill] sm:$0xff] }
 0x1fc   : > { %7186 = vst [vmem:[#allocation149_spill] sm:$0xff] %v4988_v44  ;;  %7187 = vst [vmem:[#allocation150_spill] sm:$0xff] %v4991_v46  ;;  %v5006_v7 = vadd.f32 %v1510_v1, %v4718_v19  ;;  %v5009_v40 = vadd.f32 %v1511_v34, %v7193_v41  ;;  %v1512_v24 = vmul.f32 %v7195_v31, %v7195_v31  ;;  %v7196_v52 = vld [vmem:[#allocation107_spill] sm:$0xff]  ;;  %v7217_v54 = vld [vmem:[#allocation17_spill] sm:$0xff] }
 0x1fd   : > { %7188 = vst [vmem:[#allocation151_spill] sm:$0xff] %v4994_v57  ;;  %7189 = vst [vmem:[#allocation152_spill] sm:$0xff] %v4997_v30  ;;  %v1513_v6 = vmul.f32 %v7196_v52, %v7196_v52  ;;  %v1514_v27 = vmul.f32 %v7173_v15, %v7173_v15  ;;  %v1515_v20 = vmul.f32 %v7174_v13, %v7174_v13  ;;  %v7214_v60 = vld [vmem:[#allocation167_spill] sm:$0xff]  ;;  %v7218_v1 = vld [vmem:[#allocation169_spill] sm:$0xff] }
 0x1fe   : > { %7190 = vst [vmem:[#allocation153_spill] sm:$0xff] %v5000_v53  ;;  %7191 = vst [vmem:[#allocation154_spill] sm:$0xff] %v5003_v9  ;;  %v1516_v37 = vmul.f32 %v7177_v10, %v7177_v10  ;;  %v1517_v19 = vmul.f32 %v7179_v29, %v7179_v29  ;;  %v1518_v62 = vmul.f32 %v7181_v56, %v7181_v56  ;;  %v7219_v41 = vld [vmem:[#allocation21_spill] sm:$0xff]  ;;  %v7220_v31 = vld [vmem:[#allocation164_spill] sm:$0xff] }
 0x1ff   : > { %7192 = vst [vmem:[#allocation177_spill] sm:$0xff] %v5006_v7  ;;  %7194 = vst [vmem:[#allocation155_spill] sm:$0xff] %v5009_v40  ;;  %v1519_v11 = vmul.f32 %v7184_v49, %v7184_v49  ;;  %v5028_v12 = vadd.f32 %v1512_v24, %v7197_v48  ;;  %v5031_v15 = vadd.f32 %v1513_v6, %v7199_v26  ;;  %v7221_v52 = vld [vmem:[#allocation25_spill] sm:$0xff]  ;;  %v7252_v40 = vld [vmem:[#allocation140_spill] sm:$0xff] }
 0x200   : > { %v5034_v13 = vadd.f32 %v1514_v27, %v7201_v43  ;;  %v5037_v10 = vadd.f32 %v1515_v20, %v7203_v47  ;;  %v5040_v29 = vadd.f32 %v1516_v37, %v7205_v51  ;;  %v5043_v56 = vadd.f32 %v1517_v19, %v7207_v55  ;;  %v7222_v6 = vld [vmem:[#allocation165_spill] sm:$0xff]  ;;  %v7224_v37 = vld [vmem:[#allocation166_spill] sm:$0xff]  ;;  %v7228_v43 = vld [vmem:[#allocation171_spill] sm:$0xff] }
 0x201   : > { %7198 = vst [vmem:[#allocation156_spill] sm:$0xff] %v5028_v12  ;;  %7200 = vst [vmem:[#allocation157_spill] sm:$0xff] %v5031_v15  ;;  %v5046_v49 = vadd.f32 %v1518_v62, %v7209_v59  ;;  %v5049_v61 = vadd.f32 %v1519_v11, %v7211_v63  ;;  %v1616_v25 = vadd.f32 %v7214_v60, %v7213_v22  ;;  %v7223_v20 = vld [vmem:[#allocation29_spill] sm:$0xff]  ;;  %v7226_v11 = vld [vmem:[#allocation170_spill] sm:$0xff] }
 0x202   : > { %7202 = vst [vmem:[#allocation158_spill] sm:$0xff] %v5034_v13  ;;  %7204 = vst [vmem:[#allocation159_spill] sm:$0xff] %v5037_v10  ;;  %v1617_v38 = vadd.f32 %v7216_v8, %v7215_v18  ;;  %v1618_v34 = vadd.f32 %v7218_v1, %v7217_v54  ;;  %v1619_v24 = vadd.f32 %v7220_v31, %v7219_v41  ;;  %v7225_v62 = vld [vmem:[#allocation33_spill] sm:$0xff]  ;;  %v7230_v55 = vld [vmem:[#allocation172_spill] sm:$0xff] }
 0x203   : > { %7206 = vst [vmem:[#allocation160_spill] sm:$0xff] %v5040_v29  ;;  %7208 = vst [vmem:[#allocation161_spill] sm:$0xff] %v5043_v56  ;;  %v1620_v27 = vadd.f32 %v7222_v6, %v7221_v52  ;;  %v1621_v19 = vadd.f32 %v7224_v37, %v7223_v20  ;;  %v1622_v48 = vadd.f32 %v7226_v11, %v7225_v62  ;;  %v7227_v26 = vld [vmem:[#allocation37_spill] sm:$0xff]  ;;  %v7234_v31 = vld [vmem:[#allocation174_spill] sm:$0xff] }
 0x204   : > { %7210 = vst [vmem:[#allocation162_spill] sm:$0xff] %v5046_v49  ;;  %7212 = vst [vmem:[#allocation163_spill] sm:$0xff] %v5049_v61  ;;  %v1623_v47 = vadd.f32 %v7228_v43, %v7227_v26  ;;  %v7229_v51 = vld [vmem:[#allocation41_spill] sm:$0xff]  ;;  %v7236_v61 = vld [vmem:[#allocation175_spill] sm:$0xff] }
 0x205   : > { %1648 = vst [vmem:[#allocation2] sm:$0xff] %v1616_v25  ;;  %1649 = vst [vmem:[#allocation2 + $0x8] sm:$0xff] %v1617_v38  ;;  %v1624_v59 = vadd.f32 %v7230_v55, %v7229_v51  ;;  %v7231_v63 = vld [vmem:[#allocation45_spill] sm:$0xff]  ;;  %v7238_v38 = vld [vmem:[#allocation176_spill] sm:$0xff] }
 0x206   : > { %1650 = vst [vmem:[#allocation2 + $0x10] sm:$0xff] %v1618_v34  ;;  %1651 = vst [vmem:[#allocation2 + $0x18] sm:$0xff] %v1619_v24  ;;  %v7232_v60 = vld [vmem:[#allocation173_spill] sm:$0xff]  ;;  %v7240_v11 = vld [vmem:[#allocation134_spill] sm:$0xff] }
 0x207   : > { %v1625_v8 = vadd.f32 %v7232_v60, %v7231_v63  ;;  %v7233_v1 = vld [vmem:[#allocation49_spill] sm:$0xff]  ;;  %1652 = vst [vmem:[#allocation2 + $0x20] sm:$0xff] %v1620_v27  ;;  %1653 = vst [vmem:[#allocation2 + $0x28] sm:$0xff] %v1621_v19  ;;  %v7242_v56 = vld [vmem:[#allocation135_spill] sm:$0xff] }
 0x208   : > { %v1626_v6 = vadd.f32 %v7234_v31, %v7233_v1  ;;  %v7235_v37 = vld [vmem:[#allocation53_spill] sm:$0xff]  ;;  %1654 = vst [vmem:[#allocation2 + $0x30] sm:$0xff] %v1622_v48  ;;  %1655 = vst [vmem:[#allocation2 + $0x38] sm:$0xff] %v1623_v47  ;;  %v7244_v10 = vld [vmem:[#allocation136_spill] sm:$0xff] }
 0x209   : > { %v1627_v49 = vadd.f32 %v7236_v61, %v7235_v37  ;;  %v7237_v25 = vld [vmem:[#allocation57_spill] sm:$0xff]  ;;  %1656 = vst [vmem:[#allocation2 + $0x40] sm:$0xff] %v1624_v59  ;;  %1657 = vst [vmem:[#allocation2 + $0x48] sm:$0xff] %v1625_v8  ;;  %v7248_v47 = vld [vmem:[#allocation138_spill] sm:$0xff] }
 0x20a   : > { %v1628_v34 = vadd.f32 %v7238_v38, %v7237_v25  ;;  %v7239_v24 = vld [vmem:[#allocation61_spill] sm:$0xff]  ;;  %1658 = vst [vmem:[#allocation2 + $0x50] sm:$0xff] %v1626_v6  ;;  %v7250_v15 = vld [vmem:[#allocation139_spill] sm:$0xff]  ;;  %v7256_v8 = vld [vmem:[#allocation142_spill] sm:$0xff] }
 0x20b   : > { %v1629_v43 = vadd.f32 %v7240_v11, %v7239_v24  ;;  %v7241_v55 = vld [vmem:[#allocation65_spill] sm:$0xff]  ;;  %1659 = vst [vmem:[#allocation2 + $0x58] sm:$0xff] %v1627_v49  ;;  %v7258_v9 = vld [vmem:[#allocation143_spill] sm:$0xff]  ;;  %v7260_v30 = vld [vmem:[#allocation144_spill] sm:$0xff] }
 0x20c   : > { %v1630_v29 = vadd.f32 %v7242_v56, %v7241_v55  ;;  %v7243_v60 = vld [vmem:[#allocation69_spill] sm:$0xff]  ;;  %1660 = vst [vmem:[#allocation2 + $0x60] sm:$0xff] %v1628_v34  ;;  %v7264_v34 = vld [vmem:[#allocation146_spill] sm:$0xff]  ;;  %v7267_v44 = vld [vmem:[#allocation147_spill] sm:$0xff] }
 0x20d   : > { %v1631_v13 = vadd.f32 %v7244_v10, %v7243_v60  ;;  %v7245_v61 = vld [vmem:[#allocation73_spill] sm:$0xff]  ;;  %1661 = vst [vmem:[#allocation2 + $0x68] sm:$0xff] %v1629_v43 }
 0x20e   : > { %v7246_v27 = vld [vmem:[#allocation137_spill] sm:$0xff]  ;;  %1662 = vst [vmem:[#allocation2 + $0x70] sm:$0xff] %v1630_v29 }
 0x20f   : > { %v1632_v19 = vadd.f32 %v7246_v27, %v7245_v61  ;;  %v7247_v48 = vld [vmem:[#allocation77_spill] sm:$0xff]  ;;  %1663 = vst [vmem:[#allocation2 + $0x78] sm:$0xff] %v1631_v13 }
 0x210   : > { %v1633_v31 = vadd.f32 %v7248_v47, %v7247_v48  ;;  %v7249_v38 = vld [vmem:[#allocation81_spill] sm:$0xff] }
 0x211   : > { %v1634_v12 = vadd.f32 %v7250_v15, %v7249_v38  ;;  %v7251_v11 = vld [vmem:[#allocation85_spill] sm:$0xff]  ;;  %1664 = vst [vmem:[#allocation2 + $0x80] sm:$0xff] %v1632_v19 }
 0x212   : > { %v1635_v7 = vadd.f32 %v7252_v40, %v7251_v11  ;;  %v7253_v10 = vld [vmem:[#allocation89_spill] sm:$0xff]  ;;  %1665 = vst [vmem:[#allocation2 + $0x88] sm:$0xff] %v1633_v31  ;;  %v7271_v31 = vld [vmem:[#allocation148_spill] sm:$0xff] }
 0x213   : > { %v7254_v56 = vld [vmem:[#allocation141_spill] sm:$0xff]  ;;  %1666 = vst [vmem:[#allocation2 + $0x90] sm:$0xff] %v1634_v12 }
 0x214   : > { %v1636_v59 = vadd.f32 %v7254_v56, %v7253_v10  ;;  %v7255_v49 = vld [vmem:[#allocation93_spill] sm:$0xff]  ;;  %1667 = vst [vmem:[#allocation2 + $0x98] sm:$0xff] %v1635_v7 }
 0x215   : > { %v1637_v6 = vadd.f32 %v7256_v8, %v7255_v49  ;;  %v7257_v27 = vld [vmem:[#allocation97_spill] sm:$0xff] }
 0x216   : > { %v1638_v53 = vadd.f32 %v7258_v9, %v7257_v27  ;;  %v7259_v47 = vld [vmem:[#allocation101_spill] sm:$0xff]  ;;  %1668 = vst [vmem:[#allocation2 + $0xa0] sm:$0xff] %v1636_v59 }
 0x217   : > { %v1639_v57 = vadd.f32 %v7260_v30, %v7259_v47  ;;  %v7261_v40 = vld [vmem:[#allocation105_spill] sm:$0xff]  ;;  %1669 = vst [vmem:[#allocation2 + $0xa8] sm:$0xff] %v1637_v6 }
 0x218   : > { %v7262_v15 = vld [vmem:[#allocation145_spill] sm:$0xff]  ;;  %1670 = vst [vmem:[#allocation2 + $0xb0] sm:$0xff] %v1638_v53  ;;  %v1719_v53 = vmul.f32 %v7227_v26, %v7227_v26 }
 0x219   : > { %v1640_v29 = vadd.f32 %v7262_v15, %v7261_v40  ;;  %v7263_v13 = vld [vmem:[#allocation109_spill] sm:$0xff]  ;;  %1671 = vst [vmem:[#allocation2 + $0xb8] sm:$0xff] %v1639_v57  ;;  %v1718_v57 = vmul.f32 %v7225_v62, %v7225_v62 }
 0x21a   : > { %v1641_v43 = vadd.f32 %v7264_v34, %v7263_v13  ;;  %v7265_v56 = vld [vmem:[#allocation113_spill] sm:$0xff] }
 0x21b   : > { %v1642_v46 = vadd.f32 %v4869_v50, %v7265_v56  ;;  %v7266_v8 = vld [vmem:[#allocation117_spill] sm:$0xff]  ;;  %1672 = vst [vmem:[#allocation2 + $0xc0] sm:$0xff] %v1640_v29  ;;  %v1712_v50 = vmul.f32 %v7213_v22, %v7213_v22  ;;  %v7277_v29 = vld [vmem:[#allocation152_spill] sm:$0xff] }
 0x21c   : > { %v1643_v49 = vadd.f32 %v7267_v44, %v7266_v8  ;;  %v7268_v30 = vld [vmem:[#allocation121_spill] sm:$0xff]  ;;  %1673 = vst [vmem:[#allocation2 + $0xc8] sm:$0xff] %v1641_v43  ;;  %v1713_v44 = vmul.f32 %v7215_v18, %v7215_v18 }
 0x21d   : > { %v1644_v9 = vadd.f32 %v4877_v0, %v7268_v30  ;;  %v7269_v7 = vld [vmem:[#allocation125_spill] sm:$0xff]  ;;  %1674 = vst [vmem:[#allocation2 + $0xd0] sm:$0xff] %v1642_v46  ;;  %v1714_v0 = vmul.f32 %v7217_v54, %v7217_v54  ;;  %v1717_v46 = vmul.f32 %v7223_v20, %v7223_v20  ;;  %v1744_v22 = vadd.f32 %v1712_v50, %v4908_v35  ;;  %v7281_v50 = vld [vmem:[#allocation155_spill] sm:$0xff] }
 0x21e   : > { %v1645_v12 = vadd.f32 %v4881_v28, %v7269_v7  ;;  %v7270_v19 = vld [vmem:[#allocation129_spill] sm:$0xff]  ;;  %1675 = vst [vmem:[#allocation2 + $0xd8] sm:$0xff] %v1643_v49  ;;  %v1715_v28 = vmul.f32 %v7219_v41, %v7219_v41  ;;  %v1745_v18 = vadd.f32 %v1713_v44, %v4911_v17  ;;  %v1750_v20 = vadd.f32 %v1718_v57, %v4926_v4 }
 0x21f   : > { %v1646_v15 = vadd.f32 %v7271_v31, %v7270_v19  ;;  %v7272_v34 = vld [vmem:[#allocation133_spill] sm:$0xff]  ;;  %1676 = vst [vmem:[#allocation2 + $0xe0] sm:$0xff] %v1644_v9  ;;  %v1746_v54 = vadd.f32 %v1714_v0, %v4914_v58  ;;  %v1751_v49 = vadd.f32 %v1719_v53, %v4929_v39  ;;  %1776 = vst [vmem:[#allocation3] sm:$0xff] %v1744_v22 }
 0x220   : > { %v1647_v13 = vadd.f32 %v4889_v42, %v7272_v34  ;;  %1677 = vst [vmem:[#allocation2 + $0xe8] sm:$0xff] %v1645_v12  ;;  %v1716_v42 = vmul.f32 %v7221_v52, %v7221_v52  ;;  %v1747_v41 = vadd.f32 %v1715_v28, %v4917_v16  ;;  %v1749_v52 = vadd.f32 %v1717_v46, %v4923_v45  ;;  %v7278_v43 = vld [vmem:[#allocation153_spill] sm:$0xff] }
 0x221   : > { %1678 = vst [vmem:[#allocation2 + $0xf0] sm:$0xff] %v1646_v15  ;;  %1777 = vst [vmem:[#allocation3 + $0x8] sm:$0xff] %v1745_v18  ;;  %v1720_v35 = vmul.f32 %v7229_v51, %v7229_v51  ;;  %v1721_v17 = vmul.f32 %v7231_v63, %v7231_v63  ;;  %v1722_v58 = vmul.f32 %v7233_v1, %v7233_v1  ;;  %v7280_v31 = vld [vmem:[#allocation177_spill] sm:$0xff] }
 0x222   : > { %1679 = vst [vmem:[#allocation2 + $0xf8] sm:$0xff] %v1647_v13  ;;  %v1748_v59 = vadd.f32 %v1716_v42, %v4920_v32  ;;  %1778 = vst [vmem:[#allocation3 + $0x10] sm:$0xff] %v1746_v54  ;;  %v1723_v16 = vmul.f32 %v7235_v37, %v7235_v37  ;;  %v1724_v32 = vmul.f32 %v7237_v25, %v7237_v25  ;;  %v7284_v18 = vld [vmem:[#allocation157_spill] sm:$0xff]  ;;  %v7285_v54 = vld [vmem:[#allocation158_spill] sm:$0xff] }
 0x223   : > { %1779 = vst [vmem:[#allocation3 + $0x18] sm:$0xff] %v1747_v41  ;;  %1781 = vst [vmem:[#allocation3 + $0x28] sm:$0xff] %v1749_v52  ;;  %v1725_v45 = vmul.f32 %v7239_v24, %v7239_v24  ;;  %v1726_v4 = vmul.f32 %v7241_v55, %v7241_v55  ;;  %v1727_v39 = vmul.f32 %v7243_v60, %v7243_v60  ;;  %v7274_v60 = vld [vmem:[#allocation149_spill] sm:$0xff] }
 0x224   : > { %1780 = vst [vmem:[#allocation3 + $0x20] sm:$0xff] %v1748_v59  ;;  %1782 = vst [vmem:[#allocation3 + $0x30] sm:$0xff] %v1750_v20  ;;  %v1752_v62 = vadd.f32 %v1720_v35, %v4948_v14  ;;  %v1753_v26 = vadd.f32 %v1721_v17, %v4951_v23  ;;  %v1754_v51 = vadd.f32 %v1722_v58, %v4954_v33  ;;  %v7286_v59 = vld [vmem:[#allocation159_spill] sm:$0xff]  ;;  %v7287_v20 = vld [vmem:[#allocation160_spill] sm:$0xff] }
 0x225   : > { %1783 = vst [vmem:[#allocation3 + $0x38] sm:$0xff] %v1751_v49  ;;  %v1755_v63 = vadd.f32 %v1723_v16, %v4957_v3  ;;  %v1756_v1 = vadd.f32 %v1724_v32, %v4960_v2  ;;  %v1757_v37 = vadd.f32 %v1725_v45, %v4963_v21  ;;  %v1758_v25 = vadd.f32 %v1726_v4, %v4966_v5  ;;  %v7273_v21 = vld [vmem:[#allocation93_spill] sm:$0xff]  ;;  %v7289_v17 = vld [vmem:[#allocation162_spill] sm:$0xff]  ;;  %v7290_v58 = vld [vmem:[#allocation163_spill] sm:$0xff] }
 0x226   : > { %v1759_v24 = vadd.f32 %v1727_v39, %v4969_v36  ;;  %1784 = vst [vmem:[#allocation3 + $0x40] sm:$0xff] %v1752_v62  ;;  %1785 = vst [vmem:[#allocation3 + $0x48] sm:$0xff] %v1753_v26  ;;  %v1728_v14 = vmul.f32 %v7245_v61, %v7245_v61  ;;  %v1729_v23 = vmul.f32 %v7247_v48, %v7247_v48  ;;  %v7275_v48 = vld [vmem:[#allocation150_spill] sm:$0xff] }
 0x227   : > { %1786 = vst [vmem:[#allocation3 + $0x50] sm:$0xff] %v1754_v51  ;;  %1787 = vst [vmem:[#allocation3 + $0x58] sm:$0xff] %v1755_v63  ;;  %v1730_v33 = vmul.f32 %v7249_v38, %v7249_v38  ;;  %v1731_v3 = vmul.f32 %v7251_v11, %v7251_v11  ;;  %v1732_v2 = vmul.f32 %v7253_v10, %v7253_v10  ;;  %v7276_v11 = vld [vmem:[#allocation151_spill] sm:$0xff]  ;;  %v7279_v10 = vld [vmem:[#allocation154_spill] sm:$0xff] }
 0x228   : > { %1788 = vst [vmem:[#allocation3 + $0x60] sm:$0xff] %v1756_v1  ;;  %1789 = vst [vmem:[#allocation3 + $0x68] sm:$0xff] %v1757_v37  ;;  %v1733_v5 = vmul.f32 %v7273_v21, %v7273_v21  ;;  %v1734_v36 = vmul.f32 %v7257_v27, %v7257_v27  ;;  %v1735_v55 = vmul.f32 %v7259_v47, %v7259_v47  ;;  %v7282_v47 = vld [vmem:[#allocation109_spill] sm:$0xff] }
 0x229   : > { %1790 = vst [vmem:[#allocation3 + $0x70] sm:$0xff] %v1758_v25  ;;  %1791 = vst [vmem:[#allocation3 + $0x78] sm:$0xff] %v1759_v24  ;;  %v1760_v61 = vadd.f32 %v1728_v14, %v7274_v60  ;;  %v1761_v38 = vadd.f32 %v1729_v23, %v7275_v48  ;;  %v1762_v6 = vadd.f32 %v1730_v33, %v7276_v11 }
 0x22a   : > { %v1763_v13 = vadd.f32 %v1731_v3, %v7277_v29  ;;  %v1764_v9 = vadd.f32 %v1732_v2, %v7278_v43  ;;  %v1765_v12 = vadd.f32 %v1733_v5, %v7279_v10  ;;  %v1766_v15 = vadd.f32 %v1734_v36, %v7280_v31 }
 0x22b   : > { %v1767_v44 = vadd.f32 %v1735_v55, %v7281_v50  ;;  %1792 = vst [vmem:[#allocation3 + $0x80] sm:$0xff] %v1760_v61  ;;  %1793 = vst [vmem:[#allocation3 + $0x88] sm:$0xff] %v1761_v38  ;;  %v1736_v27 = vmul.f32 %v7261_v40, %v7261_v40  ;;  %v1737_v0 = vmul.f32 %v7282_v47, %v7282_v47 }
 0x22c   : > { %1794 = vst [vmem:[#allocation3 + $0x90] sm:$0xff] %v1762_v6  ;;  %1795 = vst [vmem:[#allocation3 + $0x98] sm:$0xff] %v1763_v13  ;;  %v1738_v28 = vmul.f32 %v7265_v56, %v7265_v56  ;;  %v1739_v42 = vmul.f32 %v7266_v8, %v7266_v8  ;;  %v1740_v46 = vmul.f32 %v7268_v30, %v7268_v30  ;;  %v7283_v56 = vld [vmem:[#allocation156_spill] sm:$0xff]  ;;  %v7288_v30 = vld [vmem:[#allocation161_spill] sm:$0xff] }
 0x22d   : > { %1796 = vst [vmem:[#allocation3 + $0xa0] sm:$0xff] %v1764_v9  ;;  %1797 = vst [vmem:[#allocation3 + $0xa8] sm:$0xff] %v1765_v12  ;;  %v1741_v57 = vmul.f32 %v7269_v7, %v7269_v7  ;;  %v1742_v40 = vmul.f32 %v7270_v19, %v7270_v19  ;;  %v1743_v53 = vmul.f32 %v7272_v34, %v7272_v34 }
 0x22e   : > { %1798 = vst [vmem:[#allocation3 + $0xb0] sm:$0xff] %v1766_v15  ;;  %1799 = vst [vmem:[#allocation3 + $0xb8] sm:$0xff] %v1767_v44  ;;  %v1768_v22 = vadd.f32 %v1736_v27, %v7283_v56  ;;  %v1769_v8 = vadd.f32 %v1737_v0, %v7284_v18  ;;  %v1770_v41 = vadd.f32 %v1738_v28, %v7285_v54 }
 0x22f   : > { %v1771_v52 = vadd.f32 %v1739_v42, %v7286_v59  ;;  %v1772_v49 = vadd.f32 %v1740_v46, %v7287_v20  ;;  %v1773_v35 = vadd.f32 %v1741_v57, %v7288_v30  ;;  %v1774_v7 = vadd.f32 %v1742_v40, %v7289_v17 }
 0x230   : > { %v1775_v16 = vadd.f32 %v1743_v53, %v7290_v58  ;;  %1800 = vst [vmem:[#allocation3 + $0xc0] sm:$0xff] %v1768_v22  ;;  %1801 = vst [vmem:[#allocation3 + $0xc8] sm:$0xff] %v1769_v8 }
 0x231   : > { %1802 = vst [vmem:[#allocation3 + $0xd0] sm:$0xff] %v1770_v41  ;;  %1803 = vst [vmem:[#allocation3 + $0xd8] sm:$0xff] %v1771_v52 }
 0x232   : > { %1804 = vst [vmem:[#allocation3 + $0xe0] sm:$0xff] %v1772_v49  ;;  %1805 = vst [vmem:[#allocation3 + $0xe8] sm:$0xff] %v1773_v35 }
 0x233   : > { %1806 = vst [vmem:[#allocation3 + $0xf0] sm:$0xff] %v1774_v7  ;;  %1807 = vst [vmem:[#allocation3 + $0xf8] sm:$0xff] %v1775_v16 }
 0x234 PF: > { %1809 = sbr.rel (!%p839_p4) target bundleno = 867 (0x363), region = 48 }
 0x23b   : > { %v1812_v19 = vld [vmem:[#allocation2 + $0x10] sm:$0xff]  ;;  %v1810_v34 = vld [vmem:[#allocation2] sm:$0xff]  ;;  %v1813_v32 = vld [vmem:[#allocation2 + $0x18] sm:$0xff]  ;;  %vm2290_vm2 = vcmask 7168  }
 0x23c   : > { %1846 = vadd.xlane.f32.xlu1 %v1812_v19  ;;  %1842 = vadd.xlane.f32.xlu0 %v1810_v34  ;;  %v1811_v45 = vld [vmem:[#allocation2 + $0x8] sm:$0xff]  ;;  %v1814_v39 = vld [vmem:[#allocation2 + $0x20] sm:$0xff]  ;;  %v1817_v62 = vld [vmem:[#allocation2 + $0x38] sm:$0xff] }
 0x23d   : > { %v1815_v4 = vld [vmem:[#allocation2 + $0x28] sm:$0xff]  ;;  %v1816_v26 = vld [vmem:[#allocation2 + $0x30] sm:$0xff]  ;;  %v1818_v63 = vld [vmem:[#allocation2 + $0x40] sm:$0xff] }
 0x23e   : > { %v1819_v51 = vld [vmem:[#allocation2 + $0x48] sm:$0xff]  ;;  %v1821_v1 = vld [vmem:[#allocation2 + $0x58] sm:$0xff]  ;;  %v1820_v37 = vld [vmem:[#allocation2 + $0x50] sm:$0xff] }
 0x23f   : > { %v1823_v25 = vld [vmem:[#allocation2 + $0x68] sm:$0xff]  ;;  %v1822_v24 = vld [vmem:[#allocation2 + $0x60] sm:$0xff]  ;;  %v1825_v14 = vld [vmem:[#allocation2 + $0x78] sm:$0xff] }
 0x240   : > { %1848 = vadd.xlane.f32.xlu1 %v1813_v32  ;;  %1844 = vadd.xlane.f32.xlu0 %v1811_v45  ;;  %v1824_v23 = vld [vmem:[#allocation2 + $0x70] sm:$0xff]  ;;  %v1827_v33 = vld [vmem:[#allocation2 + $0x88] sm:$0xff]  ;;  %v1826_v3 = vld [vmem:[#allocation2 + $0x80] sm:$0xff] }
 0x241   : > { %v1829_v2 = vld [vmem:[#allocation2 + $0x98] sm:$0xff]  ;;  %v1828_v21 = vld [vmem:[#allocation2 + $0x90] sm:$0xff]  ;;  %v1831_v5 = vld [vmem:[#allocation2 + $0xa8] sm:$0xff] }
 0x242   : > { %v1830_v36 = vld [vmem:[#allocation2 + $0xa0] sm:$0xff]  ;;  %v1833_v55 = vld [vmem:[#allocation2 + $0xb8] sm:$0xff]  ;;  %v1832_v60 = vld [vmem:[#allocation2 + $0xb0] sm:$0xff] }
 0x243   : > { %v1835_v61 = vld [vmem:[#allocation2 + $0xc8] sm:$0xff]  ;;  %v1834_v48 = vld [vmem:[#allocation2 + $0xc0] sm:$0xff]  ;;  %v1837_v38 = vld [vmem:[#allocation2 + $0xd8] sm:$0xff] }
 0x244   : > { %1852 = vadd.xlane.f32.xlu1 %v1815_v4  ;;  %1850 = vadd.xlane.f32.xlu0 %v1814_v39  ;;  %v1836_v11 = vld [vmem:[#allocation2 + $0xd0] sm:$0xff]  ;;  %v1839_v6 = vld [vmem:[#allocation2 + $0xe8] sm:$0xff]  ;;  %v1838_v29 = vld [vmem:[#allocation2 + $0xe0] sm:$0xff] }
 0x245   : > { %v1841_v13 = vld [vmem:[#allocation2 + $0xf8] sm:$0xff]  ;;  %v1840_v43 = vld [vmem:[#allocation2 + $0xf0] sm:$0xff]  ;;  %v1939_v9 = vld [vmem:[#allocation3 + $0x8] sm:$0xff] }
 0x246   : > { %v1938_v10 = vld [vmem:[#allocation3] sm:$0xff]  ;;  %v1941_v12 = vld [vmem:[#allocation3 + $0x18] sm:$0xff]  ;;  %v1940_v31 = vld [vmem:[#allocation3 + $0x10] sm:$0xff] }
 0x247   : > { %v1943_v15 = vld [vmem:[#allocation3 + $0x28] sm:$0xff]  ;;  %v1942_v50 = vld [vmem:[#allocation3 + $0x20] sm:$0xff]  ;;  %v1945_v44 = vld [vmem:[#allocation3 + $0x38] sm:$0xff] }
 0x248   : > { %1856 = vadd.xlane.f32.xlu1 %v1817_v62  ;;  %1854 = vadd.xlane.f32.xlu0 %v1816_v26  ;;  %v1944_v27 = vld [vmem:[#allocation3 + $0x30] sm:$0xff]  ;;  %v1947_v47 = vld [vmem:[#allocation3 + $0x48] sm:$0xff]  ;;  %v1946_v0 = vld [vmem:[#allocation3 + $0x40] sm:$0xff] }
 0x249   : > { %v1949_v28 = vld [vmem:[#allocation3 + $0x58] sm:$0xff]  ;;  %v1948_v42 = vld [vmem:[#allocation3 + $0x50] sm:$0xff]  ;;  %v1951_v46 = vld [vmem:[#allocation3 + $0x68] sm:$0xff] }
 0x24a   : > { %v1950_v57 = vld [vmem:[#allocation3 + $0x60] sm:$0xff]  ;;  %v1953_v40 = vld [vmem:[#allocation3 + $0x78] sm:$0xff]  ;;  %v1952_v53 = vld [vmem:[#allocation3 + $0x70] sm:$0xff] }
 0x24b   : > { %v1955_v56 = vld [vmem:[#allocation3 + $0x88] sm:$0xff]  ;;  %v1954_v22 = vld [vmem:[#allocation3 + $0x80] sm:$0xff]  ;;  %v1957_v18 = vld [vmem:[#allocation3 + $0x98] sm:$0xff] }
 0x24c   : > { %1860 = vadd.xlane.f32.xlu1 %v1819_v51  ;;  %1858 = vadd.xlane.f32.xlu0 %v1818_v63  ;;  %v1956_v8 = vld [vmem:[#allocation3 + $0x90] sm:$0xff]  ;;  %v1959_v54 = vld [vmem:[#allocation3 + $0xa8] sm:$0xff]  ;;  %v1958_v41 = vld [vmem:[#allocation3 + $0xa0] sm:$0xff] }
 0x24d   : > { %v1961_v59 = vld [vmem:[#allocation3 + $0xb8] sm:$0xff]  ;;  %v1960_v52 = vld [vmem:[#allocation3 + $0xb0] sm:$0xff]  ;;  %v1963_v20 = vld [vmem:[#allocation3 + $0xc8] sm:$0xff] }
 0x24e   : > { %v1962_v49 = vld [vmem:[#allocation3 + $0xc0] sm:$0xff]  ;;  %v1965_v30 = vld [vmem:[#allocation3 + $0xd8] sm:$0xff]  ;;  %v1964_v35 = vld [vmem:[#allocation3 + $0xd0] sm:$0xff] }
 0x24f   : > { %v1967_v17 = vld [vmem:[#allocation3 + $0xe8] sm:$0xff]  ;;  %v1966_v7 = vld [vmem:[#allocation3 + $0xe0] sm:$0xff]  ;;  %v1969_v58 = vld [vmem:[#allocation3 + $0xf8] sm:$0xff] }
 0x250   : > { %1864 = vadd.xlane.f32.xlu1 %v1821_v1  ;;  %1862 = vadd.xlane.f32.xlu0 %v1820_v37  ;;  %v1968_v16 = vld [vmem:[#allocation3 + $0xf0] sm:$0xff] }
 0x254   : > { %1868 = vadd.xlane.f32.xlu1 %v1823_v25  ;;  %1866 = vadd.xlane.f32.xlu0 %v1822_v24 }
 0x258   : > { %1872 = vadd.xlane.f32.xlu1 %v1825_v14  ;;  %1870 = vadd.xlane.f32.xlu0 %v1824_v23 }
 0x25c   : > { %1876 = vadd.xlane.f32.xlu1 %v1827_v33  ;;  %1874 = vadd.xlane.f32.xlu0 %v1826_v3 }
 0x260   : > { %1880 = vadd.xlane.f32.xlu1 %v1829_v2  ;;  %1878 = vadd.xlane.f32.xlu0 %v1828_v21 }
 0x264   : > { %1884 = vadd.xlane.f32.xlu1 %v1831_v5  ;;  %1882 = vadd.xlane.f32.xlu0 %v1830_v36 }
 0x268   : > { %1888 = vadd.xlane.f32.xlu1 %v1833_v55  ;;  %1886 = vadd.xlane.f32.xlu0 %v1832_v60 }
 0x26c   : > { %1892 = vadd.xlane.f32.xlu1 %v1835_v61  ;;  %1890 = vadd.xlane.f32.xlu0 %v1834_v48 }
 0x270   : > { %1896 = vadd.xlane.f32.xlu1 %v1837_v38  ;;  %1894 = vadd.xlane.f32.xlu0 %v1836_v11 }
 0x274   : > { %1900 = vadd.xlane.f32.xlu1 %v1839_v6  ;;  %1898 = vadd.xlane.f32.xlu0 %v1838_v29 }
 0x278   : > { %1904 = vadd.xlane.f32.xlu1 %v1841_v13  ;;  %1902 = vadd.xlane.f32.xlu0 %v1840_v43 }
 0x27c   : > { %1972 = vadd.xlane.f32.xlu1 %v1939_v9  ;;  %1970 = vadd.xlane.f32.xlu0 %v1938_v10 }
 0x280   : > { %1976 = vadd.xlane.f32.xlu1 %v1941_v12  ;;  %1974 = vadd.xlane.f32.xlu0 %v1940_v31 }
 0x284   : > { %1980 = vadd.xlane.f32.xlu1 %v1943_v15  ;;  %1978 = vadd.xlane.f32.xlu0 %v1942_v50 }
 0x288   : > { %1984 = vadd.xlane.f32.xlu1 %v1945_v44  ;;  %1982 = vadd.xlane.f32.xlu0 %v1944_v27 }
 0x28c   : > { %1988 = vadd.xlane.f32.xlu1 %v1947_v47  ;;  %1986 = vadd.xlane.f32.xlu0 %v1946_v0 }
 0x290   : > { %1992 = vadd.xlane.f32.xlu1 %v1949_v28  ;;  %1990 = vadd.xlane.f32.xlu0 %v1948_v42 }
 0x294   : > { %1996 = vadd.xlane.f32.xlu1 %v1951_v46  ;;  %1994 = vadd.xlane.f32.xlu0 %v1950_v57 }
 0x298   : > { %2000 = vadd.xlane.f32.xlu1 %v1953_v40  ;;  %1998 = vadd.xlane.f32.xlu0 %v1952_v53 }
 0x29c   : > { %2004 = vadd.xlane.f32.xlu1 %v1955_v56  ;;  %2002 = vadd.xlane.f32.xlu0 %v1954_v22 }
 0x2a0   : > { %2008 = vadd.xlane.f32.xlu1 %v1957_v18  ;;  %2006 = vadd.xlane.f32.xlu0 %v1956_v8 }
 0x2a4   : > { %2012 = vadd.xlane.f32.xlu1 %v1959_v54  ;;  %2010 = vadd.xlane.f32.xlu0 %v1958_v41 }
 0x2a8   : > { %2016 = vadd.xlane.f32.xlu1 %v1961_v59  ;;  %2014 = vadd.xlane.f32.xlu0 %v1960_v52 }
 0x2ac   : > { %2020 = vadd.xlane.f32.xlu1 %v1963_v20  ;;  %2018 = vadd.xlane.f32.xlu0 %v1962_v49 }
 0x2b0   : > { %2024 = vadd.xlane.f32.xlu1 %v1965_v30  ;;  %2022 = vadd.xlane.f32.xlu0 %v1964_v35 }
 0x2b4   : > { %2028 = vadd.xlane.f32.xlu1 %v1967_v17  ;;  %2026 = vadd.xlane.f32.xlu0 %v1966_v7 }
 0x2b8   : > { %2032 = vadd.xlane.f32.xlu1 %v1969_v58  ;;  %2030 = vadd.xlane.f32.xlu0 %v1968_v16 }
 0x2c9   : > { %v1847_v19 = vpop.xlane.xlu1 %1846  ;;  %v1843_v34 = vpop.xlane.xlu0 %1842 }
 0x2ca   : > { %v5231_v13 = vmul.f32 0.001953125, %v1847_v19  ;;  %v5233_v43 = vmul.f32 0.001953125, %v1843_v34 }
 0x2cc   : > { %v2068_v47 = vmul.f32 %v5231_v13, %v5231_v13  ;;  %v2066_v46 = vmul.f32 %v5233_v43, %v5233_v43 }
 0x2cd   : > { %v1849_v32 = vpop.xlane.xlu1 %1848  ;;  %v1845_v45 = vpop.xlane.xlu0 %1844 }
 0x2ce   : > { %v5235_v9 = vmul.f32 0.001953125, %v1849_v32  ;;  %v5237_v10 = vmul.f32 0.001953125, %v1845_v45 }
 0x2d0   : > { %v2069_v57 = vmul.f32 %v5235_v9, %v5235_v9  ;;  %v2067_v56 = vmul.f32 %v5237_v10, %v5237_v10 }
 0x2d1   : > { %v1853_v4 = vpop.xlane.xlu1 %1852  ;;  %v1851_v39 = vpop.xlane.xlu0 %1850 }
 0x2d2   : > { %v5239_v12 = vmul.f32 0.001953125, %v1853_v4  ;;  %v5241_v31 = vmul.f32 0.001953125, %v1851_v39 }
 0x2d4   : > { %v2071_v22 = vmul.f32 %v5239_v12, %v5239_v12  ;;  %v5273_v18 = vmul.f32 %v5241_v31, %v5241_v31 }
 0x2d5   : > { %v1857_v62 = vpop.xlane.xlu1 %1856  ;;  %v1855_v26 = vpop.xlane.xlu0 %1854 }
 0x2d6   : > { %v5247_v44 = vmul.f32 0.001953125, %v1857_v62  ;;  %v5249_v27 = vmul.f32 0.001953125, %v1855_v26 }
 0x2d8   : > { %v5279_v59 = vmul.f32 %v5247_v44, %v5247_v44  ;;  %v5283_v52 = vmul.f32 %v5249_v27, %v5249_v27 }
 0x2d9   : > { %v1861_v51 = vpop.xlane.xlu1 %1860  ;;  %v1859_v63 = vpop.xlane.xlu0 %1858 }
 0x2da   : > { %v5253_v0 = vmul.f32 0.001953125, %v1861_v51  ;;  %v5255_v28 = vmul.f32 0.001953125, %v1859_v63 }
 0x2dc   : > { %v5287_v30 = vmul.f32 %v5253_v0, %v5253_v0  ;;  %v5291_v35 = vmul.f32 %v5255_v28, %v5255_v28 }
 0x2dd   : > { %v1865_v1 = vpop.xlane.xlu1 %1864  ;;  %v1863_v37 = vpop.xlane.xlu0 %1862 }
 0x2de   : > { %v5257_v42 = vmul.f32 0.001953125, %v1865_v1  ;;  %v5263_v40 = vmul.f32 0.001953125, %v1863_v37 }
 0x2e0   : > { %v5295_v17 = vmul.f32 %v5257_v42, %v5257_v42  ;;  %v5301_v58 = vmul.f32 %v5263_v40, %v5263_v40 }
 0x2e1   : > { %v1869_v25 = vpop.xlane.xlu1 %1868  ;;  %v1867_v24 = vpop.xlane.xlu0 %1866 }
 0x2e2   : > { %v5265_v53 = vmul.f32 0.001953125, %v1869_v25  ;;  %v5275_v8 = vmul.f32 0.001953125, %v1867_v24 }
 0x2e4   : > { %v5305_v16 = vmul.f32 %v5265_v53, %v5265_v53  ;;  %v5309_v32 = vmul.f32 %v5275_v8, %v5275_v8 }
 0x2e5   : > { %v1873_v14 = vpop.xlane.xlu1 %1872  ;;  %v1871_v23 = vpop.xlane.xlu0 %1870 }
 0x2e6   : > { %v5297_v7 = vmul.f32 0.001953125, %v1873_v14  ;;  %v5311_v45 = vmul.f32 0.001953125, %v1871_v23 }
 0x2e8   : > { %v5319_v25 = vmul.f32 %v5297_v7, %v5297_v7 }
 0x2e9   : > { %v1877_v33 = vpop.xlane.xlu1 %1876  ;;  %v1875_v3 = vpop.xlane.xlu0 %1874 }
 0x2ea   : > { %v5313_v4 = vmul.f32 0.001953125, %v1877_v33  ;;  %v5315_v39 = vmul.f32 0.001953125, %v1875_v3 }
 0x2ed   : > { %v1881_v2 = vpop.xlane.xlu1 %1880  ;;  %v1879_v21 = vpop.xlane.xlu0 %1878 }
 0x2ee   : > { %v5321_v24 = vmul.f32 0.001953125, %v1881_v2  ;;  %v5323_v14 = vmul.f32 0.001953125, %v1879_v21  ;;  %v5337_v2 = vmul.f32 %v5315_v39, %v5315_v39 }
 0x2f0   : > { %7291 = vst [vmem:[#allocation178_spill] sm:$0xff] %v5323_v14 }
 0x2f1   : > { %v1885_v5 = vpop.xlane.xlu1 %1884  ;;  %v5213_v36 = vpop.xlane.xlu0 %1882 }
 0x2f2   : > { %v5325_v23 = vmul.f32 0.001953125, %v1885_v5  ;;  %v5340_v21 = vmul.f32 0.001953125, %v5213_v36 }
 0x2f4   : > { %7292 = vst [vmem:[#allocation179_spill] sm:$0xff] %v5325_v23  ;;  %7293 = vst [vmem:[#allocation180_spill] sm:$0xff] %v5340_v21  ;;  %v5352_v36 = vmul.f32 %v5325_v23, %v5325_v23 }
 0x2f5   : > { %v5215_v55 = vpop.xlane.xlu1 %1888  ;;  %v5217_v60 = vpop.xlane.xlu0 %1886 }
 0x2f9   : > { %v5219_v61 = vpop.xlane.xlu1 %1892  ;;  %v5221_v48 = vpop.xlane.xlu0 %1890 }
 0x2fd   : > { %v5223_v38 = vpop.xlane.xlu1 %1896  ;;  %v5225_v11 = vpop.xlane.xlu0 %1894 }
 0x301   : > { %v5227_v6 = vpop.xlane.xlu1 %1900  ;;  %v5229_v29 = vpop.xlane.xlu0 %1898 }
 0x305   : > { %v5243_v15 = vpop.xlane.xlu1 %1904  ;;  %v5245_v50 = vpop.xlane.xlu0 %1902 }
 0x309   : > { %v1973_v54 = vpop.xlane.xlu1 %1972  ;;  %v1971_v41 = vpop.xlane.xlu0 %1970 }
 0x30a   : > { %v2035_v20 = vmul.f32 0.001953125, %v1973_v54  ;;  %v2034_v49 = vmul.f32 0.001953125, %v1971_v41  ;;  %v5329_v54 = vmul.f32 %v5311_v45, %v5311_v45  ;;  %v5333_v41 = vmul.f32 %v5313_v4, %v5313_v4 }
 0x30c   : > { %v2099_v19 = vsub.f32 %v2035_v20, %v2067_v56  ;;  %v2098_v34 = vsub.f32 %v2034_v49, %v2066_v46 }
 0x30d   : > { %v1977_v62 = vpop.xlane.xlu1 %1976  ;;  %v1975_v26 = vpop.xlane.xlu0 %1974 }
 0x30e   : > { %v2131_v51 = vmax.f32 %v2099_v19, 0.0  ;;  %v2130_v63 = vmax.f32 %v2098_v34, 0.0  ;;  %v2037_v1 = vmul.f32 0.001953125, %v1977_v62  ;;  %v2036_v37 = vmul.f32 0.001953125, %v1975_v26 }
 0x30f   : > { %v5344_v19 = vmul.f32 %v5321_v24, %v5321_v24  ;;  %v5348_v34 = vmul.f32 %v5323_v14, %v5323_v14 }
 0x310   : > { %v2163_v33 = vadd.f32 1e-05, %v2131_v51  ;;  %v2162_v46 = vadd.f32 1e-05, %v2130_v63  ;;  %v2101_v3 = vsub.f32 %v2037_v1, %v2069_v57  ;;  %v2100_v56 = vsub.f32 %v2036_v37, %v2068_v47 }
 0x311   : > { %v1981_v5 = vpop.xlane.xlu1 %1980  ;;  %v1979_v20 = vpop.xlane.xlu0 %1978  ;;  %v5356_v1 = vmul.f32 %v5340_v21, %v5340_v21  ;;  %v5359_v37 = vmul.f32 0.001953125, %v5215_v55 }
 0x312   : > { %3623 = vrsqrt.f32 %v2163_v33  ;;  %v2133_v57 = vmax.f32 %v2101_v3, 0.0  ;;  %v2132_v47 = vmax.f32 %v2100_v56, 0.0  ;;  %v2039_v49 = vmul.f32 0.001953125, %v1981_v5 }
 0x313   : > { %3625 = vrsqrt.f32 %v2162_v46  ;;  %v2038_v62 = vmul.f32 0.001953125, %v1979_v20  ;;  %7294 = vst [vmem:[#allocation181_spill] sm:$0xff] %v5359_v37  ;;  %v5362_v33 = vmul.f32 0.001953125, %v5217_v60 }
 0x314   : > { %v2165_v26 = vadd.f32 1e-05, %v2133_v57  ;;  %v2164_v51 = vadd.f32 1e-05, %v2132_v47  ;;  %v2103_v63 = vsub.f32 %v2039_v49, %v2071_v22  ;;  %v5366_v22 = vmul.f32 0.001953125, %v5219_v61 }
 0x315   : > { %7295 = vst [vmem:[#allocation182_spill] sm:$0xff] %v5362_v33  ;;  %v2102_v46 = vsub.f32 %v2038_v62, %v5273_v18  ;;  %v1985_v3 = vpop.xlane.xlu1 %1984  ;;  %v1983_v56 = vpop.xlane.xlu0 %1982  ;;  %v5369_v47 = vmul.f32 0.001953125, %v5221_v48  ;;  %v5372_v49 = vmul.f32 0.001953125, %v5223_v38  ;;  %v5382_v61 = vmul.f32 %v5362_v33, %v5362_v33 }
 0x316   : > { %3627 = vrsqrt.f32 %v2165_v26  ;;  %v2135_v5 = vmax.f32 %v2103_v63, 0.0  ;;  %v2041_v20 = vmul.f32 0.001953125, %v1985_v3  ;;  %v2040_v57 = vmul.f32 0.001953125, %v1983_v56  ;;  %7296 = vst [vmem:[#allocation183_spill] sm:$0xff] %v5366_v22 }
 0x317   : > { %7297 = vst [vmem:[#allocation184_spill] sm:$0xff] %v5369_v47  ;;  %3629 = vrsqrt.f32 %v2164_v51  ;;  %v2134_v55 = vmax.f32 %v2102_v46, 0.0  ;;  %7298 = vst [vmem:[#allocation185_spill] sm:$0xff] %v5372_v49  ;;  %v5378_v26 = vmul.f32 %v5359_v37, %v5359_v37  ;;  %v5385_v48 = vmul.f32 0.001953125, %v5225_v11  ;;  %v2226_v11 = vld [vmem:[%s6699_s2] sm:$0xff] }
 0x318   : > { %v2167_v60 = vadd.f32 1e-05, %v2135_v5  ;;  %v2105_v18 = vsub.f32 %v2041_v20, %v5279_v59  ;;  %v2104_v62 = vsub.f32 %v2040_v57, %v5283_v52  ;;  %v2227_v59 = vld [vmem:[%s6699_s2 + $0x8] sm:$0xff]  ;;  %v5392_v56 = vmul.f32 %v5366_v22, %v5366_v22 }
 0x319   : > { %7299 = vst [vmem:[#allocation186_spill] sm:$0xff] %v5385_v48  ;;  %v2166_v51 = vadd.f32 1e-05, %v2134_v55  ;;  %v1989_v63 = vpop.xlane.xlu1 %1988  ;;  %v1987_v38 = vpop.xlane.xlu0 %1986  ;;  %v5396_v5 = vmul.f32 %v5369_v47, %v5369_v47  ;;  %v5403_v55 = vmul.f32 %v5372_v49, %v5372_v49  ;;  %v5408_v47 = vmul.f32 %v5385_v48, %v5385_v48 }
 0x31a   : > { %3631 = vrsqrt.f32 %v2167_v60  ;;  %v2137_v52 = vmax.f32 %v2105_v18, 0.0  ;;  %v2136_v46 = vmax.f32 %v2104_v62, 0.0  ;;  %v2043_v3 = vmul.f32 0.001953125, %v1989_v63 }
 0x31b   : > { %3633 = vrsqrt.f32 %v2166_v51  ;;  %v2042_v20 = vmul.f32 0.001953125, %v1987_v38  ;;  %v5411_v22 = vmul.f32 0.001953125, %v5227_v6 }
 0x31c   : > { %v3624_v57 = vpop.eup %3623  ;;  %v2169_v60 = vadd.f32 1e-05, %v2137_v52  ;;  %v2168_v18 = vadd.f32 1e-05, %v2136_v46  ;;  %v2107_v62 = vsub.f32 %v2043_v3, %v5287_v30  ;;  %v2324_v52 = vld [vmem:[%s6700_s3 + $0x8] sm:$0xff]  ;;  %v2229_v30 = vld [vmem:[%s6699_s2 + $0x18] sm:$0xff] }
 0x31d   : > { %v3626_v63 = vpop.eup %3625  ;;  %v2259_v33 = vmul.f32 %v3624_v57, %v2227_v59  ;;  %v2106_v51 = vsub.f32 %v2042_v20, %v5291_v35  ;;  %v1993_v38 = vpop.xlane.xlu1 %1992  ;;  %v2323_v35 = vld [vmem:[%s6700_s3] sm:$0xff]  ;;  %v2228_v59 = vld [vmem:[%s6699_s2 + $0x10] sm:$0xff] }
 0x31e   : > { %v1991_v37 = vpop.xlane.xlu0 %1990  ;;  %v2258_v46 = vmul.f32 %v3626_v63, %v2226_v11  ;;  %3635 = vrsqrt.f32 %v2169_v60  ;;  %v2139_v3 = vmax.f32 %v2107_v62, 0.0  ;;  %v2045_v48 = vmul.f32 0.001953125, %v1993_v38 }
 0x31f   : > { %2292 = vst.msk [vmem:[#allocation4 + $0x8] sm:$0xff] %vm2290_vm2, %v2259_v33  ;;  %v2356_v6 = vmul.f32 %v2259_v33, %v5237_v10  ;;  %3637 = vrsqrt.f32 %v2168_v18  ;;  %v2138_v11 = vmax.f32 %v2106_v51, 0.0  ;;  %v2044_v20 = vmul.f32 0.001953125, %v1991_v37 }
 0x320   : > { %v3628_v57 = vpop.eup %3627  ;;  %v5429_v60 = vmul.f32 0.001953125, %v5229_v29  ;;  %2291 = vst.msk [vmem:[#allocation4] sm:$0xff] %vm2290_vm2, %v2258_v46  ;;  %v2355_v62 = vmul.f32 %v2258_v46, %v5233_v43  ;;  %v2171_v10 = vadd.f32 1e-05, %v2139_v3  ;;  %v2109_v33 = vsub.f32 %v2045_v48, %v5295_v17  ;;  %v2326_v29 = vld [vmem:[%s6700_s3 + $0x18] sm:$0xff]  ;;  %v2231_v43 = vld [vmem:[%s6699_s2 + $0x28] sm:$0xff] }
 0x321   : > { %v3630_v63 = vpop.eup %3629  ;;  %v2388_v38 = vsub.f32 %v2324_v52, %v2356_v6  ;;  %v2261_v49 = vmul.f32 %v3628_v57, %v2229_v30  ;;  %v2170_v21 = vadd.f32 1e-05, %v2138_v11  ;;  %v2108_v23 = vsub.f32 %v2044_v20, %v5301_v58  ;;  %v1997_v18 = vpop.xlane.xlu1 %1996  ;;  %v2325_v48 = vld [vmem:[%s6700_s3 + $0x10] sm:$0xff]  ;;  %v2230_v52 = vld [vmem:[%s6699_s2 + $0x20] sm:$0xff] }
 0x322   : > { %v1995_v51 = vpop.xlane.xlu0 %1994  ;;  %v2387_v37 = vsub.f32 %v2323_v35, %v2355_v62  ;;  %v2260_v14 = vmul.f32 %v3630_v63, %v2228_v59  ;;  %3639 = vrsqrt.f32 %v2171_v10  ;;  %v2141_v17 = vmax.f32 %v2109_v33, 0.0  ;;  %v2328_v33 = vld [vmem:[%s6700_s3 + $0x28] sm:$0xff] }
 0x323   : > { %2420 = vst.msk [vmem:[#allocation5 + $0x8] sm:$0xff] %vm2290_vm2, %v2388_v38  ;;  %2294 = vst.msk [vmem:[#allocation4 + $0x18] sm:$0xff] %vm2290_vm2, %v2261_v49  ;;  %v2358_v58 = vmul.f32 %v2261_v49, %v5235_v9  ;;  %3641 = vrsqrt.f32 %v2170_v21  ;;  %v2140_v46 = vmax.f32 %v2108_v23, 0.0  ;;  %v2047_v30 = vmul.f32 0.001953125, %v1997_v18  ;;  %v2327_v38 = vld [vmem:[%s6700_s3 + $0x20] sm:$0xff]  ;;  %v2232_v18 = vld [vmem:[%s6699_s2 + $0x30] sm:$0xff] }
 0x324   : > { %v3632_v3 = vpop.eup %3631  ;;  %v5452_v6 = vmul.f32 %v5411_v22, %v5411_v22  ;;  %2419 = vst.msk [vmem:[#allocation5] sm:$0xff] %vm2290_vm2, %v2387_v37  ;;  %2293 = vst.msk [vmem:[#allocation4 + $0x10] sm:$0xff] %vm2290_vm2, %v2260_v14  ;;  %v2357_v9 = vmul.f32 %v2260_v14, %v5231_v13  ;;  %v2173_v49 = vadd.f32 1e-05, %v2141_v17  ;;  %v2046_v35 = vmul.f32 0.001953125, %v1995_v51  ;;  %v2233_v13 = vld [vmem:[%s6699_s2 + $0x38] sm:$0xff] }
 0x325   : > { %v3634_v59 = vpop.eup %3633  ;;  %v2390_v11 = vsub.f32 %v2326_v29, %v2358_v58  ;;  %v2263_v20 = vmul.f32 %v3632_v3, %v2231_v43  ;;  %v2172_v57 = vadd.f32 1e-05, %v2140_v46  ;;  %v2111_v23 = vsub.f32 %v2047_v30, %v5305_v16  ;;  %v2001_v21 = vpop.xlane.xlu1 %2000 }
 0x326   : > { %v1999_v62 = vpop.xlane.xlu0 %1998  ;;  %v2389_v10 = vsub.f32 %v2325_v48, %v2357_v9  ;;  %v2262_v63 = vmul.f32 %v3634_v59, %v2230_v52  ;;  %3643 = vrsqrt.f32 %v2173_v49  ;;  %v2110_v14 = vsub.f32 %v2046_v35, %v5309_v32  ;;  %v2330_v35 = vld [vmem:[%s6700_s3 + $0x38] sm:$0xff] }
 0x327   : > { %2422 = vst.msk [vmem:[#allocation5 + $0x18] sm:$0xff] %vm2290_vm2, %v2390_v11  ;;  %2296 = vst.msk [vmem:[#allocation4 + $0x28] sm:$0xff] %vm2290_vm2, %v2263_v20  ;;  %v2360_v16 = vmul.f32 %v2263_v20, %v5239_v12  ;;  %3645 = vrsqrt.f32 %v2172_v57  ;;  %v2143_v51 = vmax.f32 %v2111_v23, 0.0  ;;  %v2049_v37 = vmul.f32 0.001953125, %v2001_v21  ;;  %v2329_v57 = vld [vmem:[%s6700_s3 + $0x30] sm:$0xff]  ;;  %v2234_v23 = vld [vmem:[%s6699_s2 + $0x40] sm:$0xff] }
 0x328   : > { %v3636_v29 = vpop.eup %3635  ;;  %v5476_v32 = vmul.f32 %v5429_v60, %v5429_v60  ;;  %2421 = vst.msk [vmem:[#allocation5 + $0x10] sm:$0xff] %vm2290_vm2, %v2389_v10  ;;  %2295 = vst.msk [vmem:[#allocation4 + $0x20] sm:$0xff] %vm2290_vm2, %v2262_v63  ;;  %v2359_v12 = vmul.f32 %v2262_v63, %v5241_v31  ;;  %v2142_v43 = vmax.f32 %v2110_v14, 0.0  ;;  %v2048_v17 = vmul.f32 0.001953125, %v1999_v62  ;;  %v2235_v31 = vld [vmem:[%s6699_s2 + $0x48] sm:$0xff] }
 0x329   : > { %v3638_v58 = vpop.eup %3637  ;;  %v2392_v48 = vsub.f32 %v2328_v33, %v2360_v16  ;;  %v2265_v52 = vmul.f32 %v3636_v29, %v2233_v13  ;;  %v2175_v46 = vadd.f32 1e-05, %v2143_v51  ;;  %v2113_v30 = vsub.f32 %v2049_v37, %v5319_v25  ;;  %v2005_v3 = vpop.xlane.xlu1 %2004  ;;  %v2332_v29 = vld [vmem:[%s6700_s3 + $0x48] sm:$0xff] }
 0x32a   : > { %v2003_v9 = vpop.xlane.xlu0 %2002  ;;  %v2391_v49 = vsub.f32 %v2327_v38, %v2359_v12  ;;  %v2264_v59 = vmul.f32 %v3638_v58, %v2232_v18  ;;  %v2174_v11 = vadd.f32 1e-05, %v2142_v43  ;;  %v2112_v20 = vsub.f32 %v2048_v17, %v5329_v54  ;;  %v2331_v58 = vld [vmem:[%s6700_s3 + $0x40] sm:$0xff] }
 0x32b   : > { %2424 = vst.msk [vmem:[#allocation5 + $0x28] sm:$0xff] %vm2290_vm2, %v2392_v48  ;;  %2298 = vst.msk [vmem:[#allocation4 + $0x38] sm:$0xff] %vm2290_vm2, %v2265_v52  ;;  %v2362_v25 = vmul.f32 %v2265_v52, %v5247_v44  ;;  %3647 = vrsqrt.f32 %v2175_v46  ;;  %v2145_v21 = vmax.f32 %v2113_v30, 0.0  ;;  %v2051_v62 = vmul.f32 0.001953125, %v2005_v3  ;;  %v2236_v48 = vld [vmem:[%s6699_s2 + $0x50] sm:$0xff] }
 0x32c   : > { %v3640_v10 = vpop.eup %3639  ;;  %2423 = vst.msk [vmem:[#allocation5 + $0x20] sm:$0xff] %vm2290_vm2, %v2391_v49  ;;  %2297 = vst.msk [vmem:[#allocation4 + $0x30] sm:$0xff] %vm2290_vm2, %v2264_v59  ;;  %v2361_v54 = vmul.f32 %v2264_v59, %v5249_v27  ;;  %3649 = vrsqrt.f32 %v2174_v11  ;;  %v2144_v44 = vmax.f32 %v2112_v20, 0.0  ;;  %v2050_v33 = vmul.f32 0.001953125, %v2003_v9  ;;  %v2237_v27 = vld [vmem:[%s6699_s2 + $0x58] sm:$0xff] }
 0x32d   : > { %v3642_v63 = vpop.eup %3641  ;;  %v2394_v13 = vsub.f32 %v2330_v35, %v2362_v25  ;;  %v2267_v14 = vmul.f32 %v3640_v10, %v2235_v31  ;;  %v2177_v16 = vadd.f32 1e-05, %v2145_v21  ;;  %v2115_v38 = vsub.f32 %v2051_v62, %v5333_v41  ;;  %v2009_v18 = vpop.xlane.xlu1 %2008  ;;  %v2239_v10 = vld [vmem:[%s6699_s2 + $0x68] sm:$0xff] }
 0x32e   : > { %v2007_v51 = vpop.xlane.xlu0 %2006  ;;  %v2393_v37 = vsub.f32 %v2329_v57, %v2361_v54  ;;  %v2266_v12 = vmul.f32 %v3642_v63, %v2234_v23  ;;  %v2176_v43 = vadd.f32 1e-05, %v2144_v44  ;;  %v2114_v17 = vsub.f32 %v2050_v33, %v5337_v2  ;;  %v2334_v57 = vld [vmem:[%s6700_s3 + $0x58] sm:$0xff] }
 0x32f   : > { %2426 = vst.msk [vmem:[#allocation5 + $0x38] sm:$0xff] %vm2290_vm2, %v2394_v13  ;;  %2300 = vst.msk [vmem:[#allocation4 + $0x48] sm:$0xff] %vm2290_vm2, %v2267_v14  ;;  %v2364_v41 = vmul.f32 %v2267_v14, %v5253_v0  ;;  %3651 = vrsqrt.f32 %v2177_v16  ;;  %v2147_v52 = vmax.f32 %v2115_v38, 0.0  ;;  %v2053_v46 = vmul.f32 0.001953125, %v2009_v18 }
 0x330   : > { %v3644_v30 = vpop.eup %3643  ;;  %2425 = vst.msk [vmem:[#allocation5 + $0x30] sm:$0xff] %vm2290_vm2, %v2393_v37  ;;  %2299 = vst.msk [vmem:[#allocation4 + $0x40] sm:$0xff] %vm2290_vm2, %v2266_v12  ;;  %v2363_v2 = vmul.f32 %v2266_v12, %v5255_v28  ;;  %3653 = vrsqrt.f32 %v2176_v43  ;;  %v2146_v0 = vmax.f32 %v2114_v17, 0.0  ;;  %v2052_v3 = vmul.f32 0.001953125, %v2007_v51  ;;  %v2336_v17 = vld [vmem:[%s6700_s3 + $0x68] sm:$0xff] }
 0x331   : > { %v3646_v9 = vpop.eup %3645  ;;  %v2396_v49 = vsub.f32 %v2332_v29, %v2364_v41  ;;  %v2269_v35 = vmul.f32 %v3644_v30, %v2237_v27  ;;  %v2179_v59 = vadd.f32 1e-05, %v2147_v52  ;;  %v2117_v31 = vsub.f32 %v2053_v46, %v5344_v19  ;;  %v2013_v11 = vpop.xlane.xlu1 %2012  ;;  %v2333_v19 = vld [vmem:[%s6700_s3 + $0x50] sm:$0xff]  ;;  %v2241_v41 = vld [vmem:[%s6699_s2 + $0x78] sm:$0xff] }
 0x332   : > { %v2011_v20 = vpop.xlane.xlu0 %2010  ;;  %v2395_v25 = vsub.f32 %v2331_v58, %v2363_v2  ;;  %v2268_v23 = vmul.f32 %v3646_v9, %v2236_v48  ;;  %v2178_v21 = vadd.f32 1e-05, %v2146_v0  ;;  %v2116_v28 = vsub.f32 %v2052_v3, %v5348_v34  ;;  %v2335_v48 = vld [vmem:[%s6700_s3 + $0x60] sm:$0xff]  ;;  %v2240_v52 = vld [vmem:[%s6699_s2 + $0x70] sm:$0xff] }
 0x333   : > { %2428 = vst.msk [vmem:[#allocation5 + $0x48] sm:$0xff] %vm2290_vm2, %v2396_v49  ;;  %2302 = vst.msk [vmem:[#allocation4 + $0x58] sm:$0xff] %vm2290_vm2, %v2269_v35  ;;  %v2366_v62 = vmul.f32 %v2269_v35, %v5257_v42  ;;  %3655 = vrsqrt.f32 %v2179_v59  ;;  %v2149_v54 = vmax.f32 %v2117_v31, 0.0  ;;  %v2055_v44 = vmul.f32 0.001953125, %v2013_v11  ;;  %v2238_v42 = vld [vmem:[%s6699_s2 + $0x60] sm:$0xff] }
 0x334   : > { %2427 = vst.msk [vmem:[#allocation5 + $0x40] sm:$0xff] %vm2290_vm2, %v2395_v25  ;;  %2301 = vst.msk [vmem:[#allocation4 + $0x50] sm:$0xff] %vm2290_vm2, %v2268_v23  ;;  %v2365_v34 = vmul.f32 %v2268_v23, %v5263_v40  ;;  %3657 = vrsqrt.f32 %v2178_v21  ;;  %v2148_v33 = vmax.f32 %v2116_v28, 0.0  ;;  %v2054_v63 = vmul.f32 0.001953125, %v2011_v20  ;;  %v2242_v28 = vld [vmem:[%s6699_s2 + $0x80] sm:$0xff] }
 0x335   : > { %v3648_v13 = vpop.eup %3647  ;;  %v5542_v14 = vmul.f32 0.001953125, %v5243_v15  ;;  %v2398_v16 = vsub.f32 %v2334_v57, %v2366_v62  ;;  %v2181_v38 = vadd.f32 1e-05, %v2149_v54  ;;  %v2119_v18 = vsub.f32 %v2055_v44, %v5352_v36  ;;  %v2017_v51 = vpop.xlane.xlu1 %2016 }
 0x336   : > { %v2015_v37 = vpop.xlane.xlu0 %2014  ;;  %v3650_v29 = vpop.eup %3649  ;;  %v2397_v12 = vsub.f32 %v2333_v19, %v2365_v34  ;;  %v2271_v40 = vmul.f32 %v3648_v13, %v2239_v10  ;;  %v2180_v27 = vadd.f32 1e-05, %v2148_v33  ;;  %v2118_v43 = vsub.f32 %v2054_v63, %v5356_v1 }
 0x337   : > { %2430 = vst.msk [vmem:[#allocation5 + $0x58] sm:$0xff] %vm2290_vm2, %v2398_v16  ;;  %v2270_v15 = vmul.f32 %v3650_v29, %v2238_v42  ;;  %3659 = vrsqrt.f32 %v2181_v38  ;;  %v2151_v36 = vmax.f32 %v2119_v18, 0.0  ;;  %v2057_v58 = vmul.f32 0.001953125, %v2017_v51 }
 0x338   : > { %2429 = vst.msk [vmem:[#allocation5 + $0x50] sm:$0xff] %vm2290_vm2, %v2397_v12  ;;  %2304 = vst.msk [vmem:[#allocation4 + $0x68] sm:$0xff] %vm2290_vm2, %v2271_v40  ;;  %v2368_v1 = vmul.f32 %v2271_v40, %v5265_v53  ;;  %3661 = vrsqrt.f32 %v2180_v27  ;;  %v2150_v46 = vmax.f32 %v2118_v43, 0.0  ;;  %v2056_v30 = vmul.f32 0.001953125, %v2015_v37  ;;  %v2340_v37 = vld [vmem:[%s6700_s3 + $0x88] sm:$0xff]  ;;  %v2244_v27 = vld [vmem:[%s6699_s2 + $0x90] sm:$0xff] }
 0x339   : > { %v3652_v2 = vpop.eup %3651  ;;  %v5563_v0 = vmul.f32 0.001953125, %v5245_v50  ;;  %2303 = vst.msk [vmem:[#allocation4 + $0x60] sm:$0xff] %vm2290_vm2, %v2270_v15  ;;  %v2367_v3 = vmul.f32 %v2270_v15, %v5275_v8  ;;  %v2183_v53 = vadd.f32 1e-05, %v2151_v36  ;;  %v2121_v9 = vsub.f32 %v2057_v58, %v5378_v26  ;;  %v2021_v49 = vpop.xlane.xlu1 %2020  ;;  %v2338_v50 = vld [vmem:[%s6700_s3 + $0x78] sm:$0xff]  ;;  %v2243_v8 = vld [vmem:[%s6699_s2 + $0x88] sm:$0xff] }
 0x33a   : > { %v2019_v35 = vpop.xlane.xlu0 %2018  ;;  %v3654_v59 = vpop.eup %3653  ;;  %v2400_v31 = vsub.f32 %v2336_v17, %v2368_v1  ;;  %v2273_v11 = vmul.f32 %v3652_v2, %v2241_v41  ;;  %v2182_v20 = vadd.f32 1e-05, %v2150_v46  ;;  %v2120_v25 = vsub.f32 %v2056_v30, %v5382_v61  ;;  %v2337_v61 = vld [vmem:[%s6700_s3 + $0x70] sm:$0xff] }
 0x33b   : > { %v2399_v57 = vsub.f32 %v2335_v48, %v2367_v3  ;;  %v2272_v23 = vmul.f32 %v3654_v59, %v2240_v52  ;;  %3663 = vrsqrt.f32 %v2183_v53  ;;  %v2153_v26 = vmax.f32 %v2121_v9, 0.0  ;;  %v2342_v53 = vld [vmem:[%s6700_s3 + $0x98] sm:$0xff] }
 0x33c   : > { %2432 = vst.msk [vmem:[#allocation5 + $0x68] sm:$0xff] %vm2290_vm2, %v2400_v31  ;;  %2306 = vst.msk [vmem:[#allocation4 + $0x78] sm:$0xff] %vm2290_vm2, %v2273_v11  ;;  %v2370_v21 = vmul.f32 %v2273_v11, %v5297_v7  ;;  %3665 = vrsqrt.f32 %v2182_v20  ;;  %v2152_v62 = vmax.f32 %v2120_v25, 0.0  ;;  %v2059_v19 = vmul.f32 0.001953125, %v2021_v49  ;;  %v2246_v31 = vld [vmem:[%s6699_s2 + $0xa0] sm:$0xff] }
 0x33d   : > { %v3656_v10 = vpop.eup %3655  ;;  %v5586_v54 = vmul.f32 %v5542_v14, %v5542_v14  ;;  %2431 = vst.msk [vmem:[#allocation5 + $0x60] sm:$0xff] %vm2290_vm2, %v2399_v57  ;;  %2305 = vst.msk [vmem:[#allocation4 + $0x70] sm:$0xff] %vm2290_vm2, %v2272_v23  ;;  %v2369_v7 = vmul.f32 %v2272_v23, %v5311_v45  ;;  %v2185_v44 = vadd.f32 1e-05, %v2153_v26  ;;  %v2058_v34 = vmul.f32 0.001953125, %v2019_v35  ;;  %v2025_v42 = vpop.xlane.xlu1 %2024  ;;  %v2245_v45 = vld [vmem:[%s6699_s2 + $0x98] sm:$0xff] }
 0x33e   : > { %v2023_v33 = vpop.xlane.xlu0 %2022  ;;  %v3658_v63 = vpop.eup %3657  ;;  %v2402_v13 = vsub.f32 %v2338_v50, %v2370_v21  ;;  %v2275_v16 = vmul.f32 %v3656_v10, %v2243_v8  ;;  %v2184_v38 = vadd.f32 1e-05, %v2152_v62  ;;  %v2123_v18 = vsub.f32 %v2059_v19, %v5392_v56  ;;  %v2339_v56 = vld [vmem:[%s6700_s3 + $0x80] sm:$0xff]  ;;  %v2344_v10 = vld [vmem:[%s6700_s3 + $0xa8] sm:$0xff] }
 0x33f   : > { %v2401_v51 = vsub.f32 %v2337_v61, %v2369_v7  ;;  %v2274_v29 = vmul.f32 %v3658_v63, %v2242_v28  ;;  %3667 = vrsqrt.f32 %v2185_v44  ;;  %v2122_v12 = vsub.f32 %v2058_v34, %v5396_v5  ;;  %v2249_v44 = vld [vmem:[%s6699_s2 + $0xb8] sm:$0xff]  ;;  %v2343_v63 = vld [vmem:[%s6700_s3 + $0xa0] sm:$0xff] }
 0x340   : > { %2434 = vst.msk [vmem:[#allocation5 + $0x78] sm:$0xff] %vm2290_vm2, %v2402_v13  ;;  %2308 = vst.msk [vmem:[#allocation4 + $0x88] sm:$0xff] %vm2290_vm2, %v2275_v16  ;;  %v2372_v40 = vmul.f32 %v2275_v16, %v5313_v4  ;;  %3669 = vrsqrt.f32 %v2184_v38  ;;  %v2155_v43 = vmax.f32 %v2123_v18, 0.0  ;;  %v2061_v17 = vmul.f32 0.001953125, %v2025_v42  ;;  %v2248_v13 = vld [vmem:[%s6699_s2 + $0xb0] sm:$0xff] }
 0x341   : > { %v3660_v15 = vpop.eup %3659  ;;  %v5610_v5 = vmul.f32 %v5563_v0, %v5563_v0  ;;  %2433 = vst.msk [vmem:[#allocation5 + $0x70] sm:$0xff] %vm2290_vm2, %v2401_v51  ;;  %2307 = vst.msk [vmem:[#allocation4 + $0x80] sm:$0xff] %vm2290_vm2, %v2274_v29  ;;  %v2371_v4 = vmul.f32 %v2274_v29, %v5315_v39  ;;  %v2154_v41 = vmax.f32 %v2122_v12, 0.0  ;;  %v2060_v36 = vmul.f32 0.001953125, %v2023_v33  ;;  %v2029_v58 = vpop.xlane.xlu1 %2028  ;;  %v2247_v39 = vld [vmem:[%s6699_s2 + $0xa8] sm:$0xff] }
 0x342   : > { %v2027_v1 = vpop.xlane.xlu0 %2026  ;;  %v3662_v48 = vpop.eup %3661  ;;  %v2404_v52 = vsub.f32 %v2340_v37, %v2372_v40  ;;  %v2277_v46 = vmul.f32 %v3660_v15, %v2245_v45  ;;  %v2187_v30 = vadd.f32 1e-05, %v2155_v43  ;;  %v2125_v2 = vsub.f32 %v2061_v17, %v5403_v55  ;;  %v2341_v55 = vld [vmem:[%s6700_s3 + $0x90] sm:$0xff]  ;;  %v7301_v33 = vld [vmem:[#allocation179_spill] sm:$0xff]  ;;  %v2346_v17 = vld [vmem:[%s6700_s3 + $0xb8] sm:$0xff] }
 0x343   : > { %v2403_v3 = vsub.f32 %v2339_v56, %v2371_v4  ;;  %v2276_v9 = vmul.f32 %v3662_v48, %v2244_v27  ;;  %v2186_v49 = vadd.f32 1e-05, %v2154_v41  ;;  %v2124_v35 = vsub.f32 %v2060_v36, %v5408_v47  ;;  %v7300_v47 = vld [vmem:[#allocation178_spill] sm:$0xff]  ;;  %v7303_v36 = vld [vmem:[#allocation181_spill] sm:$0xff] }
 0x344   : > { %2436 = vst.msk [vmem:[#allocation5 + $0x88] sm:$0xff] %vm2290_vm2, %v2404_v52  ;;  %2310 = vst.msk [vmem:[#allocation4 + $0x98] sm:$0xff] %vm2290_vm2, %v2277_v46  ;;  %v2374_v59 = vmul.f32 %v2277_v46, %v5321_v24  ;;  %3671 = vrsqrt.f32 %v2187_v30  ;;  %v2157_v11 = vmax.f32 %v2125_v2, 0.0  ;;  %v2063_v20 = vmul.f32 0.001953125, %v2029_v58  ;;  %v2250_v46 = vld [vmem:[%s6699_s2 + $0xc0] sm:$0xff] }
 0x345   : > { %v3664_v25 = vpop.eup %3663  ;;  %2435 = vst.msk [vmem:[#allocation5 + $0x80] sm:$0xff] %vm2290_vm2, %v2403_v3  ;;  %2309 = vst.msk [vmem:[#allocation4 + $0x90] sm:$0xff] %vm2290_vm2, %v2276_v9  ;;  %v2373_v57 = vmul.f32 %v2276_v9, %v7300_v47  ;;  %3673 = vrsqrt.f32 %v2186_v49  ;;  %v2156_v24 = vmax.f32 %v2124_v35, 0.0  ;;  %v2062_v50 = vmul.f32 0.001953125, %v2027_v1  ;;  %v2033_v23 = vpop.xlane.xlu1 %2032  ;;  %v2345_v1 = vld [vmem:[%s6700_s3 + $0xb0] sm:$0xff] }
 0x346   : > { %v3666_v8 = vpop.eup %3665  ;;  %v2406_v26 = vsub.f32 %v2342_v53, %v2374_v59  ;;  %v2279_v21 = vmul.f32 %v3664_v25, %v2247_v39  ;;  %v2189_v61 = vadd.f32 1e-05, %v2157_v11  ;;  %v2127_v28 = vsub.f32 %v2063_v20, %v5452_v6  ;;  %v2031_v62 = vpop.xlane.xlu0 %2030  ;;  %v2348_v59 = vld [vmem:[%s6700_s3 + $0xc8] sm:$0xff]  ;;  %v2347_v25 = vld [vmem:[%s6700_s3 + $0xc0] sm:$0xff]  ;;  %v2252_v47 = vld [vmem:[%s6699_s2 + $0xd0] sm:$0xff] }
 0x347   : > { %v2405_v19 = vsub.f32 %v2341_v55, %v2373_v57  ;;  %v2278_v7 = vmul.f32 %v3666_v8, %v2246_v31  ;;  %v2188_v34 = vadd.f32 1e-05, %v2156_v24  ;;  %v2126_v42 = vsub.f32 %v2062_v50, %v5476_v32  ;;  %v7302_v32 = vld [vmem:[#allocation180_spill] sm:$0xff]  ;;  %v2253_v31 = vld [vmem:[%s6699_s2 + $0xd8] sm:$0xff]  ;;  %v7305_v11 = vld [vmem:[#allocation183_spill] sm:$0xff] }
 0x348   : > { %2438 = vst.msk [vmem:[#allocation5 + $0x98] sm:$0xff] %vm2290_vm2, %v2406_v26  ;;  %2312 = vst.msk [vmem:[#allocation4 + $0xa8] sm:$0xff] %vm2290_vm2, %v2279_v21  ;;  %v2376_v6 = vmul.f32 %v2279_v21, %v7301_v33  ;;  %3675 = vrsqrt.f32 %v2189_v61  ;;  %v2159_v16 = vmax.f32 %v2127_v28, 0.0  ;;  %v2065_v38 = vmul.f32 0.001953125, %v2033_v23  ;;  %v7306_v24 = vld [vmem:[#allocation184_spill] sm:$0xff]  ;;  %v2350_v61 = vld [vmem:[%s6700_s3 + $0xd8] sm:$0xff] }
 0x349   : > { %v3668_v18 = vpop.eup %3667  ;;  %2437 = vst.msk [vmem:[#allocation5 + $0x90] sm:$0xff] %vm2290_vm2, %v2405_v19  ;;  %2311 = vst.msk [vmem:[#allocation4 + $0xa0] sm:$0xff] %vm2290_vm2, %v2278_v7  ;;  %v2375_v51 = vmul.f32 %v2278_v7, %v7302_v32  ;;  %3677 = vrsqrt.f32 %v2188_v34  ;;  %v2158_v37 = vmax.f32 %v2126_v42, 0.0  ;;  %v2064_v29 = vmul.f32 0.001953125, %v2031_v62  ;;  %v2255_v62 = vld [vmem:[%s6699_s2 + $0xe8] sm:$0xff]  ;;  %v7307_v19 = vld [vmem:[#allocation185_spill] sm:$0xff] }
 0x34a   : > { %v3670_v45 = vpop.eup %3669  ;;  %v2408_v12 = vsub.f32 %v2344_v10, %v2376_v6  ;;  %v2281_v40 = vmul.f32 %v3668_v18, %v2249_v44  ;;  %v2191_v56 = vadd.f32 1e-05, %v2159_v16  ;;  %v2129_v27 = vsub.f32 %v2065_v38, %v5586_v54  ;;  %v2251_v54 = vld [vmem:[%s6699_s2 + $0xc8] sm:$0xff]  ;;  %v2349_v7 = vld [vmem:[%s6700_s3 + $0xd0] sm:$0xff]  ;;  %v2254_v44 = vld [vmem:[%s6699_s2 + $0xe0] sm:$0xff] }
 0x34b   : > { %v2407_v43 = vsub.f32 %v2343_v63, %v2375_v51  ;;  %v2280_v15 = vmul.f32 %v3670_v45, %v2248_v13  ;;  %v2190_v4 = vadd.f32 1e-05, %v2158_v37  ;;  %v2128_v41 = vsub.f32 %v2064_v29, %v5610_v5  ;;  %v7304_v5 = vld [vmem:[#allocation182_spill] sm:$0xff]  ;;  %v2352_v38 = vld [vmem:[%s6700_s3 + $0xe8] sm:$0xff]  ;;  %v2257_v32 = vld [vmem:[%s6699_s2 + $0xf8] sm:$0xff] }
 0x34c   : > { %2440 = vst.msk [vmem:[#allocation5 + $0xa8] sm:$0xff] %vm2290_vm2, %v2408_v12  ;;  %2314 = vst.msk [vmem:[#allocation4 + $0xb8] sm:$0xff] %vm2290_vm2, %v2281_v40  ;;  %v2378_v58 = vmul.f32 %v2281_v40, %v7303_v36  ;;  %3679 = vrsqrt.f32 %v2191_v56  ;;  %v2161_v48 = vmax.f32 %v2129_v27, 0.0  ;;  %v7308_v42 = vld [vmem:[#allocation186_spill] sm:$0xff]  ;;  %v2256_v29 = vld [vmem:[%s6699_s2 + $0xf0] sm:$0xff] }
 0x34d   : > { %2439 = vst.msk [vmem:[#allocation5 + $0xa0] sm:$0xff] %vm2290_vm2, %v2407_v43  ;;  %2313 = vst.msk [vmem:[#allocation4 + $0xb0] sm:$0xff] %vm2290_vm2, %v2280_v15  ;;  %v2377_v52 = vmul.f32 %v2280_v15, %v7304_v5  ;;  %3681 = vrsqrt.f32 %v2190_v4  ;;  %v2160_v30 = vmax.f32 %v2128_v41, 0.0  ;;  %v2351_v37 = vld [vmem:[%s6700_s3 + $0xe0] sm:$0xff]  ;;  %v2353_v4 = vld [vmem:[%s6700_s3 + $0xf0] sm:$0xff] }
 0x34e   : > { %v3672_v2 = vpop.eup %3671  ;;  %v2410_v3 = vsub.f32 %v2346_v17, %v2378_v58  ;;  %v2193_v53 = vadd.f32 1e-05, %v2161_v48 }
 0x34f   : > { %v3674_v9 = vpop.eup %3673  ;;  %v2409_v39 = vsub.f32 %v2345_v1, %v2377_v52  ;;  %v2283_v49 = vmul.f32 %v3672_v2, %v2251_v54  ;;  %v2192_v35 = vadd.f32 1e-05, %v2160_v30 }
 0x350   : > { %2442 = vst.msk [vmem:[#allocation5 + $0xb8] sm:$0xff] %vm2290_vm2, %v2410_v3  ;;  %v2282_v55 = vmul.f32 %v3674_v9, %v2250_v46  ;;  %3683 = vrsqrt.f32 %v2193_v53 }
 0x351   : > { %2441 = vst.msk [vmem:[#allocation5 + $0xb0] sm:$0xff] %vm2290_vm2, %v2409_v39  ;;  %2316 = vst.msk [vmem:[#allocation4 + $0xc8] sm:$0xff] %vm2290_vm2, %v2283_v49  ;;  %v2380_v20 = vmul.f32 %v2283_v49, %v7305_v11  ;;  %3685 = vrsqrt.f32 %v2192_v35 }
 0x352   : > { %v3676_v57 = vpop.eup %3675  ;;  %2315 = vst.msk [vmem:[#allocation4 + $0xc0] sm:$0xff] %vm2290_vm2, %v2282_v55  ;;  %v2379_v50 = vmul.f32 %v2282_v55, %v7306_v24 }
 0x353   : > { %v3678_v23 = vpop.eup %3677  ;;  %v2412_v8 = vsub.f32 %v2348_v59, %v2380_v20  ;;  %v2285_v26 = vmul.f32 %v3676_v57, %v2253_v31 }
 0x354   : > { %v2411_v21 = vsub.f32 %v2347_v25, %v2379_v50  ;;  %v2284_v28 = vmul.f32 %v3678_v23, %v2252_v47 }
 0x355   : > { %2444 = vst.msk [vmem:[#allocation5 + $0xc8] sm:$0xff] %vm2290_vm2, %v2412_v8  ;;  %2318 = vst.msk [vmem:[#allocation4 + $0xd8] sm:$0xff] %vm2290_vm2, %v2285_v26  ;;  %v2382_v10 = vmul.f32 %v2285_v26, %v7307_v19 }
 0x356   : > { %v3680_v34 = vpop.eup %3679  ;;  %2443 = vst.msk [vmem:[#allocation5 + $0xc0] sm:$0xff] %vm2290_vm2, %v2411_v21  ;;  %2317 = vst.msk [vmem:[#allocation4 + $0xd0] sm:$0xff] %vm2290_vm2, %v2284_v28  ;;  %v2381_v33 = vmul.f32 %v2284_v28, %v7308_v42 }
 0x357   : > { %v3682_v6 = vpop.eup %3681  ;;  %v2414_v63 = vsub.f32 %v2350_v61, %v2382_v10  ;;  %v2287_v13 = vmul.f32 %v3680_v34, %v2255_v62 }
 0x358   : > { %v2413_v16 = vsub.f32 %v2349_v7, %v2381_v33  ;;  %v2286_v18 = vmul.f32 %v3682_v6, %v2254_v44 }
 0x359   : > { %2446 = vst.msk [vmem:[#allocation5 + $0xd8] sm:$0xff] %vm2290_vm2, %v2414_v63  ;;  %2320 = vst.msk [vmem:[#allocation4 + $0xe8] sm:$0xff] %vm2290_vm2, %v2287_v13  ;;  %v2384_v51 = vmul.f32 %v2287_v13, %v5411_v22  ;;  %v2354_v22 = vld [vmem:[%s6700_s3 + $0xf8] sm:$0xff] }
 0x35a   : > { %v3684_v45 = vpop.eup %3683  ;;  %2445 = vst.msk [vmem:[#allocation5 + $0xd0] sm:$0xff] %vm2290_vm2, %v2413_v16  ;;  %2319 = vst.msk [vmem:[#allocation4 + $0xe0] sm:$0xff] %vm2290_vm2, %v2286_v18  ;;  %v2383_v12 = vmul.f32 %v2286_v18, %v5429_v60 }
 0x35b   : > { %v3686_v40 = vpop.eup %3685  ;;  %v2416_v56 = vsub.f32 %v2352_v38, %v2384_v51  ;;  %v2289_v27 = vmul.f32 %v3684_v45, %v2257_v32 }
 0x35c   : > { %v2415_v43 = vsub.f32 %v2351_v37, %v2383_v12  ;;  %v2288_v17 = vmul.f32 %v3686_v40, %v2256_v29 }
 0x35d   : > { %2448 = vst.msk [vmem:[#allocation5 + $0xe8] sm:$0xff] %vm2290_vm2, %v2416_v56  ;;  %2322 = vst.msk [vmem:[#allocation4 + $0xf8] sm:$0xff] %vm2290_vm2, %v2289_v27  ;;  %v2386_v15 = vmul.f32 %v2289_v27, %v5542_v14 }
 0x35e   : > { %2447 = vst.msk [vmem:[#allocation5 + $0xe0] sm:$0xff] %vm2290_vm2, %v2415_v43  ;;  %2321 = vst.msk [vmem:[#allocation4 + $0xf0] sm:$0xff] %vm2290_vm2, %v2288_v17  ;;  %v2385_v60 = vmul.f32 %v2288_v17, %v5563_v0 }
 0x35f   : > { %v2418_v41 = vsub.f32 %v2354_v22, %v2386_v15 }
 0x360   : > { %v2417_v36 = vsub.f32 %v2353_v4, %v2385_v60 }
 0x361   : > { %2450 = vst.msk [vmem:[#allocation5 + $0xf8] sm:$0xff] %vm2290_vm2, %v2418_v41 }
 0x362   : > { %2449 = vst.msk [vmem:[#allocation5 + $0xf0] sm:$0xff] %vm2290_vm2, %v2417_v36 }
 0x363 PF: > { %p3494_p6 = scmp.ne.s32.totalorder %s3703_s15, 1 }
 0x365   : > { %2454 = sbr.rel (%p3494_p6) target bundleno = 1139 (0x473), region = 52 }
 0x36c   : > { %v2457_v14 = vld [vmem:[#allocation4 + $0x10] sm:$0xff]  ;;  %v2455_v58 = vld [vmem:[#allocation4] sm:$0xff]  ;;  %v3715_v1 = vmov 0   ;;  %v2458_v54 = vld [vmem:[#allocation4 + $0x18] sm:$0xff] }
 0x36d   : > { %3688 = vset.pattern.permute.xlu1 %v3715_v1  ;;  %3687 = vset.pattern.permute.xlu0 %v3715_v1  ;;  %v2456_v48 = vld [vmem:[#allocation4 + $0x8] sm:$0xff]  ;;  %v2459_v5 = vld [vmem:[#allocation4 + $0x20] sm:$0xff]  ;;  %v2462_v52 = vld [vmem:[#allocation4 + $0x38] sm:$0xff] }
 0x36e   : > { %2499 = vperm.xlu1 %3688, %v2457_v14   ;;  %2489 = vperm.xlu0 %3687, %v2455_v58   ;;  %v2460_v0 = vld [vmem:[#allocation4 + $0x28] sm:$0xff]  ;;  %v2461_v46 = vld [vmem:[#allocation4 + $0x30] sm:$0xff]  ;;  %v2463_v2 = vld [vmem:[#allocation4 + $0x40] sm:$0xff] }
 0x36f   : > { %v2464_v30 = vld [vmem:[#allocation4 + $0x48] sm:$0xff]  ;;  %v2466_v3 = vld [vmem:[#allocation4 + $0x58] sm:$0xff]  ;;  %v2465_v53 = vld [vmem:[#allocation4 + $0x50] sm:$0xff] }
 0x370   : > { %v2468_v9 = vld [vmem:[#allocation4 + $0x68] sm:$0xff]  ;;  %v2467_v39 = vld [vmem:[#allocation4 + $0x60] sm:$0xff]  ;;  %v2470_v49 = vld [vmem:[#allocation4 + $0x78] sm:$0xff] }
 0x371   : > { %v2469_v35 = vld [vmem:[#allocation4 + $0x70] sm:$0xff]  ;;  %v2472_v59 = vld [vmem:[#allocation4 + $0x88] sm:$0xff]  ;;  %v2471_v55 = vld [vmem:[#allocation4 + $0x80] sm:$0xff] }
 0x372   : > { %2504 = vperm.xlu1 %3688, %v2458_v54   ;;  %2494 = vperm.xlu0 %3687, %v2456_v48   ;;  %v2474_v31 = vld [vmem:[#allocation4 + $0x98] sm:$0xff]  ;;  %v2473_v11 = vld [vmem:[#allocation4 + $0x90] sm:$0xff]  ;;  %v2476_v20 = vld [vmem:[#allocation4 + $0xa8] sm:$0xff] }
 0x373   : > { %v2475_v25 = vld [vmem:[#allocation4 + $0xa0] sm:$0xff]  ;;  %v2478_v47 = vld [vmem:[#allocation4 + $0xb8] sm:$0xff]  ;;  %v2477_v57 = vld [vmem:[#allocation4 + $0xb0] sm:$0xff] }
 0x374   : > { %v2480_v24 = vld [vmem:[#allocation4 + $0xc8] sm:$0xff]  ;;  %v2479_v50 = vld [vmem:[#allocation4 + $0xc0] sm:$0xff]  ;;  %v2482_v23 = vld [vmem:[#allocation4 + $0xd8] sm:$0xff] }
 0x375   : > { %v2481_v8 = vld [vmem:[#allocation4 + $0xd0] sm:$0xff]  ;;  %v2484_v26 = vld [vmem:[#allocation4 + $0xe8] sm:$0xff]  ;;  %v2483_v21 = vld [vmem:[#allocation4 + $0xe0] sm:$0xff] }
 0x376   : > { %2514 = vperm.xlu1 %3688, %v2460_v0   ;;  %2509 = vperm.xlu0 %3687, %v2459_v5   ;;  %v2486_v61 = vld [vmem:[#allocation4 + $0xf8] sm:$0xff]  ;;  %v2485_v28 = vld [vmem:[#allocation4 + $0xf0] sm:$0xff]  ;;  %v2776_v62 = vld [vmem:[#allocation5 + $0x8] sm:$0xff] }
 0x377   : > { %v2775_v19 = vld [vmem:[#allocation5] sm:$0xff]  ;;  %v2778_v10 = vld [vmem:[#allocation5 + $0x18] sm:$0xff]  ;;  %v2777_v7 = vld [vmem:[#allocation5 + $0x10] sm:$0xff] }
 0x378   : > { %v2780_v44 = vld [vmem:[#allocation5 + $0x28] sm:$0xff]  ;;  %v2779_v34 = vld [vmem:[#allocation5 + $0x20] sm:$0xff]  ;;  %v2782_v42 = vld [vmem:[#allocation5 + $0x38] sm:$0xff] }
 0x379   : > { %v2781_v33 = vld [vmem:[#allocation5 + $0x30] sm:$0xff]  ;;  %v2784_v6 = vld [vmem:[#allocation5 + $0x48] sm:$0xff]  ;;  %v2783_v63 = vld [vmem:[#allocation5 + $0x40] sm:$0xff] }
 0x37a   : > { %2524 = vperm.xlu1 %3688, %v2462_v52   ;;  %2519 = vperm.xlu0 %3687, %v2461_v46   ;;  %v2786_v13 = vld [vmem:[#allocation5 + $0x58] sm:$0xff]  ;;  %v2785_v16 = vld [vmem:[#allocation5 + $0x50] sm:$0xff]  ;;  %v2788_v38 = vld [vmem:[#allocation5 + $0x68] sm:$0xff] }
 0x37b   : > { %v2787_v18 = vld [vmem:[#allocation5 + $0x60] sm:$0xff]  ;;  %v2790_v32 = vld [vmem:[#allocation5 + $0x78] sm:$0xff]  ;;  %v2789_v51 = vld [vmem:[#allocation5 + $0x70] sm:$0xff] }
 0x37c   : > { %v2792_v37 = vld [vmem:[#allocation5 + $0x88] sm:$0xff]  ;;  %v2791_v29 = vld [vmem:[#allocation5 + $0x80] sm:$0xff]  ;;  %v2794_v45 = vld [vmem:[#allocation5 + $0x98] sm:$0xff] }
 0x37d   : > { %v2793_v12 = vld [vmem:[#allocation5 + $0x90] sm:$0xff]  ;;  %v2796_v40 = vld [vmem:[#allocation5 + $0xa8] sm:$0xff]  ;;  %v2795_v56 = vld [vmem:[#allocation5 + $0xa0] sm:$0xff] }
 0x37e   : > { %2534 = vperm.xlu1 %3688, %v2464_v30   ;;  %2529 = vperm.xlu0 %3687, %v2463_v2   ;;  %v2798_v27 = vld [vmem:[#allocation5 + $0xb8] sm:$0xff]  ;;  %v2797_v43 = vld [vmem:[#allocation5 + $0xb0] sm:$0xff]  ;;  %v2800_v22 = vld [vmem:[#allocation5 + $0xc8] sm:$0xff] }
 0x37f   : > { %v2799_v17 = vld [vmem:[#allocation5 + $0xc0] sm:$0xff]  ;;  %v2802_v15 = vld [vmem:[#allocation5 + $0xd8] sm:$0xff]  ;;  %v2801_v4 = vld [vmem:[#allocation5 + $0xd0] sm:$0xff] }
 0x380   : > { %v2804_v60 = vld [vmem:[#allocation5 + $0xe8] sm:$0xff]  ;;  %v2803_v41 = vld [vmem:[#allocation5 + $0xe0] sm:$0xff]  ;;  %v2806_v36 = vld [vmem:[#allocation5 + $0xf8] sm:$0xff] }
 0x381   : > { %v2805_v14 = vld [vmem:[#allocation5 + $0xf0] sm:$0xff] }
 0x382   : > { %2544 = vperm.xlu1 %3688, %v2466_v3   ;;  %2539 = vperm.xlu0 %3687, %v2465_v53  }
 0x386   : > { %2554 = vperm.xlu1 %3688, %v2468_v9   ;;  %2549 = vperm.xlu0 %3687, %v2467_v39  }
 0x38a   : > { %2564 = vperm.xlu1 %3688, %v2470_v49   ;;  %2559 = vperm.xlu0 %3687, %v2469_v35  }
 0x38e   : > { %2574 = vperm.xlu1 %3688, %v2472_v59   ;;  %2569 = vperm.xlu0 %3687, %v2471_v55  }
 0x392   : > { %2584 = vperm.xlu1 %3688, %v2474_v31   ;;  %2579 = vperm.xlu0 %3687, %v2473_v11   ;;  %v7309_v31 = vld [vmem:[#allocation14_spill] sm:$0xff] }
 0x396   : > { %2594 = vperm.xlu1 %3688, %v2476_v20   ;;  %2589 = vperm.xlu0 %3687, %v2475_v25   ;;  %v7310_v20 = vld [vmem:[#allocation16_spill] sm:$0xff] }
 0x39a   : > { %2604 = vperm.xlu1 %3688, %v2478_v47   ;;  %2599 = vperm.xlu0 %3687, %v2477_v57   ;;  %v7311_v47 = vld [vmem:[#allocation15_spill] sm:$0xff] }
 0x39e   : > { %2614 = vperm.xlu1 %3688, %v2480_v24   ;;  %2609 = vperm.xlu0 %3687, %v2479_v50   ;;  %v7312_v24 = vld [vmem:[#allocation17_spill] sm:$0xff] }
 0x3a2   : > { %2624 = vperm.xlu1 %3688, %v2482_v23   ;;  %2619 = vperm.xlu0 %3687, %v2481_v8   ;;  %v7313_v23 = vld [vmem:[#allocation6_spill] sm:$0xff] }
 0x3a6   : > { %2634 = vperm.xlu1 %3688, %v2484_v26   ;;  %2629 = vperm.xlu0 %3687, %v2483_v21   ;;  %v7314_v26 = vld [vmem:[#allocation8_spill] sm:$0xff] }
 0x3aa   : > { %2644 = vperm.xlu1 %3688, %v2486_v61   ;;  %2639 = vperm.xlu0 %3687, %v2485_v28   ;;  %v7315_v61 = vld [vmem:[#allocation7_spill] sm:$0xff] }
 0x3ae   : > { %2814 = vperm.xlu1 %3688, %v2776_v62   ;;  %2809 = vperm.xlu0 %3687, %v2775_v19   ;;  %v7316_v62 = vld [vmem:[#allocation9_spill] sm:$0xff] }
 0x3b2   : > { %2824 = vperm.xlu1 %3688, %v2778_v10   ;;  %2819 = vperm.xlu0 %3687, %v2777_v7   ;;  %v7317_v10 = vld [vmem:[#allocation18_spill] sm:$0xff] }
 0x3b6   : > { %2834 = vperm.xlu1 %3688, %v2780_v44   ;;  %2829 = vperm.xlu0 %3687, %v2779_v34   ;;  %v7318_v44 = vld [vmem:[#allocation20_spill] sm:$0xff] }
 0x3ba   : > { %2844 = vperm.xlu1 %3688, %v2782_v42   ;;  %2839 = vperm.xlu0 %3687, %v2781_v33   ;;  %v7319_v42 = vld [vmem:[#allocation19_spill] sm:$0xff] }
 0x3be   : > { %2854 = vperm.xlu1 %3688, %v2784_v6   ;;  %2849 = vperm.xlu0 %3687, %v2783_v63   ;;  %v7320_v6 = vld [vmem:[#allocation21_spill] sm:$0xff] }
 0x3c2   : > { %2864 = vperm.xlu1 %3688, %v2786_v13   ;;  %2859 = vperm.xlu0 %3687, %v2785_v16   ;;  %v7321_v13 = vld [vmem:[#allocation10_spill] sm:$0xff] }
 0x3c6   : > { %2874 = vperm.xlu1 %3688, %v2788_v38   ;;  %2869 = vperm.xlu0 %3687, %v2787_v18   ;;  %v7322_v38 = vld [vmem:[#allocation12_spill] sm:$0xff] }
 0x3ca   : > { %2884 = vperm.xlu1 %3688, %v2790_v32   ;;  %2879 = vperm.xlu0 %3687, %v2789_v51   ;;  %v7323_v32 = vld [vmem:[#allocation11_spill] sm:$0xff] }
 0x3ce   : > { %2894 = vperm.xlu1 %3688, %v2792_v37   ;;  %2889 = vperm.xlu0 %3687, %v2791_v29   ;;  %v7324_v37 = vld [vmem:[#allocation13_spill] sm:$0xff] }
 0x3d2   : > { %2904 = vperm.xlu1 %3688, %v2794_v45   ;;  %2899 = vperm.xlu0 %3687, %v2793_v12  }
 0x3d6   : > { %2914 = vperm.xlu1 %3688, %v2796_v40   ;;  %2909 = vperm.xlu0 %3687, %v2795_v56   ;;  %v7325_v40 = vld [vmem:[#allocation26_spill] sm:$0xff] }
 0x3da   : > { %2924 = vperm.xlu1 %3688, %v2798_v27   ;;  %2919 = vperm.xlu0 %3687, %v2797_v43   ;;  %v7326_v27 = vld [vmem:[#allocation28_spill] sm:$0xff] }
 0x3de   : > { %2934 = vperm.xlu1 %3688, %v2800_v22   ;;  %2929 = vperm.xlu0 %3687, %v2799_v17   ;;  %v7327_v22 = vld [vmem:[#allocation27_spill] sm:$0xff] }
 0x3e2   : > { %2944 = vperm.xlu1 %3688, %v2802_v15   ;;  %2939 = vperm.xlu0 %3687, %v2801_v4   ;;  %v7328_v15 = vld [vmem:[#allocation29_spill] sm:$0xff] }
 0x3e6   : > { %2954 = vperm.xlu1 %3688, %v2804_v60   ;;  %2949 = vperm.xlu0 %3687, %v2803_v41   ;;  %v7329_v60 = vld [vmem:[#allocation22_spill] sm:$0xff] }
 0x3ea   : > { %2964 = vperm.xlu1 %3688, %v2806_v36   ;;  %2959 = vperm.xlu0 %3687, %v2805_v14   ;;  %v7330_v36 = vld [vmem:[#allocation24_spill] sm:$0xff] }
 0x3ed   : > { %v2500_v58 = vpop.permute.xlu1 %2499  ;;  %v2490_v1 = vpop.permute.xlu0 %2489 }
 0x3ee   : > { %v5757_v11 = vmul.f32 %v2500_v58, %v7309_v31  ;;  %v5760_v25 = vmul.f32 %v2500_v58, %v7310_v20  ;;  %v5763_v57 = vmul.f32 %v2500_v58, %v7311_v47  ;;  %v5766_v50 = vmul.f32 %v2500_v58, %v7312_v24  ;;  %v7331_v58 = vld [vmem:[#allocation23_spill] sm:$0xff]  ;;  %v7333_v31 = vld [vmem:[#allocation34_spill] sm:$0xff]  ;;  %v7334_v47 = vld [vmem:[#allocation36_spill] sm:$0xff] }
 0x3ef   : > { %v5769_v8 = vmul.f32 %v2490_v1, %v7313_v23  ;;  %v5772_v21 = vmul.f32 %v2490_v1, %v7314_v26  ;;  %v5775_v28 = vmul.f32 %v2490_v1, %v7315_v61  ;;  %v5778_v19 = vmul.f32 %v2490_v1, %v7316_v62  ;;  %v7336_v26 = vld [vmem:[#allocation37_spill] sm:$0xff]  ;;  %v7337_v62 = vld [vmem:[#allocation30_spill] sm:$0xff] }
 0x3f1   : > { %v2505_v54 = vpop.permute.xlu1 %2504  ;;  %v2495_v48 = vpop.permute.xlu0 %2494 }
 0x3f2   : > { %v5781_v7 = vmul.f32 %v2505_v54, %v7317_v10  ;;  %v5784_v34 = vmul.f32 %v2505_v54, %v7318_v44  ;;  %v5787_v33 = vmul.f32 %v2505_v54, %v7319_v42  ;;  %v5790_v63 = vmul.f32 %v2505_v54, %v7320_v6  ;;  %v7332_v54 = vld [vmem:[#allocation25_spill] sm:$0xff]  ;;  %v7338_v44 = vld [vmem:[#allocation32_spill] sm:$0xff] }
 0x3f3   : > { %v5793_v16 = vmul.f32 %v2495_v48, %v7321_v13  ;;  %v5796_v18 = vmul.f32 %v2495_v48, %v7322_v38  ;;  %v5799_v51 = vmul.f32 %v2495_v48, %v7323_v32  ;;  %v5802_v29 = vmul.f32 %v2495_v48, %v7324_v37  ;;  %v7340_v13 = vld [vmem:[#allocation33_spill] sm:$0xff] }
 0x3f5   : > { %v2515_v0 = vpop.permute.xlu1 %2514  ;;  %v2510_v5 = vpop.permute.xlu0 %2509 }
 0x3f6   : > { %v5809_v56 = vmul.f32 %v2515_v0, %v7325_v40  ;;  %v5812_v43 = vmul.f32 %v2515_v0, %v7326_v27  ;;  %v5815_v17 = vmul.f32 %v2515_v0, %v7327_v22  ;;  %v5818_v4 = vmul.f32 %v2515_v0, %v7328_v15  ;;  %v7335_v0 = vld [vmem:[#allocation35_spill] sm:$0xff]  ;;  %v7341_v40 = vld [vmem:[#allocation42_spill] sm:$0xff]  ;;  %v7342_v22 = vld [vmem:[#allocation44_spill] sm:$0xff] }
 0x3f7   : > { %v5821_v41 = vmul.f32 %v2510_v5, %v7329_v60  ;;  %v5824_v14 = vmul.f32 %v2510_v5, %v7330_v36  ;;  %v5827_v1 = vmul.f32 %v2510_v5, %v7331_v58  ;;  %v5830_v48 = vmul.f32 %v2510_v5, %v7332_v54  ;;  %v7339_v5 = vld [vmem:[#allocation31_spill] sm:$0xff]  ;;  %v7344_v36 = vld [vmem:[#allocation45_spill] sm:$0xff]  ;;  %v7345_v54 = vld [vmem:[#allocation38_spill] sm:$0xff] }
 0x3f8   : > { %v7343_v15 = vld [vmem:[#allocation43_spill] sm:$0xff] }
 0x3f9   : > { %v2525_v52 = vpop.permute.xlu1 %2524  ;;  %v2520_v46 = vpop.permute.xlu0 %2519 }
 0x3fa   : > { %v5833_v20 = vmul.f32 %v2525_v52, %v7333_v31  ;;  %v5836_v24 = vmul.f32 %v2525_v52, %v7334_v47  ;;  %v5839_v23 = vmul.f32 %v2525_v52, %v7335_v0  ;;  %v5842_v61 = vmul.f32 %v2525_v52, %v7336_v26  ;;  %v7346_v47 = vld [vmem:[#allocation40_spill] sm:$0xff]  ;;  %v7348_v0 = vld [vmem:[#allocation39_spill] sm:$0xff] }
 0x3fb   : > { %v5845_v10 = vmul.f32 %v2520_v46, %v7337_v62  ;;  %v5848_v42 = vmul.f32 %v2520_v46, %v7338_v44  ;;  %v5851_v6 = vmul.f32 %v2520_v46, %v7339_v5  ;;  %v5854_v38 = vmul.f32 %v2520_v46, %v7340_v13  ;;  %v7350_v62 = vld [vmem:[#allocation41_spill] sm:$0xff]  ;;  %v7352_v5 = vld [vmem:[#allocation50_spill] sm:$0xff] }
 0x3fd   : > { %v2535_v30 = vpop.permute.xlu1 %2534  ;;  %v2530_v2 = vpop.permute.xlu0 %2529 }
 0x3fe   : > { %v5857_v27 = vmul.f32 %v2535_v30, %v7341_v40  ;;  %v5860_v52 = vmul.f32 %v2535_v30, %v7342_v22  ;;  %v5863_v60 = vmul.f32 %v2535_v30, %v7343_v15  ;;  %v5866_v58 = vmul.f32 %v2535_v30, %v7344_v36  ;;  %v7354_v40 = vld [vmem:[#allocation52_spill] sm:$0xff]  ;;  %v7356_v30 = vld [vmem:[#allocation51_spill] sm:$0xff]  ;;  %v7357_v36 = vld [vmem:[#allocation53_spill] sm:$0xff] }
 0x3ff   : > { %v5869_v31 = vmul.f32 %v2530_v2, %v7345_v54  ;;  %v5872_v46 = vmul.f32 %v2530_v2, %v7346_v47  ;;  %v5875_v26 = vmul.f32 %v2530_v2, %v7348_v0  ;;  %v5878_v44 = vmul.f32 %v2530_v2, %v7350_v62  ;;  %v7358_v47 = vld [vmem:[#allocation46_spill] sm:$0xff]  ;;  %v7359_v0 = vld [vmem:[#allocation48_spill] sm:$0xff]  ;;  %v7361_v2 = vld [vmem:[#allocation47_spill] sm:$0xff] }
 0x401   : > { %v2545_v3 = vpop.permute.xlu1 %2544  ;;  %v2540_v53 = vpop.permute.xlu0 %2539  ;;  %7347 = vst [vmem:[#allocation187_spill] sm:$0xff] %v5872_v46  ;;  %7349 = vst [vmem:[#allocation188_spill] sm:$0xff] %v5875_v26 }
 0x402   : > { %7351 = vst [vmem:[#allocation189_spill] sm:$0xff] %v5878_v44  ;;  %v5881_v13 = vmul.f32 %v2545_v3, %v7352_v5  ;;  %v5884_v22 = vmul.f32 %v2545_v3, %v7354_v40  ;;  %v5887_v15 = vmul.f32 %v2545_v3, %v7356_v30  ;;  %v5890_v54 = vmul.f32 %v2545_v3, %v7357_v36  ;;  %v7362_v5 = vld [vmem:[#allocation49_spill] sm:$0xff]  ;;  %v7364_v44 = vld [vmem:[#allocation58_spill] sm:$0xff]  ;;  %v7366_v3 = vld [vmem:[#allocation60_spill] sm:$0xff] }
 0x403   : > { %v5893_v46 = vmul.f32 %v2540_v53, %v7358_v47  ;;  %v5896_v26 = vmul.f32 %v2540_v53, %v7359_v0  ;;  %v5899_v62 = vmul.f32 %v2540_v53, %v7361_v2  ;;  %v7368_v47 = vld [vmem:[#allocation59_spill] sm:$0xff] }
 0x404   : > { %7353 = vst [vmem:[#allocation190_spill] sm:$0xff] %v5881_v13  ;;  %7355 = vst [vmem:[#allocation191_spill] sm:$0xff] %v5884_v22  ;;  %v5902_v13 = vmul.f32 %v2540_v53, %v7362_v5  ;;  %v7371_v53 = vld [vmem:[#allocation54_spill] sm:$0xff] }
 0x405   : > { %v5744_v9 = vpop.permute.xlu1 %2554  ;;  %v5746_v39 = vpop.permute.xlu0 %2549  ;;  %7360 = vst [vmem:[#allocation192_spill] sm:$0xff] %v5896_v26  ;;  %v7370_v26 = vld [vmem:[#allocation61_spill] sm:$0xff] }
 0x406   : > { %7363 = vst [vmem:[#allocation193_spill] sm:$0xff] %v5902_v13  ;;  %v5906_v30 = vmul.f32 %v5744_v9, %v7364_v44  ;;  %v5910_v36 = vmul.f32 %v5744_v9, %v7366_v3  ;;  %v5914_v0 = vmul.f32 %v5744_v9, %v7368_v47  ;;  %v5918_v2 = vmul.f32 %v5744_v9, %v7370_v26  ;;  %v7373_v13 = vld [vmem:[#allocation56_spill] sm:$0xff] }
 0x407   : > { %v5922_v5 = vmul.f32 %v5746_v39, %v7371_v53  ;;  %v5926_v44 = vmul.f32 %v5746_v39, %v7373_v13  ;;  %v7381_v26 = vld [vmem:[#allocation68_spill] sm:$0xff] }
 0x408   : > { %7365 = vst [vmem:[#allocation194_spill] sm:$0xff] %v5906_v30  ;;  %7367 = vst [vmem:[#allocation195_spill] sm:$0xff] %v5910_v36  ;;  %v7375_v30 = vld [vmem:[#allocation55_spill] sm:$0xff]  ;;  %v7377_v36 = vld [vmem:[#allocation57_spill] sm:$0xff] }
 0x409   : > { %v5748_v49 = vpop.permute.xlu1 %2564  ;;  %v5750_v35 = vpop.permute.xlu0 %2559  ;;  %7369 = vst [vmem:[#allocation196_spill] sm:$0xff] %v5914_v0  ;;  %7372 = vst [vmem:[#allocation197_spill] sm:$0xff] %v5922_v5  ;;  %v5930_v3 = vmul.f32 %v5746_v39, %v7375_v30  ;;  %v5934_v47 = vmul.f32 %v5746_v39, %v7377_v36  ;;  %v7379_v0 = vld [vmem:[#allocation66_spill] sm:$0xff]  ;;  %v7383_v5 = vld [vmem:[#allocation67_spill] sm:$0xff] }
 0x40a   : > { %7374 = vst [vmem:[#allocation198_spill] sm:$0xff] %v5926_v44  ;;  %v5938_v9 = vmul.f32 %v5748_v49, %v7379_v0  ;;  %v5942_v53 = vmul.f32 %v5748_v49, %v7381_v26  ;;  %v5946_v13 = vmul.f32 %v5748_v49, %v7383_v5  ;;  %v7385_v44 = vld [vmem:[#allocation69_spill] sm:$0xff]  ;;  %v7389_v36 = vld [vmem:[#allocation64_spill] sm:$0xff] }
 0x40b   : > { %7376 = vst [vmem:[#allocation199_spill] sm:$0xff] %v5930_v3  ;;  %7378 = vst [vmem:[#allocation200_spill] sm:$0xff] %v5934_v47  ;;  %v5950_v30 = vmul.f32 %v5748_v49, %v7385_v44  ;;  %v7387_v3 = vld [vmem:[#allocation62_spill] sm:$0xff]  ;;  %v5958_v0 = vmul.f32 %v5750_v35, %v7389_v36  ;;  %v7399_v36 = vld [vmem:[#allocation75_spill] sm:$0xff] }
 0x40c   : > { %7380 = vst [vmem:[#allocation201_spill] sm:$0xff] %v5938_v9  ;;  %7382 = vst [vmem:[#allocation202_spill] sm:$0xff] %v5942_v53  ;;  %v5954_v39 = vmul.f32 %v5750_v35, %v7387_v3  ;;  %v7391_v9 = vld [vmem:[#allocation63_spill] sm:$0xff]  ;;  %v7393_v53 = vld [vmem:[#allocation65_spill] sm:$0xff] }
 0x40d   : > { %v5752_v59 = vpop.permute.xlu1 %2574  ;;  %v5754_v55 = vpop.permute.xlu0 %2569  ;;  %7384 = vst [vmem:[#allocation203_spill] sm:$0xff] %v5946_v13  ;;  %7386 = vst [vmem:[#allocation204_spill] sm:$0xff] %v5950_v30  ;;  %v5962_v26 = vmul.f32 %v5750_v35, %v7391_v9  ;;  %v5966_v5 = vmul.f32 %v5750_v35, %v7393_v53  ;;  %v7395_v49 = vld [vmem:[#allocation74_spill] sm:$0xff]  ;;  %v7397_v3 = vld [vmem:[#allocation76_spill] sm:$0xff] }
 0x40e   : > { %7388 = vst [vmem:[#allocation205_spill] sm:$0xff] %v5954_v39  ;;  %7390 = vst [vmem:[#allocation206_spill] sm:$0xff] %v5958_v0  ;;  %v5970_v44 = vmul.f32 %v5752_v59, %v7395_v49  ;;  %v5974_v39 = vmul.f32 %v5752_v59, %v7397_v3  ;;  %v5978_v0 = vmul.f32 %v5752_v59, %v7399_v36  ;;  %v7401_v9 = vld [vmem:[#allocation77_spill] sm:$0xff]  ;;  %v7403_v35 = vld [vmem:[#allocation70_spill] sm:$0xff] }
 0x40f   : > { %7392 = vst [vmem:[#allocation207_spill] sm:$0xff] %v5962_v26  ;;  %7394 = vst [vmem:[#allocation208_spill] sm:$0xff] %v5966_v5  ;;  %v5982_v26 = vmul.f32 %v5752_v59, %v7401_v9  ;;  %v5986_v53 = vmul.f32 %v5754_v55, %v7403_v35  ;;  %v7405_v5 = vld [vmem:[#allocation72_spill] sm:$0xff] }
 0x410   : > { %7396 = vst [vmem:[#allocation209_spill] sm:$0xff] %v5970_v44  ;;  %7398 = vst [vmem:[#allocation210_spill] sm:$0xff] %v5974_v39  ;;  %v5990_v49 = vmul.f32 %v5754_v55, %v7405_v5  ;;  %v7407_v44 = vld [vmem:[#allocation71_spill] sm:$0xff]  ;;  %v7409_v39 = vld [vmem:[#allocation73_spill] sm:$0xff] }
 0x411   : > { %v5804_v45 = vpop.permute.xlu1 %2584  ;;  %v5806_v12 = vpop.permute.xlu0 %2579  ;;  %7400 = vst [vmem:[#allocation211_spill] sm:$0xff] %v5978_v0  ;;  %7402 = vst [vmem:[#allocation212_spill] sm:$0xff] %v5982_v26  ;;  %v5994_v3 = vmul.f32 %v5754_v55, %v7407_v44  ;;  %v5998_v36 = vmul.f32 %v5754_v55, %v7409_v39  ;;  %v7411_v0 = vld [vmem:[#allocation82_spill] sm:$0xff]  ;;  %v7413_v9 = vld [vmem:[#allocation84_spill] sm:$0xff] }
 0x412   : > { %7404 = vst [vmem:[#allocation213_spill] sm:$0xff] %v5986_v53  ;;  %7406 = vst [vmem:[#allocation214_spill] sm:$0xff] %v5990_v49  ;;  %v6002_v59 = vmul.f32 %v5804_v45, %v7411_v0  ;;  %v6006_v35 = vmul.f32 %v5804_v45, %v7413_v9  ;;  %v7415_v53 = vld [vmem:[#allocation83_spill] sm:$0xff]  ;;  %v7417_v49 = vld [vmem:[#allocation85_spill] sm:$0xff] }
 0x413   : > { %7408 = vst [vmem:[#allocation215_spill] sm:$0xff] %v5994_v3  ;;  %7410 = vst [vmem:[#allocation216_spill] sm:$0xff] %v5998_v36  ;;  %v6010_v5 = vmul.f32 %v5804_v45, %v7415_v53  ;;  %v6014_v44 = vmul.f32 %v5804_v45, %v7417_v49  ;;  %v7419_v3 = vld [vmem:[#allocation78_spill] sm:$0xff]  ;;  %v7421_v39 = vld [vmem:[#allocation80_spill] sm:$0xff] }
 0x414   : > { %7412 = vst [vmem:[#allocation217_spill] sm:$0xff] %v6002_v59  ;;  %7414 = vst [vmem:[#allocation218_spill] sm:$0xff] %v6006_v35  ;;  %v6018_v55 = vmul.f32 %v5806_v12, %v7419_v3  ;;  %v6022_v0 = vmul.f32 %v5806_v12, %v7421_v39  ;;  %v7423_v59 = vld [vmem:[#allocation79_spill] sm:$0xff]  ;;  %v7425_v35 = vld [vmem:[#allocation81_spill] sm:$0xff] }
 0x415   : > { %v2595_v32 = vpop.permute.xlu1 %2594  ;;  %v2590_v37 = vpop.permute.xlu0 %2589  ;;  %7416 = vst [vmem:[#allocation219_spill] sm:$0xff] %v6010_v5  ;;  %7418 = vst [vmem:[#allocation220_spill] sm:$0xff] %v6014_v44  ;;  %v6026_v9 = vmul.f32 %v5806_v12, %v7423_v59  ;;  %v6030_v53 = vmul.f32 %v5806_v12, %v7425_v35  ;;  %v7427_v45 = vld [vmem:[#allocation90_spill] sm:$0xff]  ;;  %v7429_v44 = vld [vmem:[#allocation92_spill] sm:$0xff] }
 0x416   : > { %7420 = vst [vmem:[#allocation221_spill] sm:$0xff] %v6018_v55  ;;  %7422 = vst [vmem:[#allocation222_spill] sm:$0xff] %v6022_v0  ;;  %v6033_v49 = vmul.f32 %v2595_v32, %v7427_v45  ;;  %v6036_v3 = vmul.f32 %v2595_v32, %v7429_v44  ;;  %v7431_v55 = vld [vmem:[#allocation91_spill] sm:$0xff]  ;;  %v7433_v39 = vld [vmem:[#allocation93_spill] sm:$0xff] }
 0x417   : > { %7424 = vst [vmem:[#allocation223_spill] sm:$0xff] %v6026_v9  ;;  %7426 = vst [vmem:[#allocation224_spill] sm:$0xff] %v6030_v53  ;;  %v6039_v26 = vmul.f32 %v2595_v32, %v7431_v55  ;;  %v6042_v0 = vmul.f32 %v2595_v32, %v7433_v39  ;;  %v7434_v59 = vld [vmem:[#allocation86_spill] sm:$0xff]  ;;  %v7436_v30 = vld [vmem:[#allocation88_spill] sm:$0xff] }
 0x418   : > { %7428 = vst [vmem:[#allocation225_spill] sm:$0xff] %v6033_v49  ;;  %7430 = vst [vmem:[#allocation226_spill] sm:$0xff] %v6036_v3  ;;  %v6045_v9 = vmul.f32 %v2590_v37, %v7434_v59  ;;  %v6048_v12 = vmul.f32 %v2590_v37, %v7436_v30  ;;  %v7438_v35 = vld [vmem:[#allocation87_spill] sm:$0xff]  ;;  %v7440_v45 = vld [vmem:[#allocation89_spill] sm:$0xff] }
 0x419   : > { %v2605_v40 = vpop.permute.xlu1 %2604  ;;  %v2600_v22 = vpop.permute.xlu0 %2599  ;;  %7432 = vst [vmem:[#allocation227_spill] sm:$0xff] %v6039_v26  ;;  %v6051_v53 = vmul.f32 %v2590_v37, %v7438_v35  ;;  %v6054_v49 = vmul.f32 %v2590_v37, %v7440_v45  ;;  %v7442_v44 = vld [vmem:[#allocation98_spill] sm:$0xff]  ;;  %v7444_v55 = vld [vmem:[#allocation100_spill] sm:$0xff]  ;;  %v7446_v32 = vld [vmem:[#allocation99_spill] sm:$0xff] }
 0x41a   : > { %7435 = vst [vmem:[#allocation228_spill] sm:$0xff] %v6045_v9  ;;  %7437 = vst [vmem:[#allocation229_spill] sm:$0xff] %v6048_v12  ;;  %v6057_v3 = vmul.f32 %v2605_v40, %v7442_v44  ;;  %v6060_v26 = vmul.f32 %v2605_v40, %v7444_v55  ;;  %v6063_v39 = vmul.f32 %v2605_v40, %v7446_v32  ;;  %v7448_v59 = vld [vmem:[#allocation101_spill] sm:$0xff]  ;;  %v7449_v30 = vld [vmem:[#allocation94_spill] sm:$0xff] }
 0x41b   : > { %7439 = vst [vmem:[#allocation230_spill] sm:$0xff] %v6051_v53  ;;  %7441 = vst [vmem:[#allocation231_spill] sm:$0xff] %v6054_v49  ;;  %v6066_v9 = vmul.f32 %v2605_v40, %v7448_v59  ;;  %v6069_v12 = vmul.f32 %v2600_v22, %v7449_v30  ;;  %v7451_v35 = vld [vmem:[#allocation96_spill] sm:$0xff]  ;;  %v7453_v37 = vld [vmem:[#allocation95_spill] sm:$0xff] }
 0x41c   : > { %7443 = vst [vmem:[#allocation232_spill] sm:$0xff] %v6057_v3  ;;  %7445 = vst [vmem:[#allocation233_spill] sm:$0xff] %v6060_v26  ;;  %v6072_v53 = vmul.f32 %v2600_v22, %v7451_v35  ;;  %v6075_v45 = vmul.f32 %v2600_v22, %v7453_v37  ;;  %v7455_v44 = vld [vmem:[#allocation97_spill] sm:$0xff]  ;;  %v7457_v49 = vld [vmem:[#allocation106_spill] sm:$0xff] }
 0x41d   : > { %v2615_v13 = vpop.permute.xlu1 %2614  ;;  %v2610_v47 = vpop.permute.xlu0 %2609  ;;  %7447 = vst [vmem:[#allocation234_spill] sm:$0xff] %v6063_v39  ;;  %7450 = vst [vmem:[#allocation235_spill] sm:$0xff] %v6069_v12  ;;  %v6078_v3 = vmul.f32 %v2600_v22, %v7455_v44  ;;  %v7459_v39 = vld [vmem:[#allocation108_spill] sm:$0xff]  ;;  %v7461_v59 = vld [vmem:[#allocation107_spill] sm:$0xff] }
 0x41e   : > { %7452 = vst [vmem:[#allocation236_spill] sm:$0xff] %v6072_v53  ;;  %7454 = vst [vmem:[#allocation237_spill] sm:$0xff] %v6075_v45  ;;  %v6081_v32 = vmul.f32 %v2615_v13, %v7457_v49  ;;  %v6084_v40 = vmul.f32 %v2615_v13, %v7459_v39  ;;  %v6087_v30 = vmul.f32 %v2615_v13, %v7461_v59  ;;  %v7463_v12 = vld [vmem:[#allocation109_spill] sm:$0xff]  ;;  %v7464_v53 = vld [vmem:[#allocation102_spill] sm:$0xff] }
 0x41f   : > { %7456 = vst [vmem:[#allocation238_spill] sm:$0xff] %v6078_v3  ;;  %v6090_v35 = vmul.f32 %v2615_v13, %v7463_v12  ;;  %v6093_v37 = vmul.f32 %v2610_v47, %v7464_v53  ;;  %v7466_v45 = vld [vmem:[#allocation104_spill] sm:$0xff]  ;;  %v7468_v44 = vld [vmem:[#allocation103_spill] sm:$0xff]  ;;  %v7470_v49 = vld [vmem:[#allocation105_spill] sm:$0xff] }
 0x420   : > { %7458 = vst [vmem:[#allocation239_spill] sm:$0xff] %v6081_v32  ;;  %7460 = vst [vmem:[#allocation240_spill] sm:$0xff] %v6084_v40  ;;  %v6096_v22 = vmul.f32 %v2610_v47, %v7466_v45  ;;  %v6099_v3 = vmul.f32 %v2610_v47, %v7468_v44  ;;  %v6102_v32 = vmul.f32 %v2610_v47, %v7470_v49  ;;  %v7472_v39 = vld [vmem:[#allocation114_spill] sm:$0xff]  ;;  %v7474_v59 = vld [vmem:[#allocation116_spill] sm:$0xff] }
 0x421   : > { %v2625_v5 = vpop.permute.xlu1 %2624  ;;  %v2620_v36 = vpop.permute.xlu0 %2619  ;;  %7462 = vst [vmem:[#allocation241_spill] sm:$0xff] %v6087_v30  ;;  %7465 = vst [vmem:[#allocation242_spill] sm:$0xff] %v6093_v37  ;;  %v7476_v13 = vld [vmem:[#allocation115_spill] sm:$0xff]  ;;  %v7478_v53 = vld [vmem:[#allocation117_spill] sm:$0xff] }
 0x422   : > { %7467 = vst [vmem:[#allocation243_spill] sm:$0xff] %v6096_v22  ;;  %7469 = vst [vmem:[#allocation244_spill] sm:$0xff] %v6099_v3  ;;  %v6105_v40 = vmul.f32 %v2625_v5, %v7472_v39  ;;  %v6108_v30 = vmul.f32 %v2625_v5, %v7474_v59  ;;  %v6111_v12 = vmul.f32 %v2625_v5, %v7476_v13  ;;  %v7479_v45 = vld [vmem:[#allocation110_spill] sm:$0xff]  ;;  %v7481_v44 = vld [vmem:[#allocation112_spill] sm:$0xff] }
 0x423   : > { %7471 = vst [vmem:[#allocation245_spill] sm:$0xff] %v6102_v32  ;;  %v6114_v37 = vmul.f32 %v2625_v5, %v7478_v53  ;;  %v6117_v22 = vmul.f32 %v2620_v36, %v7479_v45  ;;  %v6120_v3 = vmul.f32 %v2620_v36, %v7481_v44  ;;  %v7483_v47 = vld [vmem:[#allocation111_spill] sm:$0xff]  ;;  %v7485_v39 = vld [vmem:[#allocation113_spill] sm:$0xff]  ;;  %v7487_v32 = vld [vmem:[#allocation122_spill] sm:$0xff] }
 0x424   : > { %7473 = vst [vmem:[#allocation246_spill] sm:$0xff] %v6105_v40  ;;  %7475 = vst [vmem:[#allocation247_spill] sm:$0xff] %v6108_v30  ;;  %v6123_v49 = vmul.f32 %v2620_v36, %v7483_v47  ;;  %v6126_v40 = vmul.f32 %v2620_v36, %v7485_v39  ;;  %v7491_v53 = vld [vmem:[#allocation123_spill] sm:$0xff] }
 0x425   : > { %v2635_v55 = vpop.permute.xlu1 %2634  ;;  %v2630_v26 = vpop.permute.xlu0 %2629  ;;  %7477 = vst [vmem:[#allocation248_spill] sm:$0xff] %v6111_v12  ;;  %7480 = vst [vmem:[#allocation249_spill] sm:$0xff] %v6117_v22  ;;  %v7489_v12 = vld [vmem:[#allocation124_spill] sm:$0xff]  ;;  %v7493_v22 = vld [vmem:[#allocation125_spill] sm:$0xff] }
 0x426   : > { %7482 = vst [vmem:[#allocation250_spill] sm:$0xff] %v6120_v3  ;;  %7484 = vst [vmem:[#allocation251_spill] sm:$0xff] %v6123_v49  ;;  %v6129_v13 = vmul.f32 %v2635_v55, %v7487_v32  ;;  %v6132_v5 = vmul.f32 %v2635_v55, %v7489_v12  ;;  %v6135_v45 = vmul.f32 %v2635_v55, %v7491_v53  ;;  %v7495_v3 = vld [vmem:[#allocation118_spill] sm:$0xff]  ;;  %v7497_v49 = vld [vmem:[#allocation120_spill] sm:$0xff] }
 0x427   : > { %7486 = vst [vmem:[#allocation252_spill] sm:$0xff] %v6126_v40  ;;  %v6138_v44 = vmul.f32 %v2635_v55, %v7493_v22  ;;  %v6141_v47 = vmul.f32 %v2630_v26, %v7495_v3  ;;  %v6144_v36 = vmul.f32 %v2630_v26, %v7497_v49  ;;  %v7499_v39 = vld [vmem:[#allocation119_spill] sm:$0xff]  ;;  %v7501_v32 = vld [vmem:[#allocation121_spill] sm:$0xff]  ;;  %v7502_v12 = vld [vmem:[#allocation130_spill] sm:$0xff] }
 0x428   : > { %7488 = vst [vmem:[#allocation253_spill] sm:$0xff] %v6129_v13  ;;  %7490 = vst [vmem:[#allocation254_spill] sm:$0xff] %v6132_v5  ;;  %v6147_v40 = vmul.f32 %v2630_v26, %v7499_v39  ;;  %v6150_v13 = vmul.f32 %v2630_v26, %v7501_v32  ;;  %v7504_v53 = vld [vmem:[#allocation132_spill] sm:$0xff]  ;;  %v7506_v55 = vld [vmem:[#allocation131_spill] sm:$0xff] }
 0x429   : > { %v2645_v59 = vpop.permute.xlu1 %2644  ;;  %v2640_v30 = vpop.permute.xlu0 %2639  ;;  %7492 = vst [vmem:[#allocation255_spill] sm:$0xff] %v6135_v45  ;;  %7494 = vst [vmem:[#allocation256_spill] sm:$0xff] %v6138_v44  ;;  %v7508_v3 = vld [vmem:[#allocation133_spill] sm:$0xff]  ;;  %v7510_v44 = vld [vmem:[#allocation126_spill] sm:$0xff] }
 0x42a   : > { %7496 = vst [vmem:[#allocation257_spill] sm:$0xff] %v6141_v47  ;;  %7498 = vst [vmem:[#allocation258_spill] sm:$0xff] %v6144_v36  ;;  %v6153_v5 = vmul.f32 %v2645_v59, %v7502_v12  ;;  %v6156_v45 = vmul.f32 %v2645_v59, %v7504_v53  ;;  %v6159_v22 = vmul.f32 %v2645_v59, %v7506_v55  ;;  %v7514_v32 = vld [vmem:[#allocation127_spill] sm:$0xff] }
 0x42b   : > { %7500 = vst [vmem:[#allocation259_spill] sm:$0xff] %v6147_v40  ;;  %v6162_v47 = vmul.f32 %v2645_v59, %v7508_v3  ;;  %v6165_v39 = vmul.f32 %v2640_v30, %v7510_v44  ;;  %v7512_v40 = vld [vmem:[#allocation128_spill] sm:$0xff]  ;;  %v6171_v12 = vmul.f32 %v2640_v30, %v7514_v32 }
 0x42c   : > { %7503 = vst [vmem:[#allocation260_spill] sm:$0xff] %v6153_v5  ;;  %7505 = vst [vmem:[#allocation261_spill] sm:$0xff] %v6156_v45  ;;  %v6168_v26 = vmul.f32 %v2640_v30, %v7512_v40  ;;  %v7516_v5 = vld [vmem:[#allocation129_spill] sm:$0xff] }
 0x42d   : > { %7507 = vst [vmem:[#allocation262_spill] sm:$0xff] %v6159_v22  ;;  %7509 = vst [vmem:[#allocation263_spill] sm:$0xff] %v6162_v47  ;;  %v2815_v49 = vpop.permute.xlu1 %2814  ;;  %v2810_v36 = vpop.permute.xlu0 %2809  ;;  %v6174_v53 = vmul.f32 %v2640_v30, %v7516_v5 }
 0x42e   : > { %7511 = vst [vmem:[#allocation264_spill] sm:$0xff] %v6165_v39  ;;  %7513 = vst [vmem:[#allocation265_spill] sm:$0xff] %v6168_v26  ;;  %v2971_v55 = vadd.f32 %v2815_v49, %v5793_v16  ;;  %v2972_v22 = vadd.f32 %v2815_v49, %v5796_v18  ;;  %v2973_v59 = vadd.f32 %v2815_v49, %v5799_v51 }
 0x42f   : > { %7515 = vst [vmem:[#allocation266_spill] sm:$0xff] %v6171_v12  ;;  %7517 = vst [vmem:[#allocation267_spill] sm:$0xff] %v6174_v53  ;;  %v2974_v3 = vadd.f32 %v2815_v49, %v5802_v29  ;;  %v2967_v44 = vadd.f32 %v2810_v36, %v5769_v8  ;;  %v2968_v39 = vadd.f32 %v2810_v36, %v5772_v21 }
 0x430   : > { %v2969_v40 = vadd.f32 %v2810_v36, %v5775_v28  ;;  %v2970_v32 = vadd.f32 %v2810_v36, %v5778_v19  ;;  %v3099_v12 = vmax.f32 %v2971_v55, 0.0  ;;  %v3100_v26 = vmax.f32 %v2972_v22, 0.0 }
 0x431   : > { %v3101_v30 = vmax.f32 %v2973_v59, 0.0  ;;  %v3102_v5 = vmax.f32 %v2974_v3, 0.0  ;;  %v3095_v53 = vmax.f32 %v2967_v44, 0.0  ;;  %v3096_v16 = vmax.f32 %v2968_v39, 0.0  ;;  %v2825_v45 = vpop.permute.xlu1 %2824  ;;  %v2820_v51 = vpop.permute.xlu0 %2819 }
 0x432   : > { %v3097_v47 = vmax.f32 %v2969_v40, 0.0  ;;  %v3098_v18 = vmax.f32 %v2970_v32, 0.0  ;;  %3225 = vst [vmem:[%s6701_s4 + $0x10] sm:$0xff] %v3099_v12  ;;  %3226 = vst [vmem:[%s6701_s4 + $0x18] sm:$0xff] %v3100_v26  ;;  %v2979_v8 = vadd.f32 %v2825_v45, %v5781_v7  ;;  %v2980_v21 = vadd.f32 %v2825_v45, %v5784_v34 }
 0x433   : > { %3497 = vst [vmem:[%s6701_s4 + $0x210] sm:$0xff] %v3101_v30  ;;  %3498 = vst [vmem:[%s6701_s4 + $0x218] sm:$0xff] %v3102_v5  ;;  %v2981_v28 = vadd.f32 %v2825_v45, %v5787_v33  ;;  %v2982_v19 = vadd.f32 %v2825_v45, %v5790_v63  ;;  %v2975_v7 = vadd.f32 %v2820_v51, %v5757_v11 }
 0x434   : > { %3223 = vst [vmem:[%s6701_s4] sm:$0xff] %v3095_v53  ;;  %3224 = vst [vmem:[%s6701_s4 + $0x8] sm:$0xff] %v3096_v16  ;;  %v2976_v34 = vadd.f32 %v2820_v51, %v5760_v25  ;;  %v2977_v33 = vadd.f32 %v2820_v51, %v5763_v57  ;;  %v2978_v63 = vadd.f32 %v2820_v51, %v5766_v50  ;;  %v3107_v29 = vmax.f32 %v2979_v8, 0.0 }
 0x435   : > { %3495 = vst [vmem:[%s6701_s4 + $0x200] sm:$0xff] %v3097_v47  ;;  %3496 = vst [vmem:[%s6701_s4 + $0x208] sm:$0xff] %v3098_v18  ;;  %v3108_v45 = vmax.f32 %v2980_v21, 0.0  ;;  %v3109_v36 = vmax.f32 %v2981_v28, 0.0  ;;  %v3110_v22 = vmax.f32 %v2982_v19, 0.0  ;;  %v3103_v49 = vmax.f32 %v2975_v7, 0.0  ;;  %v2835_v12 = vpop.permute.xlu1 %2834  ;;  %v2830_v53 = vpop.permute.xlu0 %2829 }
 0x436   : > { %v3104_v39 = vmax.f32 %v2976_v34, 0.0  ;;  %v3105_v26 = vmax.f32 %v2977_v33, 0.0  ;;  %v3106_v47 = vmax.f32 %v2978_v63, 0.0  ;;  %3229 = vst [vmem:[%s6701_s4 + $0x30] sm:$0xff] %v3107_v29  ;;  %v2987_v11 = vadd.f32 %v2835_v12, %v5809_v56 }
 0x437   : > { %3230 = vst [vmem:[%s6701_s4 + $0x38] sm:$0xff] %v3108_v45  ;;  %3501 = vst [vmem:[%s6701_s4 + $0x230] sm:$0xff] %v3109_v36  ;;  %v2988_v25 = vadd.f32 %v2835_v12, %v5812_v43  ;;  %v2989_v57 = vadd.f32 %v2835_v12, %v5815_v17  ;;  %v2990_v50 = vadd.f32 %v2835_v12, %v5818_v4  ;;  %v7520_v36 = vld [vmem:[#allocation189_spill] sm:$0xff] }
 0x438   : > { %3502 = vst [vmem:[%s6701_s4 + $0x238] sm:$0xff] %v3110_v22  ;;  %3227 = vst [vmem:[%s6701_s4 + $0x20] sm:$0xff] %v3103_v49  ;;  %v2983_v56 = vadd.f32 %v2830_v53, %v5821_v41  ;;  %v2984_v43 = vadd.f32 %v2830_v53, %v5824_v14  ;;  %v2985_v17 = vadd.f32 %v2830_v53, %v5827_v1  ;;  %v3115_v55 = vmax.f32 %v2987_v11, 0.0 }
 0x439   : > { %3228 = vst [vmem:[%s6701_s4 + $0x28] sm:$0xff] %v3104_v39  ;;  %3499 = vst [vmem:[%s6701_s4 + $0x220] sm:$0xff] %v3105_v26  ;;  %v2986_v4 = vadd.f32 %v2830_v53, %v5830_v48  ;;  %v3116_v59 = vmax.f32 %v2988_v25, 0.0  ;;  %v3117_v3 = vmax.f32 %v2989_v57, 0.0  ;;  %v3118_v44 = vmax.f32 %v2990_v50, 0.0  ;;  %v2845_v16 = vpop.permute.xlu1 %2844  ;;  %v2840_v18 = vpop.permute.xlu0 %2839 }
 0x43a   : > { %3500 = vst [vmem:[%s6701_s4 + $0x228] sm:$0xff] %v3106_v47  ;;  %v3111_v40 = vmax.f32 %v2983_v56, 0.0  ;;  %v3112_v32 = vmax.f32 %v2984_v43, 0.0  ;;  %v3113_v30 = vmax.f32 %v2985_v17, 0.0  ;;  %3233 = vst [vmem:[%s6701_s4 + $0x50] sm:$0xff] %v3115_v55  ;;  %v2995_v41 = vadd.f32 %v2845_v16, %v5833_v20  ;;  %v7522_v43 = vld [vmem:[#allocation191_spill] sm:$0xff] }
 0x43b   : > { %v3114_v5 = vmax.f32 %v2986_v4, 0.0  ;;  %3234 = vst [vmem:[%s6701_s4 + $0x58] sm:$0xff] %v3116_v59  ;;  %3505 = vst [vmem:[%s6701_s4 + $0x250] sm:$0xff] %v3117_v3  ;;  %v2996_v14 = vadd.f32 %v2845_v16, %v5836_v24  ;;  %v2997_v1 = vadd.f32 %v2845_v16, %v5839_v23  ;;  %v2998_v48 = vadd.f32 %v2845_v16, %v5842_v61  ;;  %v7523_v59 = vld [vmem:[#allocation192_spill] sm:$0xff] }
 0x43c   : > { %3506 = vst [vmem:[%s6701_s4 + $0x258] sm:$0xff] %v3118_v44  ;;  %3231 = vst [vmem:[%s6701_s4 + $0x40] sm:$0xff] %v3111_v40  ;;  %v2991_v20 = vadd.f32 %v2840_v18, %v5845_v10  ;;  %v2992_v24 = vadd.f32 %v2840_v18, %v5848_v42  ;;  %v2993_v23 = vadd.f32 %v2840_v18, %v5851_v6  ;;  %v3123_v51 = vmax.f32 %v2995_v41, 0.0  ;;  %v7524_v44 = vld [vmem:[#allocation193_spill] sm:$0xff] }
 0x43d   : > { %3232 = vst [vmem:[%s6701_s4 + $0x48] sm:$0xff] %v3112_v32  ;;  %3503 = vst [vmem:[%s6701_s4 + $0x240] sm:$0xff] %v3113_v30  ;;  %v2994_v61 = vadd.f32 %v2840_v18, %v5854_v38  ;;  %v3124_v8 = vmax.f32 %v2996_v14, 0.0  ;;  %v3125_v21 = vmax.f32 %v2997_v1, 0.0  ;;  %v3126_v28 = vmax.f32 %v2998_v48, 0.0  ;;  %v2855_v63 = vpop.permute.xlu1 %2854  ;;  %v2850_v29 = vpop.permute.xlu0 %2849 }
 0x43e   : > { %3504 = vst [vmem:[%s6701_s4 + $0x248] sm:$0xff] %v3114_v5  ;;  %v3119_v19 = vmax.f32 %v2991_v20, 0.0  ;;  %v3120_v7 = vmax.f32 %v2992_v24, 0.0  ;;  %v3121_v34 = vmax.f32 %v2993_v23, 0.0  ;;  %3237 = vst [vmem:[%s6701_s4 + $0x70] sm:$0xff] %v3123_v51  ;;  %v3003_v10 = vadd.f32 %v2855_v63, %v5857_v27  ;;  %v7526_v24 = vld [vmem:[#allocation195_spill] sm:$0xff] }
 0x43f   : > { %v3122_v33 = vmax.f32 %v2994_v61, 0.0  ;;  %3238 = vst [vmem:[%s6701_s4 + $0x78] sm:$0xff] %v3124_v8  ;;  %3509 = vst [vmem:[%s6701_s4 + $0x270] sm:$0xff] %v3125_v21  ;;  %v3004_v42 = vadd.f32 %v2855_v63, %v5860_v52  ;;  %v3005_v6 = vadd.f32 %v2855_v63, %v5863_v60  ;;  %v3006_v38 = vadd.f32 %v2855_v63, %v5866_v58  ;;  %v7518_v52 = vld [vmem:[#allocation187_spill] sm:$0xff]  ;;  %v7519_v58 = vld [vmem:[#allocation188_spill] sm:$0xff] }
 0x440   : > { %3510 = vst [vmem:[%s6701_s4 + $0x278] sm:$0xff] %v3126_v28  ;;  %3235 = vst [vmem:[%s6701_s4 + $0x60] sm:$0xff] %v3119_v19  ;;  %v2999_v27 = vadd.f32 %v2850_v29, %v5869_v31  ;;  %v3000_v60 = vadd.f32 %v2850_v29, %v7518_v52  ;;  %v3001_v45 = vadd.f32 %v2850_v29, %v7519_v58  ;;  %v3131_v49 = vmax.f32 %v3003_v10, 0.0  ;;  %v7521_v31 = vld [vmem:[#allocation190_spill] sm:$0xff]  ;;  %v7527_v61 = vld [vmem:[#allocation196_spill] sm:$0xff] }
 0x441   : > { %3236 = vst [vmem:[%s6701_s4 + $0x68] sm:$0xff] %v3120_v7  ;;  %3507 = vst [vmem:[%s6701_s4 + $0x260] sm:$0xff] %v3121_v34  ;;  %v3002_v22 = vadd.f32 %v2850_v29, %v7520_v36  ;;  %v3132_v39 = vmax.f32 %v3004_v42, 0.0  ;;  %v3133_v26 = vmax.f32 %v3005_v6, 0.0  ;;  %v3134_v47 = vmax.f32 %v3006_v38, 0.0  ;;  %v2865_v57 = vpop.permute.xlu1 %2864  ;;  %v2860_v50 = vpop.permute.xlu0 %2859  ;;  %v7528_v21 = vld [vmem:[#allocation197_spill] sm:$0xff] }
 0x442   : > { %3508 = vst [vmem:[%s6701_s4 + $0x268] sm:$0xff] %v3122_v33  ;;  %v3127_v12 = vmax.f32 %v2999_v27, 0.0  ;;  %v3128_v53 = vmax.f32 %v3000_v60, 0.0  ;;  %v3129_v11 = vmax.f32 %v3001_v45, 0.0  ;;  %3241 = vst [vmem:[%s6701_s4 + $0x90] sm:$0xff] %v3131_v49  ;;  %v3011_v56 = vadd.f32 %v2865_v57, %v7521_v31  ;;  %v7529_v19 = vld [vmem:[#allocation198_spill] sm:$0xff] }
 0x443   : > { %v3130_v25 = vmax.f32 %v3002_v22, 0.0  ;;  %3242 = vst [vmem:[%s6701_s4 + $0x98] sm:$0xff] %v3132_v39  ;;  %3513 = vst [vmem:[%s6701_s4 + $0x290] sm:$0xff] %v3133_v26  ;;  %v3012_v17 = vadd.f32 %v2865_v57, %v7522_v43  ;;  %v3013_v4 = vadd.f32 %v2865_v57, %v5887_v15  ;;  %v3014_v55 = vadd.f32 %v2865_v57, %v5890_v54  ;;  %v7530_v7 = vld [vmem:[#allocation199_spill] sm:$0xff]  ;;  %v7531_v33 = vld [vmem:[#allocation200_spill] sm:$0xff] }
 0x444   : > { %3514 = vst [vmem:[%s6701_s4 + $0x298] sm:$0xff] %v3134_v47  ;;  %3239 = vst [vmem:[%s6701_s4 + $0x80] sm:$0xff] %v3127_v12  ;;  %v3007_v15 = vadd.f32 %v2860_v50, %v5893_v46  ;;  %v3008_v54 = vadd.f32 %v2860_v50, %v7523_v59  ;;  %v3009_v3 = vadd.f32 %v2860_v50, %v5899_v62  ;;  %v3139_v32 = vmax.f32 %v3011_v56, 0.0  ;;  %v7525_v46 = vld [vmem:[#allocation194_spill] sm:$0xff]  ;;  %v7532_v36 = vld [vmem:[#allocation201_spill] sm:$0xff] }
 0x445   : > { %3240 = vst [vmem:[%s6701_s4 + $0x88] sm:$0xff] %v3128_v53  ;;  %3511 = vst [vmem:[%s6701_s4 + $0x280] sm:$0xff] %v3129_v11  ;;  %v3010_v40 = vadd.f32 %v2860_v50, %v7524_v44  ;;  %v3140_v30 = vmax.f32 %v3012_v17, 0.0  ;;  %v3141_v5 = vmax.f32 %v3013_v4, 0.0  ;;  %v3142_v16 = vmax.f32 %v3014_v55, 0.0  ;;  %v2875_v48 = vpop.permute.xlu1 %2874  ;;  %v2870_v20 = vpop.permute.xlu0 %2869  ;;  %v7533_v49 = vld [vmem:[#allocation202_spill] sm:$0xff] }
 0x446   : > { %3512 = vst [vmem:[%s6701_s4 + $0x288] sm:$0xff] %v3130_v25  ;;  %v3135_v18 = vmax.f32 %v3007_v15, 0.0  ;;  %v3136_v41 = vmax.f32 %v3008_v54, 0.0  ;;  %v3137_v14 = vmax.f32 %v3009_v3, 0.0  ;;  %3245 = vst [vmem:[%s6701_s4 + $0xb0] sm:$0xff] %v3139_v32  ;;  %v3019_v62 = vadd.f32 %v2875_v48, %v7525_v46  ;;  %v7534_v26 = vld [vmem:[#allocation203_spill] sm:$0xff] }
 0x447   : > { %v3138_v1 = vmax.f32 %v3010_v40, 0.0  ;;  %3246 = vst [vmem:[%s6701_s4 + $0xb8] sm:$0xff] %v3140_v30  ;;  %3517 = vst [vmem:[%s6701_s4 + $0x2b0] sm:$0xff] %v3141_v5  ;;  %v3020_v23 = vadd.f32 %v2875_v48, %v7526_v24  ;;  %v3021_v51 = vadd.f32 %v2875_v48, %v7527_v61  ;;  %v3022_v8 = vadd.f32 %v2875_v48, %v5918_v2  ;;  %v7535_v12 = vld [vmem:[#allocation204_spill] sm:$0xff]  ;;  %v7536_v11 = vld [vmem:[#allocation205_spill] sm:$0xff] }
 0x448   : > { %3518 = vst [vmem:[%s6701_s4 + $0x2b8] sm:$0xff] %v3142_v16  ;;  %3243 = vst [vmem:[%s6701_s4 + $0xa0] sm:$0xff] %v3135_v18  ;;  %v3015_v28 = vadd.f32 %v2870_v20, %v7528_v21  ;;  %v3016_v2 = vadd.f32 %v2870_v20, %v7529_v19  ;;  %v3017_v34 = vadd.f32 %v2870_v20, %v7530_v7  ;;  %v3147_v29 = vmax.f32 %v3019_v62, 0.0  ;;  %v7537_v57 = vld [vmem:[#allocation206_spill] sm:$0xff]  ;;  %v7538_v31 = vld [vmem:[#allocation207_spill] sm:$0xff] }
 0x449   : > { %3244 = vst [vmem:[%s6701_s4 + $0xa8] sm:$0xff] %v3136_v41  ;;  %3515 = vst [vmem:[%s6701_s4 + $0x2a0] sm:$0xff] %v3137_v14  ;;  %v3018_v63 = vadd.f32 %v2870_v20, %v7531_v33  ;;  %v3148_v10 = vmax.f32 %v3020_v23, 0.0  ;;  %v3149_v42 = vmax.f32 %v3021_v51, 0.0  ;;  %v3150_v6 = vmax.f32 %v3022_v8, 0.0  ;;  %v2885_v58 = vpop.permute.xlu1 %2884  ;;  %v2880_v45 = vpop.permute.xlu0 %2879  ;;  %v7539_v43 = vld [vmem:[#allocation208_spill] sm:$0xff] }
 0x44a   : > { %3516 = vst [vmem:[%s6701_s4 + $0x2a8] sm:$0xff] %v3138_v1  ;;  %v3143_v38 = vmax.f32 %v3015_v28, 0.0  ;;  %v3144_v27 = vmax.f32 %v3016_v2, 0.0  ;;  %v3145_v52 = vmax.f32 %v3017_v34, 0.0  ;;  %3249 = vst [vmem:[%s6701_s4 + $0xd0] sm:$0xff] %v3147_v29  ;;  %v3027_v22 = vadd.f32 %v2885_v58, %v7532_v36  ;;  %v7540_v5 = vld [vmem:[#allocation209_spill] sm:$0xff] }
 0x44b   : > { %v3146_v60 = vmax.f32 %v3018_v63, 0.0  ;;  %3250 = vst [vmem:[%s6701_s4 + $0xd8] sm:$0xff] %v3148_v10  ;;  %3521 = vst [vmem:[%s6701_s4 + $0x2d0] sm:$0xff] %v3149_v42  ;;  %v3028_v39 = vadd.f32 %v2885_v58, %v7533_v49  ;;  %v3029_v47 = vadd.f32 %v2885_v58, %v7534_v26  ;;  %v3030_v53 = vadd.f32 %v2885_v58, %v7535_v12  ;;  %v7541_v18 = vld [vmem:[#allocation210_spill] sm:$0xff]  ;;  %v7542_v14 = vld [vmem:[#allocation211_spill] sm:$0xff] }
 0x44c   : > { %3522 = vst [vmem:[%s6701_s4 + $0x2d8] sm:$0xff] %v3150_v6  ;;  %3247 = vst [vmem:[%s6701_s4 + $0xc0] sm:$0xff] %v3143_v38  ;;  %v3023_v25 = vadd.f32 %v2880_v45, %v7536_v11  ;;  %v3024_v50 = vadd.f32 %v2880_v45, %v7537_v57  ;;  %v3025_v56 = vadd.f32 %v2880_v45, %v7538_v31  ;;  %v3155_v4 = vmax.f32 %v3027_v22, 0.0  ;;  %v7543_v48 = vld [vmem:[#allocation212_spill] sm:$0xff]  ;;  %v7544_v46 = vld [vmem:[#allocation213_spill] sm:$0xff] }
 0x44d   : > { %3248 = vst [vmem:[%s6701_s4 + $0xc8] sm:$0xff] %v3144_v27  ;;  %3519 = vst [vmem:[%s6701_s4 + $0x2c0] sm:$0xff] %v3145_v52  ;;  %v3026_v17 = vadd.f32 %v2880_v45, %v7539_v43  ;;  %v3156_v55 = vmax.f32 %v3028_v39, 0.0  ;;  %v3157_v15 = vmax.f32 %v3029_v47, 0.0  ;;  %v3158_v59 = vmax.f32 %v3030_v53, 0.0  ;;  %v2895_v32 = vpop.permute.xlu1 %2894  ;;  %v2890_v30 = vpop.permute.xlu0 %2889  ;;  %v7545_v24 = vld [vmem:[#allocation214_spill] sm:$0xff] }
 0x44e   : > { %3520 = vst [vmem:[%s6701_s4 + $0x2c8] sm:$0xff] %v3146_v60  ;;  %v3151_v54 = vmax.f32 %v3023_v25, 0.0  ;;  %v3152_v3 = vmax.f32 %v3024_v50, 0.0  ;;  %v3153_v44 = vmax.f32 %v3025_v56, 0.0  ;;  %3253 = vst [vmem:[%s6701_s4 + $0xf0] sm:$0xff] %v3155_v4  ;;  %v3035_v16 = vadd.f32 %v2895_v32, %v7540_v5  ;;  %v7546_v61 = vld [vmem:[#allocation215_spill] sm:$0xff] }
 0x44f   : > { %v3154_v40 = vmax.f32 %v3026_v17, 0.0  ;;  %3254 = vst [vmem:[%s6701_s4 + $0xf8] sm:$0xff] %v3156_v55  ;;  %3525 = vst [vmem:[%s6701_s4 + $0x2f0] sm:$0xff] %v3157_v15  ;;  %v3036_v41 = vadd.f32 %v2895_v32, %v7541_v18  ;;  %v3037_v1 = vadd.f32 %v2895_v32, %v7542_v14  ;;  %v3038_v20 = vadd.f32 %v2895_v32, %v7543_v48  ;;  %v7547_v8 = vld [vmem:[#allocation216_spill] sm:$0xff]  ;;  %v7548_v6 = vld [vmem:[#allocation217_spill] sm:$0xff] }
 0x450   : > { %3526 = vst [vmem:[%s6701_s4 + $0x2f8] sm:$0xff] %v3158_v59  ;;  %3251 = vst [vmem:[%s6701_s4 + $0xe0] sm:$0xff] %v3151_v54  ;;  %v3031_v62 = vadd.f32 %v2890_v30, %v7544_v46  ;;  %v3032_v23 = vadd.f32 %v2890_v30, %v7545_v24  ;;  %v3033_v51 = vadd.f32 %v2890_v30, %v7546_v61  ;;  %v3163_v28 = vmax.f32 %v3035_v16, 0.0  ;;  %v7549_v27 = vld [vmem:[#allocation218_spill] sm:$0xff]  ;;  %v7550_v60 = vld [vmem:[#allocation219_spill] sm:$0xff] }
 0x451   : > { %3252 = vst [vmem:[%s6701_s4 + $0xe8] sm:$0xff] %v3152_v3  ;;  %3523 = vst [vmem:[%s6701_s4 + $0x2e0] sm:$0xff] %v3153_v44  ;;  %v3034_v21 = vadd.f32 %v2890_v30, %v7547_v8  ;;  %v3164_v19 = vmax.f32 %v3036_v41, 0.0  ;;  %v3165_v2 = vmax.f32 %v3037_v1, 0.0  ;;  %v3166_v7 = vmax.f32 %v3038_v20, 0.0  ;;  %v2905_v10 = vpop.permute.xlu1 %2904  ;;  %v2900_v42 = vpop.permute.xlu0 %2899  ;;  %v7551_v45 = vld [vmem:[#allocation220_spill] sm:$0xff] }
 0x452   : > { %3524 = vst [vmem:[%s6701_s4 + $0x2e8] sm:$0xff] %v3154_v40  ;;  %v3159_v34 = vmax.f32 %v3031_v62, 0.0  ;;  %v3160_v33 = vmax.f32 %v3032_v23, 0.0  ;;  %v3161_v63 = vmax.f32 %v3033_v51, 0.0  ;;  %3257 = vst [vmem:[%s6701_s4 + $0x110] sm:$0xff] %v3163_v28  ;;  %v3043_v38 = vadd.f32 %v2905_v10, %v7548_v6  ;;  %v7552_v22 = vld [vmem:[#allocation221_spill] sm:$0xff] }
 0x453   : > { %v3162_v29 = vmax.f32 %v3034_v21, 0.0  ;;  %3258 = vst [vmem:[%s6701_s4 + $0x118] sm:$0xff] %v3164_v19  ;;  %3529 = vst [vmem:[%s6701_s4 + $0x310] sm:$0xff] %v3165_v2  ;;  %v3044_v52 = vadd.f32 %v2905_v10, %v7549_v27  ;;  %v3045_v58 = vadd.f32 %v2905_v10, %v7550_v60  ;;  %v3046_v36 = vadd.f32 %v2905_v10, %v7551_v45  ;;  %v7553_v39 = vld [vmem:[#allocation222_spill] sm:$0xff]  ;;  %v7554_v47 = vld [vmem:[#allocation223_spill] sm:$0xff] }
 0x454   : > { %3530 = vst [vmem:[%s6701_s4 + $0x318] sm:$0xff] %v3166_v7  ;;  %3255 = vst [vmem:[%s6701_s4 + $0x100] sm:$0xff] %v3159_v34  ;;  %v3039_v49 = vadd.f32 %v2900_v42, %v7552_v22  ;;  %v3040_v26 = vadd.f32 %v2900_v42, %v7553_v39  ;;  %v3041_v12 = vadd.f32 %v2900_v42, %v7554_v47  ;;  %v7555_v53 = vld [vmem:[#allocation224_spill] sm:$0xff]  ;;  %v3171_v25 = vmax.f32 %v3043_v38, 0.0  ;;  %v7556_v59 = vld [vmem:[#allocation225_spill] sm:$0xff] }
 0x455   : > { %3256 = vst [vmem:[%s6701_s4 + $0x108] sm:$0xff] %v3160_v33  ;;  %3527 = vst [vmem:[%s6701_s4 + $0x300] sm:$0xff] %v3161_v63  ;;  %v3042_v11 = vadd.f32 %v2900_v42, %v7555_v53  ;;  %v3172_v57 = vmax.f32 %v3044_v52, 0.0  ;;  %v3173_v50 = vmax.f32 %v3045_v58, 0.0  ;;  %v3174_v31 = vmax.f32 %v3046_v36, 0.0  ;;  %v2915_v55 = vpop.permute.xlu1 %2914  ;;  %v2910_v15 = vpop.permute.xlu0 %2909  ;;  %v7557_v3 = vld [vmem:[#allocation226_spill] sm:$0xff] }
 0x456   : > { %3528 = vst [vmem:[%s6701_s4 + $0x308] sm:$0xff] %v3162_v29  ;;  %v3167_v56 = vmax.f32 %v3039_v49, 0.0  ;;  %v3168_v43 = vmax.f32 %v3040_v26, 0.0  ;;  %v3169_v17 = vmax.f32 %v3041_v12, 0.0  ;;  %3261 = vst [vmem:[%s6701_s4 + $0x130] sm:$0xff] %v3171_v25  ;;  %v3051_v54 = vadd.f32 %v2915_v55, %v7556_v59  ;;  %v7558_v40 = vld [vmem:[#allocation227_spill] sm:$0xff] }
 0x457   : > { %v3170_v4 = vmax.f32 %v3042_v11, 0.0  ;;  %3262 = vst [vmem:[%s6701_s4 + $0x138] sm:$0xff] %v3172_v57  ;;  %3533 = vst [vmem:[%s6701_s4 + $0x330] sm:$0xff] %v3173_v50  ;;  %v3052_v44 = vadd.f32 %v2915_v55, %v7557_v3  ;;  %v3053_v32 = vadd.f32 %v2915_v55, %v7558_v40  ;;  %v3054_v30 = vadd.f32 %v2915_v55, %v6042_v0  ;;  %v7559_v5 = vld [vmem:[#allocation228_spill] sm:$0xff]  ;;  %v7560_v18 = vld [vmem:[#allocation229_spill] sm:$0xff] }
 0x458   : > { %3534 = vst [vmem:[%s6701_s4 + $0x338] sm:$0xff] %v3174_v31  ;;  %3259 = vst [vmem:[%s6701_s4 + $0x120] sm:$0xff] %v3167_v56  ;;  %v3047_v16 = vadd.f32 %v2910_v15, %v7559_v5  ;;  %v3048_v0 = vadd.f32 %v2910_v15, %v7560_v18  ;;  %v7561_v41 = vld [vmem:[#allocation230_spill] sm:$0xff]  ;;  %v7562_v1 = vld [vmem:[#allocation231_spill] sm:$0xff]  ;;  %v3179_v20 = vmax.f32 %v3051_v54, 0.0 }
 0x459   : > { %3260 = vst [vmem:[%s6701_s4 + $0x128] sm:$0xff] %v3168_v43  ;;  %3531 = vst [vmem:[%s6701_s4 + $0x320] sm:$0xff] %v3169_v17  ;;  %v3049_v14 = vadd.f32 %v2910_v15, %v7561_v41  ;;  %v3050_v48 = vadd.f32 %v2910_v15, %v7562_v1  ;;  %v3180_v46 = vmax.f32 %v3052_v44, 0.0  ;;  %v3181_v62 = vmax.f32 %v3053_v32, 0.0  ;;  %v2925_v21 = vpop.permute.xlu1 %2924  ;;  %v2920_v28 = vpop.permute.xlu0 %2919  ;;  %v7563_v19 = vld [vmem:[#allocation232_spill] sm:$0xff]  ;;  %v7564_v7 = vld [vmem:[#allocation233_spill] sm:$0xff] }
 0x45a   : > { %3532 = vst [vmem:[%s6701_s4 + $0x328] sm:$0xff] %v3170_v4  ;;  %v3182_v24 = vmax.f32 %v3054_v30, 0.0  ;;  %v3175_v23 = vmax.f32 %v3047_v16, 0.0  ;;  %v3176_v61 = vmax.f32 %v3048_v0, 0.0  ;;  %3265 = vst [vmem:[%s6701_s4 + $0x150] sm:$0xff] %v3179_v20  ;;  %v3059_v2 = vadd.f32 %v2925_v21, %v7563_v19  ;;  %v7565_v33 = vld [vmem:[#allocation234_spill] sm:$0xff] }
 0x45b   : > { %v3177_v51 = vmax.f32 %v3049_v14, 0.0  ;;  %v3178_v8 = vmax.f32 %v3050_v48, 0.0  ;;  %3266 = vst [vmem:[%s6701_s4 + $0x158] sm:$0xff] %v3180_v46  ;;  %3537 = vst [vmem:[%s6701_s4 + $0x350] sm:$0xff] %v3181_v62  ;;  %v3060_v34 = vadd.f32 %v2925_v21, %v7564_v7  ;;  %v3061_v63 = vadd.f32 %v2925_v21, %v7565_v33  ;;  %v7566_v10 = vld [vmem:[#allocation235_spill] sm:$0xff]  ;;  %v7567_v6 = vld [vmem:[#allocation236_spill] sm:$0xff] }
 0x45c   : > { %3538 = vst [vmem:[%s6701_s4 + $0x358] sm:$0xff] %v3182_v24  ;;  %v3062_v29 = vadd.f32 %v2925_v21, %v6066_v9  ;;  %3263 = vst [vmem:[%s6701_s4 + $0x140] sm:$0xff] %v3175_v23  ;;  %v3055_v42 = vadd.f32 %v2920_v28, %v7566_v10  ;;  %v3056_v9 = vadd.f32 %v2920_v28, %v7567_v6  ;;  %v7568_v38 = vld [vmem:[#allocation237_spill] sm:$0xff]  ;;  %v7569_v52 = vld [vmem:[#allocation238_spill] sm:$0xff]  ;;  %v3187_v58 = vmax.f32 %v3059_v2, 0.0 }
 0x45d   : > { %3264 = vst [vmem:[%s6701_s4 + $0x148] sm:$0xff] %v3176_v61  ;;  %3535 = vst [vmem:[%s6701_s4 + $0x340] sm:$0xff] %v3177_v51  ;;  %v3057_v27 = vadd.f32 %v2920_v28, %v7568_v38  ;;  %v3058_v60 = vadd.f32 %v2920_v28, %v7569_v52  ;;  %v3188_v45 = vmax.f32 %v3060_v34, 0.0  ;;  %v3189_v36 = vmax.f32 %v3061_v63, 0.0  ;;  %v2935_v12 = vpop.permute.xlu1 %2934  ;;  %v2930_v53 = vpop.permute.xlu0 %2929  ;;  %v7570_v11 = vld [vmem:[#allocation239_spill] sm:$0xff]  ;;  %v7571_v57 = vld [vmem:[#allocation240_spill] sm:$0xff] }
 0x45e   : > { %3536 = vst [vmem:[%s6701_s4 + $0x348] sm:$0xff] %v3178_v8  ;;  %v3190_v22 = vmax.f32 %v3062_v29, 0.0  ;;  %v3183_v49 = vmax.f32 %v3055_v42, 0.0  ;;  %v3184_v39 = vmax.f32 %v3056_v9, 0.0  ;;  %3269 = vst [vmem:[%s6701_s4 + $0x170] sm:$0xff] %v3187_v58  ;;  %v3067_v25 = vadd.f32 %v2935_v12, %v7570_v11  ;;  %v7572_v31 = vld [vmem:[#allocation241_spill] sm:$0xff] }
 0x45f   : > { %v3185_v26 = vmax.f32 %v3057_v27, 0.0  ;;  %v3186_v47 = vmax.f32 %v3058_v60, 0.0  ;;  %3270 = vst [vmem:[%s6701_s4 + $0x178] sm:$0xff] %v3188_v45  ;;  %3541 = vst [vmem:[%s6701_s4 + $0x370] sm:$0xff] %v3189_v36  ;;  %v3068_v50 = vadd.f32 %v2935_v12, %v7571_v57  ;;  %v3069_v56 = vadd.f32 %v2935_v12, %v7572_v31  ;;  %v7573_v17 = vld [vmem:[#allocation242_spill] sm:$0xff]  ;;  %v7574_v55 = vld [vmem:[#allocation243_spill] sm:$0xff] }
 0x460   : > { %3542 = vst [vmem:[%s6701_s4 + $0x378] sm:$0xff] %v3190_v22  ;;  %v3070_v43 = vadd.f32 %v2935_v12, %v6090_v35  ;;  %3267 = vst [vmem:[%s6701_s4 + $0x160] sm:$0xff] %v3183_v49  ;;  %v3063_v4 = vadd.f32 %v2930_v53, %v7573_v17  ;;  %v3064_v35 = vadd.f32 %v2930_v53, %v7574_v55  ;;  %v7575_v15 = vld [vmem:[#allocation244_spill] sm:$0xff]  ;;  %v7576_v54 = vld [vmem:[#allocation245_spill] sm:$0xff]  ;;  %v3195_v44 = vmax.f32 %v3067_v25, 0.0 }
 0x461   : > { %3268 = vst [vmem:[%s6701_s4 + $0x168] sm:$0xff] %v3184_v39  ;;  %3539 = vst [vmem:[%s6701_s4 + $0x360] sm:$0xff] %v3185_v26  ;;  %v3065_v59 = vadd.f32 %v2930_v53, %v7575_v15  ;;  %v3066_v3 = vadd.f32 %v2930_v53, %v7576_v54  ;;  %v3196_v40 = vmax.f32 %v3068_v50, 0.0  ;;  %v3197_v32 = vmax.f32 %v3069_v56, 0.0  ;;  %v2945_v41 = vpop.permute.xlu1 %2944  ;;  %v2940_v14 = vpop.permute.xlu0 %2939  ;;  %v7577_v1 = vld [vmem:[#allocation246_spill] sm:$0xff]  ;;  %v7578_v20 = vld [vmem:[#allocation247_spill] sm:$0xff] }
 0x462   : > { %3540 = vst [vmem:[%s6701_s4 + $0x368] sm:$0xff] %v3186_v47  ;;  %v3198_v30 = vmax.f32 %v3070_v43, 0.0  ;;  %v3191_v5 = vmax.f32 %v3063_v4, 0.0  ;;  %v3192_v16 = vmax.f32 %v3064_v35, 0.0  ;;  %3273 = vst [vmem:[%s6701_s4 + $0x190] sm:$0xff] %v3195_v44  ;;  %v3075_v48 = vadd.f32 %v2945_v41, %v7577_v1  ;;  %v7579_v62 = vld [vmem:[#allocation248_spill] sm:$0xff] }
 0x463   : > { %v3193_v18 = vmax.f32 %v3065_v59, 0.0  ;;  %v3194_v0 = vmax.f32 %v3066_v3, 0.0  ;;  %3274 = vst [vmem:[%s6701_s4 + $0x198] sm:$0xff] %v3196_v40  ;;  %3545 = vst [vmem:[%s6701_s4 + $0x390] sm:$0xff] %v3197_v32  ;;  %v3076_v46 = vadd.f32 %v2945_v41, %v7578_v20  ;;  %v3077_v24 = vadd.f32 %v2945_v41, %v7579_v62  ;;  %v7580_v61 = vld [vmem:[#allocation249_spill] sm:$0xff]  ;;  %v7581_v8 = vld [vmem:[#allocation250_spill] sm:$0xff] }
 0x464   : > { %3546 = vst [vmem:[%s6701_s4 + $0x398] sm:$0xff] %v3198_v30  ;;  %v3078_v23 = vadd.f32 %v2945_v41, %v6114_v37  ;;  %3271 = vst [vmem:[%s6701_s4 + $0x180] sm:$0xff] %v3191_v5  ;;  %v3071_v51 = vadd.f32 %v2940_v14, %v7580_v61  ;;  %v3072_v37 = vadd.f32 %v2940_v14, %v7581_v8  ;;  %v7582_v21 = vld [vmem:[#allocation251_spill] sm:$0xff]  ;;  %v7583_v19 = vld [vmem:[#allocation252_spill] sm:$0xff]  ;;  %v3203_v7 = vmax.f32 %v3075_v48, 0.0 }
 0x465   : > { %3272 = vst [vmem:[%s6701_s4 + $0x188] sm:$0xff] %v3192_v16  ;;  %3543 = vst [vmem:[%s6701_s4 + $0x380] sm:$0xff] %v3193_v18  ;;  %v3073_v28 = vadd.f32 %v2940_v14, %v7582_v21  ;;  %v3074_v2 = vadd.f32 %v2940_v14, %v7583_v19  ;;  %v3204_v34 = vmax.f32 %v3076_v46, 0.0  ;;  %v3205_v33 = vmax.f32 %v3077_v24, 0.0  ;;  %v2955_v9 = vpop.permute.xlu1 %2954  ;;  %v2950_v38 = vpop.permute.xlu0 %2949  ;;  %v7584_v27 = vld [vmem:[#allocation253_spill] sm:$0xff]  ;;  %v7585_v60 = vld [vmem:[#allocation254_spill] sm:$0xff] }
 0x466   : > { %3544 = vst [vmem:[%s6701_s4 + $0x388] sm:$0xff] %v3194_v0  ;;  %v3206_v63 = vmax.f32 %v3078_v23, 0.0  ;;  %v3199_v29 = vmax.f32 %v3071_v51, 0.0  ;;  %v3200_v10 = vmax.f32 %v3072_v37, 0.0  ;;  %3277 = vst [vmem:[%s6701_s4 + $0x1b0] sm:$0xff] %v3203_v7  ;;  %v3083_v52 = vadd.f32 %v2955_v9, %v7584_v27  ;;  %v7586_v45 = vld [vmem:[#allocation255_spill] sm:$0xff] }
 0x467   : > { %v3201_v42 = vmax.f32 %v3073_v28, 0.0  ;;  %v3202_v6 = vmax.f32 %v3074_v2, 0.0  ;;  %3278 = vst [vmem:[%s6701_s4 + $0x1b8] sm:$0xff] %v3204_v34  ;;  %3549 = vst [vmem:[%s6701_s4 + $0x3b0] sm:$0xff] %v3205_v33  ;;  %v3084_v58 = vadd.f32 %v2955_v9, %v7585_v60  ;;  %v3085_v36 = vadd.f32 %v2955_v9, %v7586_v45  ;;  %v7587_v22 = vld [vmem:[#allocation256_spill] sm:$0xff]  ;;  %v7588_v39 = vld [vmem:[#allocation257_spill] sm:$0xff] }
 0x468   : > { %3550 = vst [vmem:[%s6701_s4 + $0x3b8] sm:$0xff] %v3206_v63  ;;  %v3086_v49 = vadd.f32 %v2955_v9, %v7587_v22  ;;  %3275 = vst [vmem:[%s6701_s4 + $0x1a0] sm:$0xff] %v3199_v29  ;;  %v3079_v26 = vadd.f32 %v2950_v38, %v7588_v39  ;;  %v7589_v47 = vld [vmem:[#allocation258_spill] sm:$0xff]  ;;  %v7590_v53 = vld [vmem:[#allocation259_spill] sm:$0xff]  ;;  %v3082_v25 = vadd.f32 %v2950_v38, %v6150_v13  ;;  %v3211_v57 = vmax.f32 %v3083_v52, 0.0 }
 0x469   : > { %3276 = vst [vmem:[%s6701_s4 + $0x1a8] sm:$0xff] %v3200_v10  ;;  %3547 = vst [vmem:[%s6701_s4 + $0x3a0] sm:$0xff] %v3201_v42  ;;  %v3080_v12 = vadd.f32 %v2950_v38, %v7589_v47  ;;  %v3081_v11 = vadd.f32 %v2950_v38, %v7590_v53  ;;  %v3212_v50 = vmax.f32 %v3084_v58, 0.0  ;;  %v3213_v31 = vmax.f32 %v3085_v36, 0.0  ;;  %v2965_v35 = vpop.permute.xlu1 %2964  ;;  %v2960_v15 = vpop.permute.xlu0 %2959  ;;  %v7591_v13 = vld [vmem:[#allocation260_spill] sm:$0xff]  ;;  %v7592_v54 = vld [vmem:[#allocation261_spill] sm:$0xff] }
 0x46a   : > { %3548 = vst [vmem:[%s6701_s4 + $0x3a8] sm:$0xff] %v3202_v6  ;;  %v3214_v56 = vmax.f32 %v3086_v49, 0.0  ;;  %v3207_v43 = vmax.f32 %v3079_v26, 0.0  ;;  %v3210_v55 = vmax.f32 %v3082_v25, 0.0  ;;  %3281 = vst [vmem:[%s6701_s4 + $0x1d0] sm:$0xff] %v3211_v57  ;;  %v3091_v59 = vadd.f32 %v2965_v35, %v7591_v13  ;;  %v7593_v44 = vld [vmem:[#allocation262_spill] sm:$0xff] }
 0x46b   : > { %v3208_v17 = vmax.f32 %v3080_v12, 0.0  ;;  %v3209_v4 = vmax.f32 %v3081_v11, 0.0  ;;  %3282 = vst [vmem:[%s6701_s4 + $0x1d8] sm:$0xff] %v3212_v50  ;;  %3553 = vst [vmem:[%s6701_s4 + $0x3d0] sm:$0xff] %v3213_v31  ;;  %v3092_v3 = vadd.f32 %v2965_v35, %v7592_v54  ;;  %v3093_v40 = vadd.f32 %v2965_v35, %v7593_v44  ;;  %v7594_v32 = vld [vmem:[#allocation263_spill] sm:$0xff]  ;;  %v7595_v5 = vld [vmem:[#allocation264_spill] sm:$0xff] }
 0x46c   : > { %3554 = vst [vmem:[%s6701_s4 + $0x3d8] sm:$0xff] %v3214_v56  ;;  %v3094_v30 = vadd.f32 %v2965_v35, %v7594_v32  ;;  %3279 = vst [vmem:[%s6701_s4 + $0x1c0] sm:$0xff] %v3207_v43  ;;  %v3087_v16 = vadd.f32 %v2960_v15, %v7595_v5  ;;  %v7596_v18 = vld [vmem:[#allocation265_spill] sm:$0xff]  ;;  %v7597_v41 = vld [vmem:[#allocation266_spill] sm:$0xff]  ;;  %v3219_v20 = vmax.f32 %v3091_v59, 0.0 }
 0x46d   : > { %3280 = vst [vmem:[%s6701_s4 + $0x1c8] sm:$0xff] %v3208_v17  ;;  %3551 = vst [vmem:[%s6701_s4 + $0x3c0] sm:$0xff] %v3209_v4  ;;  %v3088_v0 = vadd.f32 %v2960_v15, %v7596_v18  ;;  %v3089_v14 = vadd.f32 %v2960_v15, %v7597_v41  ;;  %v7598_v1 = vld [vmem:[#allocation267_spill] sm:$0xff]  ;;  %v3220_v46 = vmax.f32 %v3092_v3, 0.0  ;;  %v3221_v62 = vmax.f32 %v3093_v40, 0.0 }
 0x46e   : > { %3552 = vst [vmem:[%s6701_s4 + $0x3c8] sm:$0xff] %v3210_v55  ;;  %v3090_v48 = vadd.f32 %v2960_v15, %v7598_v1  ;;  %v3222_v24 = vmax.f32 %v3094_v30, 0.0  ;;  %v3215_v23 = vmax.f32 %v3087_v16, 0.0  ;;  %3285 = vst [vmem:[%s6701_s4 + $0x1f0] sm:$0xff] %v3219_v20 }
 0x46f   : > { %v3216_v61 = vmax.f32 %v3088_v0, 0.0  ;;  %v3217_v51 = vmax.f32 %v3089_v14, 0.0  ;;  %3286 = vst [vmem:[%s6701_s4 + $0x1f8] sm:$0xff] %v3220_v46  ;;  %3557 = vst [vmem:[%s6701_s4 + $0x3f0] sm:$0xff] %v3221_v62 }
 0x470   : > { %v3218_v8 = vmax.f32 %v3090_v48, 0.0  ;;  %3558 = vst [vmem:[%s6701_s4 + $0x3f8] sm:$0xff] %v3222_v24  ;;  %3283 = vst [vmem:[%s6701_s4 + $0x1e0] sm:$0xff] %v3215_v23 }
 0x471   : > { %3284 = vst [vmem:[%s6701_s4 + $0x1e8] sm:$0xff] %v3216_v61  ;;  %3555 = vst [vmem:[%s6701_s4 + $0x3e0] sm:$0xff] %v3217_v51 }
 0x472   : > { %3556 = vst [vmem:[%s6701_s4 + $0x3e8] sm:$0xff] %v3218_v8 }
 0x473 PF: > { %s14_s17 = sadd.s32 1, %s3711_s17   ;;  %s7599_s15 = smov %s3707_s16 }
 0x474   : > { %p11_p7 = scmp.ge.s32.totalorder %s14_s17, 4   ;;  %s7600_s16 = smov %s7602_s18 }
 0x476   :  { %13 = sbr.rel (!%p11_p7) target bundleno = 2 (0x2), region = 83 }

</bundles_post_ra>
